<compile_context>
chip_gen: v5e
topology: v5e:2x2
jax: 0.10.0
libtpu: 0.0.40
codegen_flags: <defaults>
</compile_context>

<pallas_src>
import jax
import jax.numpy as jnp
from jax.experimental import pallas as pl
from jax.experimental.pallas import tpu as pltpu

N = 25          # node_num (skeleton joints)
NFEAT = 16
NHID1 = 32
NHID2 = 16
ATT_HID = 16    # Attention hidden_size default
G = 5           # graphs packed per grid step -> G*N = 125 sublane rows


def _pack_params(params):
    (w11, b11, w12, b12, w21, b21, w22, b22,
     wc1, bc1, wc2, bc2, aw1, ab1, aw2) = params

    # Layer-1 slab: column order [SGCN1 | CGCN | SGCN2] so the sadj branch
    # consumes contiguous cols [0,64) and the Adj branch cols [32,96).
    # Last row carries the biases.
    w1 = jnp.concatenate([w11, wc1, w21], axis=1)            # (16, 96)
    b1 = jnp.concatenate([b11, bc1, b21], axis=1)            # (1, 96)
    w1s = jnp.concatenate([w1, b1], axis=0)                  # (17, 96)

    # Layer-2 slab: block-diagonal (128, 64) so a single matmul produces all
    # four layer-2 supports; column order [emb1 | com1 | com2 | emb2].
    z = jnp.zeros((NHID1, NHID2), jnp.float32)
    w2 = jnp.concatenate([
        jnp.concatenate([w12, z,   z,   z  ], axis=1),
        jnp.concatenate([z,   wc2, z,   z  ], axis=1),
        jnp.concatenate([z,   z,   wc2, z  ], axis=1),
        jnp.concatenate([z,   z,   z,   w22], axis=1),
    ], axis=0)                                               # (128, 64)
    b2 = jnp.concatenate([b12, bc2, bc2, b22], axis=1)       # (1, 64)
    w2s = jnp.concatenate([w2, b2], axis=0)                  # (129, 64)

    # Attention slab: rows [aw1 ; ab1 ; aw2^T].
    atts = jnp.concatenate([aw1, ab1, aw2.T], axis=0)        # (18, 16)
    return w1s, w2s, atts


def sfgcn_kernel(x_ref, adjs_ref, w1s_ref, w2s_ref, atts_ref, out_ref):
    x = x_ref[...]                 # (gn, NFEAT), gn = G*N graphs stacked on sublanes
    sadj = adjs_ref[0]             # (gn, gn) block-diag skeleton adjacency
    ladj = adjs_ref[1]             # (gn, gn) block-diag learned adjacency (self.Adj)
    gn = x.shape[0]

    w1 = w1s_ref[0:NFEAT, :]                      # (16, 96)
    b1 = w1s_ref[NFEAT:NFEAT + 1, :]              # (1, 96)
    w2 = w2s_ref[0:4 * NHID1, :]                  # (128, 64)
    b2 = w2s_ref[4 * NHID1:4 * NHID1 + 1, :]      # (1, 64)
    aw1 = atts_ref[0:NHID2, :]                    # (16, 16)
    ab1 = atts_ref[NHID2:NHID2 + 1, :]            # (1, 16)
    aw2t = atts_ref[NHID2 + 1:NHID2 + 2, :]       # (1, 16) == aw2^T

    # ---- GCN layer 1: one fused support matmul; CGCN support shared ----
    # sup columns: [sup_SGCN1 | sup_CGCN | sup_SGCN2]
    sup = jnp.dot(x, w1, preferred_element_type=jnp.float32)            # (gn, 96)
    pre_s = jnp.dot(sadj, sup[:, 0:2 * NHID1],
                    preferred_element_type=jnp.float32) + b1[:, 0:2 * NHID1]
    pre_a = jnp.dot(ladj, sup[:, NHID1:3 * NHID1],
                    preferred_element_type=jnp.float32) + b1[:, NHID1:3 * NHID1]
    h_s = jnp.maximum(pre_s, 0.0)    # (gn, 64) = [h_emb1 | h_com1]
    h_a = jnp.maximum(pre_a, 0.0)    # (gn, 64) = [h_com2 | h_emb2]
    # F.dropout(training=False) is identity in eval mode.

    # ---- GCN layer 2: single (gn,128)@(128,64) block-diagonal matmul ----
    hcat = jnp.concatenate([h_s, h_a], axis=1)                           # (gn, 128)
    sup2 = jnp.dot(hcat, w2, preferred_element_type=jnp.float32)         # (gn, 64)
    out_s = jnp.dot(sadj, sup2[:, 0:2 * NHID2],
                    preferred_element_type=jnp.float32) + b2[:, 0:2 * NHID2]
    out_a = jnp.dot(ladj, sup2[:, 2 * NHID2:4 * NHID2],
                    preferred_element_type=jnp.float32) + b2[:, 2 * NHID2:4 * NHID2]

    emb1 = out_s[:, 0:NHID2]
    com1 = out_s[:, NHID2:2 * NHID2]
    com2 = out_a[:, 0:NHID2]
    emb2 = out_a[:, NHID2:2 * NHID2]
    xcom = (com1 + com2) * 0.5

    # ---- attention over the 3 views: one fused scoring chain ----
    zc = jnp.concatenate([emb1, emb2, xcom], axis=0)                     # (3*gn, 16)
    h = jnp.tanh(jnp.dot(zc, aw1, preferred_element_type=jnp.float32) + ab1)
    s = jnp.sum(h * aw2t, axis=1, keepdims=True)                         # (3*gn, 1)
    s1 = s[0:gn]
    s2 = s[gn:2 * gn]
    s3 = s[2 * gn:3 * gn]

    m = jnp.maximum(jnp.maximum(s1, s2), s3)
    e1 = jnp.exp(s1 - m)
    e2 = jnp.exp(s2 - m)
    e3 = jnp.exp(s3 - m)
    inv = pl.reciprocal(e1 + e2 + e3, approx=True)
    out_ref[...] = (e1 * emb1 + e2 * emb2 + e3 * xcom) * inv


def sfgcn_forward(x, sadj, adj, params, graphs_per_step=G):
    """x: (B, N, NFEAT) batch of graphs; sadj/adj: (N, N) shared parameters."""
    B = x.shape[0]
    g = graphs_per_step
    assert B % g == 0, "batch must be divisible by graphs_per_step"
    steps = B // g
    gn = g * N

    w1s, w2s, atts = _pack_params(params)
    eye_g = jnp.eye(g, dtype=jnp.float32)
    # Block-diagonal adjacency so g graphs share every MXU matmul.
    adjs = jnp.stack([jnp.kron(eye_g, sadj), jnp.kron(eye_g, adj)], axis=0)  # (2, gn, gn)

    x_blk = x.reshape(steps, gn, NFEAT)

    out = pl.pallas_call(
        sfgcn_kernel,
        out_shape=jax.ShapeDtypeStruct((steps, gn, NHID2), jnp.float32),
        grid_spec=pltpu.PrefetchScalarGridSpec(
            num_scalar_prefetch=0,
            grid=(steps,),
            in_specs=[
                pl.BlockSpec((None, gn, NFEAT), lambda s: (s, 0, 0)),
                pl.BlockSpec((2, gn, gn), lambda s: (0, 0, 0)),
                pl.BlockSpec((NFEAT + 1, 3 * NHID1), lambda s: (0, 0)),
                pl.BlockSpec((4 * NHID1 + 1, 4 * NHID2), lambda s: (0, 0)),
                pl.BlockSpec((NHID2 + 2, ATT_HID), lambda s: (0, 0)),
            ],
            out_specs=pl.BlockSpec((None, gn, NHID2), lambda s: (s, 0, 0)),
        ),
        compiler_params=pltpu.CompilerParams(
            dimension_semantics=("parallel",)),
    )(x_blk, adjs, w1s, w2s, atts)
    return out.reshape(B, N, NHID2)


def sfgcn_reference(x, sadj, adj, params):
    (w11, b11, w12, b12, w21, b21, w22, b22,
     wc1, bc1, wc2, bc2, aw1, ab1, aw2) = params

    def gcn(xx, a, w1, b1, w2, b2):
        h = jnp.maximum(a @ (xx @ w1) + b1, 0.0)
        return a @ (h @ w2) + b2

    def single(xx):
        emb1 = gcn(xx, sadj, w11, b11, w12, b12)
        com1 = gcn(xx, sadj, wc1, bc1, wc2, bc2)
        com2 = gcn(xx, adj, wc1, bc1, wc2, bc2)
        emb2 = gcn(xx, adj, w21, b21, w22, b22)
        xcom = (com1 + com2) / 2.0
        emb = jnp.stack([emb1, emb2, xcom], axis=1)          # (N, 3, nhid2)
        w = jnp.tanh(emb @ aw1 + ab1) @ aw2                  # (N, 3, 1)
        beta = jax.nn.softmax(w, axis=1)
        return (beta * emb).sum(axis=1)

    return jax.vmap(single)(x)


def make_params(key):
    ks = jax.random.split(key, 16)

    def u(k, shape, scale=0.3):
        return jax.random.uniform(k, shape, jnp.float32, -scale, scale)

    params = [
        u(ks[0], (NFEAT, NHID1)), u(ks[1], (1, NHID1)),
        u(ks[2], (NHID1, NHID2)), u(ks[3], (1, NHID2)),      # SGCN1
        u(ks[4], (NFEAT, NHID1)), u(ks[5], (1, NHID1)),
        u(ks[6], (NHID1, NHID2)), u(ks[7], (1, NHID2)),      # SGCN2
        u(ks[8], (NFEAT, NHID1)), u(ks[9], (1, NHID1)),
        u(ks[10], (NHID1, NHID2)), u(ks[11], (1, NHID2)),    # CGCN
        u(ks[12], (NHID2, ATT_HID)), u(ks[13], (1, ATT_HID)),
        u(ks[14], (ATT_HID, 1)),                             # Attention
    ]
    return params, ks[15]


if __name__ == "__main__":
    key = jax.random.PRNGKey(0)
    params, key = make_params(key)
    k_x, k_sadj, k_adj = jax.random.split(key, 3)

    B = 10
    x = jax.random.normal(k_x, (B, N, NFEAT), jnp.float32)

    # synthetic symmetric-normalized skeleton adjacency (stand-in for Spatial_Graph().A_ske)
    raw = jax.random.uniform(k_sadj, (N, N), jnp.float32)
    a_sym = (raw + raw.T) * 0.5 + jnp.eye(N, dtype=jnp.float32)
    deg = jnp.sum(a_sym, axis=1, keepdims=True)
    sadj = a_sym / jnp.sqrt(deg) / jnp.sqrt(deg.T)

    adj = jax.random.uniform(k_adj, (N, N), jnp.float32, -0.1, 0.1)  # self.Adj parameter

    out = sfgcn_forward(x, sadj, adj, params)
    out = jax.block_until_ready(out)

    ref = sfgcn_reference(x, sadj, adj, params)
    assert out.shape == (B, N, NHID2)
    # tolerance loosened vs 1e-4 because of the approximate (EUP) softmax reciprocal
    assert jnp.allclose(out, ref, atol=1e-2, rtol=1e-2), "mismatch vs reference"

    print("KERNEL_OK")
</pallas_src>

<mosaic_0001>
module attributes {stable_mosaic.version = 11 : i64} {
  func.func @sfgcn_kernel(%arg0: i32, %arg1: memref<1x125x16xf32, #tpu.memory_space<vmem>>, %arg2: memref<2x125x125xf32, #tpu.memory_space<vmem>>, %arg3: memref<17x96xf32, #tpu.memory_space<vmem>>, %arg4: memref<129x64xf32, #tpu.memory_space<vmem>>, %arg5: memref<18x16xf32, #tpu.memory_space<vmem>>, %arg6: memref<1x125x16xf32, #tpu.memory_space<vmem>>) attributes {dimension_semantics = [#tpu.dimension_semantics<parallel>], iteration_bounds = array<i64: 2>, scalar_prefetch = 0 : i64, scratch_operands = 0 : i64, tpu.core_type = #tpu.core_type<tc>, window_params = [{transform_indices = @transform_0, window_bounds = array<i64: 1, 125, 16>}, {pipeline_mode = #tpu.pipeline_mode<synchronous>, transform_indices = @transform_1, window_bounds = array<i64: 2, 125, 125>}, {pipeline_mode = #tpu.pipeline_mode<synchronous>, transform_indices = @transform_2, window_bounds = array<i64: 17, 96>}, {pipeline_mode = #tpu.pipeline_mode<synchronous>, transform_indices = @transform_3, window_bounds = array<i64: 129, 64>}, {pipeline_mode = #tpu.pipeline_mode<synchronous>, transform_indices = @transform_4, window_bounds = array<i64: 18, 16>}, {transform_indices = @transform_5, window_bounds = array<i64: 1, 125, 16>}]} {
    %c0 = arith.constant 0 : index
    %c0_0 = arith.constant 0 : index
    %c0_1 = arith.constant 0 : index
    %0 = vector.load %arg1[%c0, %c0_0, %c0_1] : memref<1x125x16xf32, #tpu.memory_space<vmem>>, vector<1x125x16xf32>
    %1 = vector.shape_cast %0 : vector<1x125x16xf32> to vector<125x16xf32>
    %c0_2 = arith.constant 0 : index
    %c0_3 = arith.constant 0 : index
    %c0_4 = arith.constant 0 : index
    %2 = vector.load %arg2[%c0_2, %c0_3, %c0_4] : memref<2x125x125xf32, #tpu.memory_space<vmem>>, vector<1x125x125xf32>
    %3 = vector.shape_cast %2 : vector<1x125x125xf32> to vector<125x125xf32>
    %c1 = arith.constant 1 : index
    %c0_5 = arith.constant 0 : index
    %c0_6 = arith.constant 0 : index
    %4 = vector.load %arg2[%c1, %c0_5, %c0_6] : memref<2x125x125xf32, #tpu.memory_space<vmem>>, vector<1x125x125xf32>
    %5 = vector.shape_cast %4 : vector<1x125x125xf32> to vector<125x125xf32>
    %c0_7 = arith.constant 0 : index
    %c0_8 = arith.constant 0 : index
    %6 = vector.load %arg3[%c0_7, %c0_8] : memref<17x96xf32, #tpu.memory_space<vmem>>, vector<16x96xf32>
    %c16 = arith.constant 16 : index
    %c0_9 = arith.constant 0 : index
    %7 = vector.load %arg3[%c16, %c0_9] : memref<17x96xf32, #tpu.memory_space<vmem>>, vector<1x96xf32>
    %c0_10 = arith.constant 0 : index
    %c0_11 = arith.constant 0 : index
    %8 = vector.load %arg4[%c0_10, %c0_11] : memref<129x64xf32, #tpu.memory_space<vmem>>, vector<128x64xf32>
    %c128 = arith.constant 128 : index
    %c0_12 = arith.constant 0 : index
    %9 = vector.load %arg4[%c128, %c0_12] : memref<129x64xf32, #tpu.memory_space<vmem>>, vector<1x64xf32>
    %c0_13 = arith.constant 0 : index
    %c0_14 = arith.constant 0 : index
    %10 = vector.load %arg5[%c0_13, %c0_14] : memref<18x16xf32, #tpu.memory_space<vmem>>, vector<16x16xf32>
    %c16_15 = arith.constant 16 : index
    %c0_16 = arith.constant 0 : index
    %11 = vector.load %arg5[%c16_15, %c0_16] : memref<18x16xf32, #tpu.memory_space<vmem>>, vector<1x16xf32>
    %c17 = arith.constant 17 : index
    %c0_17 = arith.constant 0 : index
    %12 = vector.load %arg5[%c17, %c0_17] : memref<18x16xf32, #tpu.memory_space<vmem>>, vector<1x16xf32>
    %cst = arith.constant dense<0.000000e+00> : vector<125x96xf32>
    %13 = tpu.matmul %1, %6, %cst {dimension_numbers = #tpu.dot_dimension_numbers<[1], [0], [0], [1], [0, 0, 1, 1], [], []>} : vector<125x16xf32>, vector<16x96xf32>, vector<125x96xf32> -> vector<125x96xf32>
    %14 = vector.extract_strided_slice %13 {offsets = [0, 0], sizes = [125, 64], strides = [1, 1]} : vector<125x96xf32> to vector<125x64xf32>
    %cst_18 = arith.constant dense<0.000000e+00> : vector<125x64xf32>
    %15 = tpu.matmul %3, %14, %cst_18 {dimension_numbers = #tpu.dot_dimension_numbers<[1], [0], [0], [1], [0, 0, 1, 1], [], []>} : vector<125x125xf32>, vector<125x64xf32>, vector<125x64xf32> -> vector<125x64xf32>
    %16 = vector.extract_strided_slice %7 {offsets = [0, 0], sizes = [1, 64], strides = [1, 1]} : vector<1x96xf32> to vector<1x64xf32>
    %17 = vector.broadcast %16 : vector<1x64xf32> to vector<125x64xf32>
    %18 = arith.addf %15, %17 : vector<125x64xf32>
    %19 = vector.extract_strided_slice %13 {offsets = [0, 32], sizes = [125, 64], strides = [1, 1]} : vector<125x96xf32> to vector<125x64xf32>
    %cst_19 = arith.constant dense<0.000000e+00> : vector<125x64xf32>
    %20 = tpu.matmul %5, %19, %cst_19 {dimension_numbers = #tpu.dot_dimension_numbers<[1], [0], [0], [1], [0, 0, 1, 1], [], []>} : vector<125x125xf32>, vector<125x64xf32>, vector<125x64xf32> -> vector<125x64xf32>
    %21 = vector.extract_strided_slice %7 {offsets = [0, 32], sizes = [1, 64], strides = [1, 1]} : vector<1x96xf32> to vector<1x64xf32>
    %22 = vector.broadcast %21 : vector<1x64xf32> to vector<125x64xf32>
    %23 = arith.addf %20, %22 : vector<125x64xf32>
    %cst_20 = arith.constant 0.000000e+00 : f32
    %24 = vector.broadcast %cst_20 : f32 to vector<125x64xf32>
    %25 = arith.maximumf %18, %24 : vector<125x64xf32>
    %cst_21 = arith.constant 0.000000e+00 : f32
    %26 = vector.broadcast %cst_21 : f32 to vector<125x64xf32>
    %27 = arith.maximumf %23, %26 : vector<125x64xf32>
    %28 = tpu.concatenate %25, %27 in 1 : vector<125x64xf32>, vector<125x64xf32> -> vector<125x128xf32>
    %cst_22 = arith.constant dense<0.000000e+00> : vector<125x64xf32>
    %29 = tpu.matmul %28, %8, %cst_22 {dimension_numbers = #tpu.dot_dimension_numbers<[1], [0], [0], [1], [0, 0, 1, 1], [], []>} : vector<125x128xf32>, vector<128x64xf32>, vector<125x64xf32> -> vector<125x64xf32>
    %30 = vector.extract_strided_slice %29 {offsets = [0, 0], sizes = [125, 32], strides = [1, 1]} : vector<125x64xf32> to vector<125x32xf32>
    %cst_23 = arith.constant dense<0.000000e+00> : vector<125x32xf32>
    %31 = tpu.matmul %3, %30, %cst_23 {dimension_numbers = #tpu.dot_dimension_numbers<[1], [0], [0], [1], [0, 0, 1, 1], [], []>} : vector<125x125xf32>, vector<125x32xf32>, vector<125x32xf32> -> vector<125x32xf32>
    %32 = vector.extract_strided_slice %9 {offsets = [0, 0], sizes = [1, 32], strides = [1, 1]} : vector<1x64xf32> to vector<1x32xf32>
    %33 = vector.broadcast %32 : vector<1x32xf32> to vector<125x32xf32>
    %34 = arith.addf %31, %33 : vector<125x32xf32>
    %35 = vector.extract_strided_slice %29 {offsets = [0, 32], sizes = [125, 32], strides = [1, 1]} : vector<125x64xf32> to vector<125x32xf32>
    %cst_24 = arith.constant dense<0.000000e+00> : vector<125x32xf32>
    %36 = tpu.matmul %5, %35, %cst_24 {dimension_numbers = #tpu.dot_dimension_numbers<[1], [0], [0], [1], [0, 0, 1, 1], [], []>} : vector<125x125xf32>, vector<125x32xf32>, vector<125x32xf32> -> vector<125x32xf32>
    %37 = vector.extract_strided_slice %9 {offsets = [0, 32], sizes = [1, 32], strides = [1, 1]} : vector<1x64xf32> to vector<1x32xf32>
    %38 = vector.broadcast %37 : vector<1x32xf32> to vector<125x32xf32>
    %39 = arith.addf %36, %38 : vector<125x32xf32>
    %40 = vector.extract_strided_slice %34 {offsets = [0, 0], sizes = [125, 16], strides = [1, 1]} : vector<125x32xf32> to vector<125x16xf32>
    %41 = vector.extract_strided_slice %34 {offsets = [0, 16], sizes = [125, 16], strides = [1, 1]} : vector<125x32xf32> to vector<125x16xf32>
    %42 = vector.extract_strided_slice %39 {offsets = [0, 0], sizes = [125, 16], strides = [1, 1]} : vector<125x32xf32> to vector<125x16xf32>
    %43 = vector.extract_strided_slice %39 {offsets = [0, 16], sizes = [125, 16], strides = [1, 1]} : vector<125x32xf32> to vector<125x16xf32>
    %44 = arith.addf %41, %42 : vector<125x16xf32>
    %cst_25 = arith.constant 5.000000e-01 : f32
    %45 = vector.broadcast %cst_25 : f32 to vector<125x16xf32>
    %46 = arith.mulf %44, %45 : vector<125x16xf32>
    %47 = tpu.concatenate %40, %43, %46 in 0 : vector<125x16xf32>, vector<125x16xf32>, vector<125x16xf32> -> vector<375x16xf32>
    %cst_26 = arith.constant dense<0.000000e+00> : vector<375x16xf32>
    %48 = tpu.matmul %47, %10, %cst_26 {dimension_numbers = #tpu.dot_dimension_numbers<[1], [0], [0], [1], [0, 0, 1, 1], [], []>} : vector<375x16xf32>, vector<16x16xf32>, vector<375x16xf32> -> vector<375x16xf32>
    %49 = vector.broadcast %11 : vector<1x16xf32> to vector<375x16xf32>
    %50 = arith.addf %48, %49 : vector<375x16xf32>
    %51 = math.tanh %50 : vector<375x16xf32>
    %52 = vector.broadcast %12 : vector<1x16xf32> to vector<375x16xf32>
    %53 = arith.mulf %51, %52 : vector<375x16xf32>
    %cst_27 = arith.constant dense<0.000000e+00> : vector<375xf32>
    %54 = vector.multi_reduction <add>, %53, %cst_27 [1] : vector<375x16xf32> to vector<375xf32>
    %55 = vector.shape_cast %54 : vector<375xf32> to vector<375x1xf32>
    %56 = vector.extract_strided_slice %55 {offsets = [0, 0], sizes = [125, 1], strides = [1, 1]} : vector<375x1xf32> to vector<125x1xf32>
    %57 = vector.extract_strided_slice %55 {offsets = [125, 0], sizes = [125, 1], strides = [1, 1]} : vector<375x1xf32> to vector<125x1xf32>
    %58 = vector.extract_strided_slice %55 {offsets = [250, 0], sizes = [125, 1], strides = [1, 1]} : vector<375x1xf32> to vector<125x1xf32>
    %59 = arith.maximumf %56, %57 : vector<125x1xf32>
    %60 = arith.maximumf %59, %58 : vector<125x1xf32>
    %61 = arith.subf %56, %60 : vector<125x1xf32>
    %62 = math.exp %61 : vector<125x1xf32>
    %63 = arith.subf %57, %60 : vector<125x1xf32>
    %64 = math.exp %63 : vector<125x1xf32>
    %65 = arith.subf %58, %60 : vector<125x1xf32>
    %66 = math.exp %65 : vector<125x1xf32>
    %67 = arith.addf %62, %64 : vector<125x1xf32>
    %68 = arith.addf %67, %66 : vector<125x1xf32>
    %69 = tpu.reciprocal %68 {approx = true} : vector<125x1xf32> -> vector<125x1xf32>
    %70 = vector.broadcast %62 : vector<125x1xf32> to vector<125x16xf32>
    %71 = arith.mulf %70, %40 : vector<125x16xf32>
    %72 = vector.broadcast %64 : vector<125x1xf32> to vector<125x16xf32>
    %73 = arith.mulf %72, %43 : vector<125x16xf32>
    %74 = arith.addf %71, %73 : vector<125x16xf32>
    %75 = vector.broadcast %66 : vector<125x1xf32> to vector<125x16xf32>
    %76 = arith.mulf %75, %46 : vector<125x16xf32>
    %77 = arith.addf %74, %76 : vector<125x16xf32>
    %78 = vector.broadcast %69 : vector<125x1xf32> to vector<125x16xf32>
    %79 = arith.mulf %77, %78 : vector<125x16xf32>
    %c0_28 = arith.constant 0 : index
    %c0_29 = arith.constant 0 : index
    %c0_30 = arith.constant 0 : index
    %80 = vector.load %arg6[%c0_28, %c0_29, %c0_30] : memref<1x125x16xf32, #tpu.memory_space<vmem>>, vector<1x125x16xf32>
    %81 = vector.shape_cast %80 : vector<1x125x16xf32> to vector<125x16xf32>
    %82 = vector.shape_cast %79 : vector<125x16xf32> to vector<1x125x16xf32>
    tpu.vector_store %arg6[%c0_28, %c0_29, %c0_30], %82 {strides = array<i32>} : memref<1x125x16xf32, #tpu.memory_space<vmem>>, vector<1x125x16xf32>,
    return
  }
  func.func @transform_0(%arg0: i32) -> (i32, i32, i32) {
    %c0_i32 = arith.constant 0 : i32
    %c0_i32_0 = arith.constant 0 : i32
    %c0_i32_1 = arith.constant 0 : i32
    return %arg0, %c0_i32, %c0_i32_0 : i32, i32, i32
  }
  func.func @transform_1(%arg0: i32) -> (i32, i32, i32) {
    %c0_i32 = arith.constant 0 : i32
    %c0_i32_0 = arith.constant 0 : i32
    %c0_i32_1 = arith.constant 0 : i32
    %c0_i32_2 = arith.constant 0 : i32
    return %c0_i32, %c0_i32_0, %c0_i32_1 : i32, i32, i32
  }
  func.func @transform_2(%arg0: i32) -> (i32, i32) {
    %c0_i32 = arith.constant 0 : i32
    %c0_i32_0 = arith.constant 0 : i32
    %c0_i32_1 = arith.constant 0 : i32
    return %c0_i32, %c0_i32_0 : i32, i32
  }
  func.func @transform_3(%arg0: i32) -> (i32, i32) {
    %c0_i32 = arith.constant 0 : i32
    %c0_i32_0 = arith.constant 0 : i32
    %c0_i32_1 = arith.constant 0 : i32
    return %c0_i32, %c0_i32_0 : i32, i32
  }
  func.func @transform_4(%arg0: i32) -> (i32, i32) {
    %c0_i32 = arith.constant 0 : i32
    %c0_i32_0 = arith.constant 0 : i32
    %c0_i32_1 = arith.constant 0 : i32
    return %c0_i32, %c0_i32_0 : i32, i32
  }
  func.func @transform_5(%arg0: i32) -> (i32, i32, i32) {
    %c0_i32 = arith.constant 0 : i32
    %c0_i32_0 = arith.constant 0 : i32
    %c0_i32_1 = arith.constant 0 : i32
    return %arg0, %c0_i32, %c0_i32_0 : i32, i32, i32
  }
}

</mosaic_0001>

<bundles_post_ra>
// kernel: tpu_custom_call.1
= control target key start
LH: loop header
LB: loop body
LE: loop exit
PB: predicated region body
PF: predicated region fallthrough
CT: control target
= control target key end

     0   :  { %s3587_s18 = smov 0   ;;  %s5335_s0 = inlined_call_operand.vmem [shape: f32[2,125,16], index: 0, kind: input, shape index: {}]   ;;  %s5336_s1 = inlined_call_operand.vmem [shape: f32[2,125,125], index: 1, kind: input, shape index: {}]   ;;  %s5337_s2 = inlined_call_operand.vmem [shape: f32[17,96], index: 2, kind: input, shape index: {}]   ;;  %s5338_s3 = inlined_call_operand.vmem [shape: f32[129,64], index: 3, kind: input, shape index: {}]   ;;  %s5339_s4 = inlined_call_operand.vmem [shape: f32[18,16], index: 4, kind: input, shape index: {}]   ;;  %s5340_s5 = inlined_call_operand.vmem [shape: f32[2,125,16], index: 5, kind: output, shape index: {}]  }
   0x1 LB: > { %s3062_s19 = sadd.s32 4294967295, %s3550_s18   ;;  %p3066_p0 = scmp.ge.s32.totalorder %s3550_s18, 1  ;;  %s3550_s18 = sphi %s3587_s18, %s15_s18  }
   0x2   : > { %p187_p1 = scmp.lt.s32.totalorder %s3550_s18, 3 }
   0x4   : > { %p188_p2 = pnand %p3066_p0, %p187_p1 }
   0x6   : > { %191 = sbr.rel (%p188_p2) target bundleno = 2212 (0x8a4), region = 40 }
   0xb   : > { %v275_v0 = vld [vmem:[%s5337_s2 + $0x8] sm:$0xff]  ;;  %v274_v1 = vld [vmem:[%s5337_s2] sm:$0xff]  ;;  %p215_p3 = scmp.lt.s32.totalorder %s3062_s19, 1  ;;  %vm298_vm0 = vcmask 130048   ;;  %vm462_vm1 = vcmask 1044480   ;;  %s3552_s28 = smov 96  }
   0xc   : > { %361 = vmatpush.msra.mxu0 %v275_v0  ;;  %3222 = vmatpush.msra.mxu1 %v275_v0  ;;  %v3657_v55 = vld [vmem:[%s5337_s2 + $0x10] ss:$0 sm:$0xff]  ;;  %v3664_v0 = vld [vmem:[%s5336_s1 + $0x80] sm:$0xff]  ;;  %vm413_vm2 = vcmask 1022976   ;;  %s3553_s14 = smov 64   ;;  %vm808_vm3 = vcmask 523264  }
   0xd   : > { %s5472_s19 = smov (!%p215_p3, %s3062_s19), 1  ;;  %s3554_s29 = smov 16   ;;  %vm1271_vm4 = vcmask 1041408   ;;  %vm1841_vm5 = vcmask 129024   ;;  %vm1862_vm6 = vcmask 1042432   ;;  %vm1943_vm7 = vcmask 1045504  }
   0xe   : > { %362 = vmatpush.msra.mxu0 %v274_v1  ;;  %3223 = vmatpush.msra.mxu1 %v274_v1  ;;  %s3220_s24 = sshll.u32 %s5472_s19, 7  ;;  %s3555_s30 = smov 112   ;;  %vm3005_vm8 = vcmask 126976  }
   0xf   : > { %s3609_s27 = scalar_lea.vmem %s5335_s0, %s3220_s24  ;;  %s5180_s17 = scalar_lea.vmem %s5340_s5, %s3220_s24 }
  0x10   : > { %v225_v2 = vld [vmem:[%s3609_s27] sm:$0xff]  ;;  %v226_v4 = vld [vmem:[%s3609_s27 + $0x8] sm:$0xff]  ;;  %v227_v6 = vld [vmem:[%s3609_s27 + $0x10] sm:$0xff] }
  0x11   : > { %v237_v3 = vld [vmem:[%s3609_s27 + $0x60] sm:$0xff]  ;;  %3087 = vmatmul.msk.f32.vlgmr.msra.gmra.mxu0 %vm298_vm0, %v225_v2  ;;  %v238_v5 = vld [vmem:[%s3609_s27 + $0x68] sm:$0xff]  ;;  %v239_v7 = vld [vmem:[%s3609_s27 + $0x70] sm:$0xff] }
  0x12   : > { %3099 = vmatmul.msk.f32.vlgmr.msra.gmra.mxu1 %vm298_vm0, %v237_v3  ;;  %v228_v8 = vld [vmem:[%s3609_s27 + $0x18] sm:$0xff]  ;;  %v229_v10 = vld [vmem:[%s3609_s27 + $0x20] sm:$0xff]  ;;  %v230_v11 = vld [vmem:[%s3609_s27 + $0x28] sm:$0xff] }
  0x13   : > { %v240_v9 = vld [vmem:[%s3609_s27 + $0x78] sm:$0x1f]  ;;  %v231_v12 = vld [vmem:[%s3609_s27 + $0x30] sm:$0xff]  ;;  %v233_v14 = vld [vmem:[%s3609_s27 + $0x40] sm:$0xff] }
  0x14   : > { %v232_v13 = vld [vmem:[%s3609_s27 + $0x38] sm:$0xff]  ;;  %v234_v15 = vld [vmem:[%s3609_s27 + $0x48] sm:$0xff]  ;;  %v235_v16 = vld [vmem:[%s3609_s27 + $0x50] sm:$0xff] }
  0x15   : > { %v236_v17 = vld [vmem:[%s3609_s27 + $0x58] sm:$0xff]  ;;  %v3671_v2 = vld [vmem:[%s5336_s1 + $0x88] sm:$0xff]  ;;  %v3678_v3 = vld [vmem:[%s5336_s1 + $0x90] sm:$0xff] }
  0x19   : > { %3088 = vmatmul.msk.f32.gmra.mxu0 %vm298_vm0, %v226_v4  ;;  %v3685_v4 = vld [vmem:[%s5336_s1 + $0x98] sm:$0xff] }
  0x1a   : > { %3100 = vmatmul.msk.f32.gmra.mxu1 %vm298_vm0, %v238_v5  ;;  %v3692_v5 = vld [vmem:[%s5336_s1 + $0xa0] sm:$0xff] }
  0x21   : > { %3089 = vmatmul.msk.f32.gmra.mxu0 %vm298_vm0, %v227_v6  ;;  %v3699_v6 = vld [vmem:[%s5336_s1 + $0xa8] sm:$0xff] }
  0x22   : > { %3101 = vmatmul.msk.f32.gmra.mxu1 %vm298_vm0, %v239_v7  ;;  %v3706_v7 = vld [vmem:[%s5336_s1 + $0xb0] sm:$0xff] }
  0x29   : > { %3090 = vmatmul.msk.f32.gmra.mxu0 %vm298_vm0, %v228_v8  ;;  %v3713_v8 = vld [vmem:[%s5336_s1 + $0xb8] sm:$0xff] }
  0x2a   : > { %3102 = vmatmul.msk.f32.gmra.mxu1 %vm298_vm0, %v240_v9  ;;  %v3720_v9 = vld [vmem:[%s5336_s1 + $0xc0] sm:$0xff] }
  0x31   : > { %3091 = vmatmul.msk.f32.gmra.mxu0 %vm298_vm0, %v229_v10  ;;  %v3727_v10 = vld [vmem:[%s5336_s1] sm:$0xff] }
  0x39   : > { %3092 = vmatmul.msk.f32.gmra.mxu0 %vm298_vm0, %v230_v11  ;;  %v3734_v11 = vld [vmem:[%s5336_s1 + $0xc8] sm:$0xff] }
  0x41   : > { %3093 = vmatmul.msk.f32.gmra.mxu0 %vm298_vm0, %v231_v12  ;;  %v3741_v12 = vld [vmem:[%s5336_s1 + $0x8] sm:$0xff] }
  0x49   : > { %3094 = vmatmul.msk.f32.gmra.mxu0 %vm298_vm0, %v232_v13  ;;  %v3748_v13 = vld [vmem:[%s5336_s1 + $0xd0] sm:$0xff] }
  0x51   : > { %3095 = vmatmul.msk.f32.gmra.mxu0 %vm298_vm0, %v233_v14  ;;  %v3755_v14 = vld [vmem:[%s5336_s1 + $0x10] sm:$0xff] }
  0x59   : > { %3096 = vmatmul.msk.f32.gmra.mxu0 %vm298_vm0, %v234_v15  ;;  %v3762_v15 = vld [vmem:[%s5336_s1 + $0xd8] sm:$0xff] }
  0x61   : > { %3097 = vmatmul.msk.f32.gmra.mxu0 %vm298_vm0, %v235_v16  ;;  %v3769_v16 = vld [vmem:[%s5336_s1 + $0x18] sm:$0xff] }
  0x69   : > { %3098 = vmatmul.msk.f32.gmra.mxu0 %vm298_vm0, %v236_v17  ;;  %v3776_v17 = vld [vmem:[%s5336_s1 + $0xe0] sm:$0xff] }
  0x8e   : > { %v364_v18 = vpop.f32.mrf.mxu0 }
  0x8f   : > { %v400_v19 = vpop.f32.mrf.mxu1 }
  0x96   : > { %v367_v20 = vpop.f32.mrf.mxu0 }
  0x97   : > { %v403_v21 = vpop.f32.mrf.mxu1 }
  0x9e   : > { %v370_v22 = vpop.f32.mrf.mxu0 }
  0x9f   : > { %v406_v23 = vpop.f32.mrf.mxu1  ;;  %v3271_v40 = vpack.i.bf16 %v367_v20, %v370_v22 }
  0xa0   : > { %v3241_v26 = vpack.i.bf16 %v403_v21, %v406_v23 }
  0xa6   : > { %v373_v24 = vpop.f32.mrf.mxu0 }
  0xa7   : > { %v409_v25 = vpop.f32.mrf.mxu1 }
  0xa8   : > { %576 = vrot.lane.b32.xlu0 %v409_v25, %s3552_s28  ;;  %3103 = vmatpush.msk.msrb.mxu1 %vm462_vm1, %v409_v25  ;;  %v3832_v25 = vld [vmem:[%s5336_s1 + $0x40] sm:$0xff] }
  0xaa   : > { %467 = vmatpush.msrb.mxu1 %v406_v23  ;;  %v3818_v23 = vld [vmem:[%s5336_s1 + $0xf8] sm:$0x1f] }
  0xac   : > { %468 = vmatpush.msrb.mxu1 %v403_v21  ;;  %v3804_v21 = vld [vmem:[%s5336_s1 + $0xf0] sm:$0xff] }
  0xae   : > { %469 = vmatpush.msrb.mxu1 %v400_v19  ;;  %v376_v27 = vpop.f32.mrf.mxu0 }
  0xaf   : > { %v3266_v28 = vpack.i.bf16 %v373_v24, %v376_v27 }
  0xb0   : > { %3242 = vrot.lane.b32.xlu0 %v3241_v26, %s3552_s28 }
  0xb6   : > { %v379_v29 = vpop.f32.mrf.mxu0 }
  0xb8   : > { %3267 = vrot.lane.b32.xlu0 %v3266_v28, %s3552_s28 }
  0xbe   : > { %v382_v30 = vpop.f32.mrf.mxu0 }
  0xbf   : > { %v3261_v35 = vpack.i.bf16 %v379_v29, %v382_v30 }
  0xc0   : > { %594 = vrot.lane.b32.xlu0 %v3657_v55, %s3552_s28 }
  0xc6   : > { %v385_v31 = vpop.f32.mrf.mxu0 }
  0xce   : > { %v388_v32 = vpop.f32.mrf.mxu0 }
  0xcf   : > { %v3256_v33 = vpack.i.bf16 %v385_v31, %v388_v32 }
  0xd1   : > { %3257 = vrot.lane.b32.xlu2 %v3256_v33, %s3552_s28 }
  0xd6   : > { %v391_v34 = vpop.f32.mrf.mxu0 }
  0xd9   : > { %3262 = vrot.lane.b32.xlu2 %v3261_v35, %s3552_s28 }
  0xde   : > { %v394_v36 = vpop.f32.mrf.mxu0 }
  0xdf   : > { %v3251_v39 = vpack.i.bf16 %v391_v34, %v394_v36 }
  0xe1   : > { %546 = vrot.lane.b32.xlu2 %v364_v18, %s3552_s28 }
  0xe6   : > { %v397_v37 = vpop.f32.mrf.mxu0 }
  0xe7   : > { %470 = vmatpush.msrb.mxu1 %v397_v37  ;;  %v3246_v38 = vpack.i.bf16 %v397_v37, %v400_v19  ;;  %v3790_v19 = vld [vmem:[%s5336_s1 + $0xe8] sm:$0xff] }
  0xe9   : > { %3247 = vrot.lane.b32.xlu1 %v3246_v38, %s3552_s28  ;;  %471 = vmatpush.msrb.mxu1 %v394_v36  ;;  %v3861_v38 = vld [vmem:[%s5336_s1 + $0x58] sm:$0xff] }
  0xeb   : > { %472 = vmatpush.msrb.mxu1 %v391_v34  ;;  %v3852_v34 = vld [vmem:[%s5336_s1 + $0x50] sm:$0xff] }
  0xed   : > { %473 = vmatpush.msrb.mxu1 %v388_v32 }
  0xef   : > { %474 = vmatpush.msrb.mxu1 %v385_v31 }
  0xf1   : > { %3252 = vrot.lane.b32.xlu1 %v3251_v39, %s3552_s28  ;;  %475 = vmatpush.msrb.mxu1 %v382_v30  ;;  %v3843_v30 = vld [vmem:[%s5336_s1 + $0x48] sm:$0xff] }
  0xf3   : > { %476 = vmatpush.msrb.mxu1 %v379_v29 }
  0xf5   : > { %477 = vmatpush.msrb.mxu1 %v376_v27 }
  0xf7   : > { %478 = vmatpush.msrb.mxu1 %v373_v24  ;;  %v3825_v24 = vld [vmem:[%s5336_s1 + $0x38] sm:$0xff] }
  0xf9   : > { %3272 = vrot.lane.b32.xlu1 %v3271_v40, %s3552_s28  ;;  %479 = vmatpush.msrb.mxu1 %v370_v22  ;;  %v3811_v22 = vld [vmem:[%s5336_s1 + $0x30] sm:$0xff] }
  0xfb   : > { %480 = vmatpush.msrb.mxu1 %v367_v20  ;;  %v3797_v20 = vld [vmem:[%s5336_s1 + $0x28] sm:$0xff] }
  0xfd   : > { %481 = vmatpush.msrb.mxu1 %v364_v18  ;;  %v3781_v18 = vld [vmem:[%s5336_s1 + $0x20] sm:$0xff] }
  0xfe   : > { %3104 = vmatmul.msk.f32.vlgmr.msrb.gmra.mxu1 %vm413_vm2, %v3727_v10 }
 0x106   : > { %3105 = vmatmul.msk.f32.gmra.mxu1 %vm413_vm2, %v3741_v12 }
 0x10e   : > { %3106 = vmatmul.msk.f32.gmra.mxu1 %vm413_vm2, %v3755_v14 }
 0x116   : > { %3107 = vmatmul.msk.f32.gmra.mxu1 %vm413_vm2, %v3769_v16 }
 0x11a   : > { %v577_v41 = vpop.permute.xlu0 %576 }
 0x11b   : > { %3120 = vmatpush.msk.msra.mxu3 %vm462_vm1, %v577_v41 }
 0x11e   : > { %3108 = vmatmul.msk.f32.gmra.mxu1 %vm413_vm2, %v3781_v18 }
 0x122   : > { %v3243_v42 = vpop.permute.xlu0 %3242 }
 0x123   : > { %v3244_v43 = vunpack.i.l.bf16 %v3243_v42  ;;  %v3245_v44 = vunpack.i.h.bf16 %v3243_v42  ;;  %v3870_v42 = vld [vmem:[%s5336_s1 + $0x60] sm:$0xff] }
 0x125   : > { %648 = vmatpush.msra.mxu3 %v3244_v43 }
 0x126   : > { %3109 = vmatmul.msk.f32.gmra.mxu1 %vm413_vm2, %v3797_v20 }
 0x127   : > { %649 = vmatpush.msra.mxu3 %v3245_v44 }
 0x12a   : > { %v3268_v57 = vpop.permute.xlu0 %3267 }
 0x12b   : > { %v3258_v48 = vpop.permute.xlu2 %3257  ;;  %v3269_v59 = vunpack.i.l.bf16 %v3268_v57  ;;  %v3270_v61 = vunpack.i.h.bf16 %v3268_v57 }
 0x12c   : > { %v3259_v52 = vunpack.i.l.bf16 %v3258_v48  ;;  %v3260_v54 = vunpack.i.h.bf16 %v3258_v48 }
 0x12e   : > { %3110 = vmatmul.msk.f32.gmra.mxu1 %vm413_vm2, %v3811_v22 }
 0x132   : > { %v3834_v26 = vpop.permute.xlu0 %594 }
 0x133   : > { %v3263_v53 = vpop.permute.xlu2 %3262 }
 0x134   : > { %v3264_v56 = vunpack.i.l.bf16 %v3263_v53  ;;  %v3265_v58 = vunpack.i.h.bf16 %v3263_v53 }
 0x136   : > { %3111 = vmatmul.msk.f32.gmra.mxu1 %vm413_vm2, %v3825_v24 }
 0x13b   : > { %v547_v1 = vpop.permute.xlu2 %546 }
 0x13e   : > { %3112 = vmatmul.msk.f32.gmra.mxu1 %vm413_vm2, %v3832_v25 }
 0x146   : > { %3113 = vmatmul.msk.f32.gmra.mxu1 %vm413_vm2, %v3843_v30 }
 0x14e   : > { %3114 = vmatmul.msk.f32.gmra.mxu1 %vm413_vm2, %v3852_v34 }
 0x156   : > { %3115 = vmatmul.msk.f32.gmra.mxu1 %vm413_vm2, %v3861_v38 }
 0x15b   : > { %v3248_v45 = vpop.permute.xlu1 %3247 }
 0x15c   : > { %v3249_v46 = vunpack.i.l.bf16 %v3248_v45  ;;  %v3250_v47 = vunpack.i.h.bf16 %v3248_v45 }
 0x15e   : > { %650 = vmatpush.msra.mxu3 %v3249_v46  ;;  %3116 = vmatmul.msk.f32.gmra.mxu1 %vm413_vm2, %v3870_v42  ;;  %v3879_v46 = vld [vmem:[%s5336_s1 + $0x68] sm:$0xff] }
 0x160   : > { %651 = vmatpush.msra.mxu3 %v3250_v47 }
 0x163   : > { %v3253_v49 = vpop.permute.xlu1 %3252 }
 0x164   : > { %v3254_v50 = vunpack.i.l.bf16 %v3253_v49  ;;  %v3255_v51 = vunpack.i.h.bf16 %v3253_v49 }
 0x166   : > { %652 = vmatpush.msra.mxu3 %v3254_v50  ;;  %3117 = vmatmul.msk.f32.gmra.mxu1 %vm413_vm2, %v3879_v46 }
 0x168   : > { %653 = vmatpush.msra.mxu3 %v3255_v51 }
 0x16a   : > { %654 = vmatpush.msra.mxu3 %v3259_v52 }
 0x16b   : > { %v3273_v60 = vpop.permute.xlu1 %3272 }
 0x16c   : > { %655 = vmatpush.msra.mxu3 %v3260_v54  ;;  %v3274_v62 = vunpack.i.l.bf16 %v3273_v60  ;;  %v3275_v63 = vunpack.i.h.bf16 %v3273_v60  ;;  %v289_v60 = vld [vmem:[%s5338_s3 + $0x60] sm:$0xff] }
 0x16e   : > { %656 = vmatpush.msra.mxu3 %v3264_v56  ;;  %v292_v56 = vld [vmem:[%s5338_s3 + $0x78] sm:$0xff] }
 0x170   : > { %657 = vmatpush.msra.mxu3 %v3265_v58  ;;  %v291_v58 = vld [vmem:[%s5338_s3 + $0x70] sm:$0xff] }
 0x172   : > { %658 = vmatpush.msra.mxu3 %v3269_v59  ;;  %v290_v59 = vld [vmem:[%s5338_s3 + $0x68] sm:$0xff] }
 0x174   : > { %659 = vmatpush.msra.mxu3 %v3270_v61 }
 0x176   : > { %660 = vmatpush.msra.mxu3 %v3274_v62 }
 0x178   : > { %661 = vmatpush.msra.mxu3 %v3275_v63  ;;  %v288_v63 = vld [vmem:[%s5338_s3 + $0x58] sm:$0xff] }
 0x17a   : > { %662 = vmatpush.msra.mxu3 %v547_v1 }
 0x17b   : > { %3121 = vmatmul.msk.f32.vlgmr.msra.gmra.mxu3 %vm413_vm2, %v3664_v0 }
 0x17c   : > { %825 = vmatpush.msrb.mxu3 %v292_v56 }
 0x17e   : > { %826 = vmatpush.msrb.mxu3 %v291_v58 }
 0x180   : > { %827 = vmatpush.msrb.mxu3 %v290_v59 }
 0x182   : > { %828 = vmatpush.msrb.mxu3 %v289_v60 }
 0x183   : > { %3122 = vmatmul.msk.f32.gmra.mxu3 %vm413_vm2, %v3671_v2 }
 0x184   : > { %829 = vmatpush.msrb.mxu3 %v288_v63 }
 0x18b   : > { %3123 = vmatmul.msk.f32.gmra.mxu3 %vm413_vm2, %v3678_v3 }
 0x193   : > { %3124 = vmatmul.msk.f32.gmra.mxu3 %vm413_vm2, %v3685_v4 }
 0x19b   : > { %3125 = vmatmul.msk.f32.gmra.mxu3 %vm413_vm2, %v3692_v5 }
 0x1a3   : > { %3126 = vmatmul.msk.f32.gmra.mxu3 %vm413_vm2, %v3699_v6 }
 0x1ab   : > { %3127 = vmatmul.msk.f32.gmra.mxu3 %vm413_vm2, %v3706_v7 }
 0x1b3   : > { %3128 = vmatmul.msk.f32.gmra.mxu3 %vm413_vm2, %v3713_v8 }
 0x1bb   : > { %3129 = vmatmul.msk.f32.gmra.mxu3 %vm413_vm2, %v3720_v9 }
 0x1c3   : > { %3130 = vmatmul.msk.f32.gmra.mxu3 %vm413_vm2, %v3734_v11 }
 0x1cb   : > { %3131 = vmatmul.msk.f32.gmra.mxu3 %vm413_vm2, %v3748_v13 }
 0x1d3   : > { %3132 = vmatmul.msk.f32.gmra.mxu3 %vm413_vm2, %v3762_v15 }
 0x1db   : > { %3133 = vmatmul.msk.f32.gmra.mxu3 %vm413_vm2, %v3776_v17 }
 0x1e3   : > { %3134 = vmatmul.msk.f32.gmra.mxu3 %vm413_vm2, %v3790_v19 }
 0x1eb   : > { %3135 = vmatmul.msk.f32.gmra.mxu3 %vm413_vm2, %v3804_v21 }
 0x1f3   : > { %3136 = vmatmul.msk.f32.gmra.mxu3 %vm413_vm2, %v3818_v23 }
 0x1fe   : > { %v664_v27 = vpop.f32.mrf.mxu3 }
 0x1ff   : > { %v665_v28 = vadd.f32 %v664_v27, %v3834_v26  ;;  %v287_v27 = vld [vmem:[%s5338_s3 + $0x50] sm:$0xff] }
 0x200   : > { %830 = vmatpush.msrb.mxu3 %v287_v27 }
 0x201   : > { %v728_v29 = vmax.f32 %v665_v28, 0.0  ;;  %v3912_v28 = vld [vmem:[%s5336_s1 + $0x70] sm:$0xff] }
 0x202   : > { %3118 = vmatmul.msk.f32.gmra.mxu1 %vm413_vm2, %v3912_v28 }
 0x203   : > { %760 = vrot.lane.b32.xlu1 %v728_v29, %s3553_s14  ;;  %v286_v29 = vld [vmem:[%s5338_s3 + $0x48] sm:$0xff] }
 0x204   : > { %831 = vmatpush.msrb.mxu3 %v286_v29 }
 0x206   : > { %v667_v31 = vpop.f32.mrf.mxu3 }
 0x207   : > { %v668_v32 = vadd.f32 %v667_v31, %v3834_v26  ;;  %v285_v31 = vld [vmem:[%s5338_s3 + $0x40] sm:$0xff] }
 0x208   : > { %832 = vmatpush.msrb.mxu3 %v285_v31 }
 0x209   : > { %v729_v33 = vmax.f32 %v668_v32, 0.0 }
 0x20b   : > { %762 = vrot.lane.b32.xlu2 %v729_v33, %s3553_s14 }
 0x20e   : > { %v670_v35 = vpop.f32.mrf.mxu3 }
 0x20f   : > { %v671_v36 = vadd.f32 %v670_v35, %v3834_v26  ;;  %v284_v35 = vld [vmem:[%s5338_s3 + $0x38] sm:$0xff] }
 0x210   : > { %833 = vmatpush.msrb.mxu3 %v284_v35 }
 0x211   : > { %v730_v37 = vmax.f32 %v671_v36, 0.0 }
 0x213   : > { %764 = vrot.lane.b32.xlu0 %v730_v37, %s3553_s14  ;;  %v283_v37 = vld [vmem:[%s5338_s3 + $0x30] sm:$0xff] }
 0x214   : > { %834 = vmatpush.msrb.mxu3 %v283_v37 }
 0x216   : > { %v673_v39 = vpop.f32.mrf.mxu3 }
 0x217   : > { %v674_v40 = vadd.f32 %v673_v39, %v3834_v26  ;;  %v3933_v39 = vld [vmem:[%s5336_s1 + $0x78] sm:$0x1f] }
 0x218   : > { %3119 = vmatmul.msk.f32.gmra.mxu1 %vm413_vm2, %v3933_v39 }
 0x219   : > { %v731_v41 = vmax.f32 %v674_v40, 0.0  ;;  %v282_v40 = vld [vmem:[%s5338_s3 + $0x28] sm:$0xff] }
 0x21a   : > { %835 = vmatpush.msrb.mxu3 %v282_v40 }
 0x21b   : > { %766 = vrot.lane.b32.xlu1 %v731_v41, %s3553_s14  ;;  %v281_v41 = vld [vmem:[%s5338_s3 + $0x20] sm:$0xff] }
 0x21c   : > { %836 = vmatpush.msrb.mxu3 %v281_v41 }
 0x21e   : > { %v676_v43 = vpop.f32.mrf.mxu3 }
 0x21f   : > { %v677_v44 = vadd.f32 %v676_v43, %v3834_v26 }
 0x221   : > { %v732_v45 = vmax.f32 %v677_v44, 0.0 }
 0x223   : > { %768 = vrot.lane.b32.xlu2 %v732_v45, %s3553_s14  ;;  %v483_v45 = vpop.f32.mrf.mxu1 }
 0x224   : > { %v484_v27 = vadd.f32 %v3657_v55, %v483_v45 }
 0x226   : > { %v679_v47 = vpop.f32.mrf.mxu3 }
 0x227   : > { %v680_v48 = vadd.f32 %v679_v47, %v3834_v26  ;;  %v280_v47 = vld [vmem:[%s5338_s3 + $0x18] sm:$0xff] }
 0x228   : > { %837 = vmatpush.msrb.mxu3 %v280_v47 }
 0x229   : > { %v733_v49 = vmax.f32 %v680_v48, 0.0 }
 0x22b   : > { %770 = vrot.lane.b32.xlu0 %v733_v49, %s3553_s14  ;;  %v279_v49 = vld [vmem:[%s5338_s3 + $0x10] sm:$0xff]  ;;  %v486_v56 = vpop.f32.mrf.mxu1 }
 0x22c   : > { %838 = vmatpush.msrb.mxu3 %v279_v49 }
 0x22e   : > { %v682_v50 = vpop.f32.mrf.mxu3 }
 0x22f   : > { %v683_v51 = vadd.f32 %v682_v50, %v3834_v26  ;;  %v278_v50 = vld [vmem:[%s5338_s3 + $0x8] sm:$0xff] }
 0x230   : > { %839 = vmatpush.msrb.mxu3 %v278_v50 }
 0x231   : > { %v734_v52 = vmax.f32 %v683_v51, 0.0  ;;  %v277_v51 = vld [vmem:[%s5338_s3] sm:$0xff] }
 0x232   : > { %840 = vmatpush.msrb.mxu3 %v277_v51 }
 0x233   : > { %772 = vrot.lane.b32.xlu1 %v734_v52, %s3553_s14  ;;  %v489_v60 = vpop.f32.mrf.mxu1 }
 0x236   : > { %v685_v53 = vpop.f32.mrf.mxu3 }
 0x237   : > { %v686_v54 = vadd.f32 %v685_v53, %v3834_v26 }
 0x239   : > { %v735_v57 = vmax.f32 %v686_v54, 0.0 }
 0x23b   : > { %774 = vrot.lane.b32.xlu2 %v735_v57, %s3553_s14 }
 0x23e   : > { %v688_v61 = vpop.f32.mrf.mxu3 }
 0x23f   : > { %v689_v62 = vadd.f32 %v688_v61, %v3834_v26 }
 0x241   : > { %v736_v1 = vmax.f32 %v689_v62, 0.0 }
 0x243   : > { %776 = vrot.lane.b32.xlu0 %v736_v1, %s3553_s14  ;;  %v492_v1 = vpop.f32.mrf.mxu1 }
 0x246   : > { %v691_v32 = vpop.f32.mrf.mxu3 }
 0x247   : > { %v692_v33 = vadd.f32 %v691_v32, %v3834_v26 }
 0x249   : > { %v737_v36 = vmax.f32 %v692_v33, 0.0  ;;  %v712_v33 = vmax.f32 %v484_v27, 0.0 }
 0x24b   : > { %778 = vrot.lane.b32.xlu1 %v737_v36, %s3553_s14  ;;  %v487_v36 = vadd.f32 %v3657_v55, %v486_v56 }
 0x24d   : > { %v713_v45 = vmax.f32 %v487_v36, 0.0 }
 0x24e   : > { %v694_v43 = vpop.f32.mrf.mxu3 }
 0x24f   : > { %v695_v44 = vadd.f32 %v694_v43, %v3834_v26  ;;  %v495_v43 = vpop.f32.mrf.mxu1 }
 0x251   : > { %v738_v48 = vmax.f32 %v695_v44, 0.0 }
 0x253   : > { %780 = vrot.lane.b32.xlu2 %v738_v48, %s3553_s14  ;;  %v490_v48 = vadd.f32 %v3657_v55, %v489_v60 }
 0x255   : > { %v714_v51 = vmax.f32 %v490_v48, 0.0 }
 0x256   : > { %v697_v52 = vpop.f32.mrf.mxu3 }
 0x257   : > { %v698_v53 = vadd.f32 %v697_v52, %v3834_v26  ;;  %v498_v50 = vpop.f32.mrf.mxu1 }
 0x259   : > { %v739_v54 = vmax.f32 %v698_v53, 0.0  ;;  %v493_v53 = vadd.f32 %v3657_v55, %v492_v1 }
 0x25b   : > { %782 = vrot.lane.b32.xlu0 %v739_v54, %s3553_s14 }
 0x25e   : > { %v700_v57 = vpop.f32.mrf.mxu3 }
 0x25f   : > { %v701_v58 = vadd.f32 %v700_v57, %v3834_v26  ;;  %v501_v56 = vpop.f32.mrf.mxu1 }
 0x261   : > { %v740_v59 = vmax.f32 %v701_v58, 0.0  ;;  %v496_v58 = vadd.f32 %v3657_v55, %v495_v43 }
 0x263   : > { %784 = vrot.lane.b32.xlu1 %v740_v59, %s3553_s14  ;;  %v716_v60 = vmax.f32 %v496_v58, 0.0 }
 0x265   : > { %v763_v47 = vpop.permute.xlu2 %762 }
 0x266   : > { %v703_v61 = vpop.f32.mrf.mxu3  ;;  %v810_v49 = vsel %vm808_vm3, %v713_v45, %v763_v47 }
 0x267   : > { %v704_v62 = vadd.f32 %v703_v61, %v3834_v26 }
 0x269   : > { %v741_v63 = vmax.f32 %v704_v62, 0.0  ;;  %v504_v62 = vpop.f32.mrf.mxu1 }
 0x26b   : > { %786 = vrot.lane.b32.xlu2 %v741_v63, %s3553_s14  ;;  %v499_v63 = vadd.f32 %v3657_v55, %v498_v50 }
 0x26d   : > { %v717_v1 = vmax.f32 %v499_v63, 0.0 }
 0x26e   : > { %v706_v29 = vpop.f32.mrf.mxu3 }
 0x26f   : > { %v707_v31 = vadd.f32 %v706_v29, %v3834_v26 }
 0x271   : > { %v742_v32 = vmax.f32 %v707_v31, 0.0  ;;  %v502_v31 = vadd.f32 %v3657_v55, %v501_v56 }
 0x273   : > { %788 = vrot.lane.b32.xlu0 %v742_v32, %s3553_s14 }
 0x275   : > { %v761_v35 = vpop.permute.xlu1 %760 }
 0x276   : > { %v709_v37 = vpop.f32.mrf.mxu3  ;;  %v809_v40 = vsel %vm808_vm3, %v712_v33, %v761_v35  ;;  %v507_v33 = vpop.f32.mrf.mxu1  ;;  %v718_v35 = vmax.f32 %v502_v31, 0.0 }
 0x277   : > { %v710_v41 = vadd.f32 %v709_v37, %v3834_v26  ;;  %841 = vmatmul.f32.vlgmr.msrb.gmra.mxu3 %v809_v40  ;;  %v715_v26 = vmax.f32 %v493_v53, 0.0  ;;  %v505_v37 = vadd.f32 %v3657_v55, %v504_v62  ;;  %v508_v45 = vadd.f32 %v3657_v55, %v507_v33 }
 0x279   : > { %v743_v44 = vmax.f32 %v710_v41, 0.0  ;;  %v719_v43 = vmax.f32 %v505_v37, 0.0  ;;  %v720_v48 = vmax.f32 %v508_v45, 0.0 }
 0x27b   : > { %790 = vrot.lane.b32.xlu1 %v743_v44, %s3553_s14 }
 0x27d   : > { %v769_v61 = vpop.permute.xlu2 %768 }
 0x27e   : > { %v813_v27 = vsel %vm808_vm3, %v716_v60, %v769_v61  ;;  %v510_v41 = vpop.f32.mrf.mxu1 }
 0x27f   : > { %844 = vmatmul.f32.gmra.mxu3 %v810_v49 }
 0x285   : > { %v765_v52 = vpop.permute.xlu0 %764 }
 0x286   : > { %v811_v54 = vsel %vm808_vm3, %v714_v51, %v765_v52  ;;  %v513_v49 = vpop.f32.mrf.mxu1  ;;  %v511_v51 = vadd.f32 %v3657_v55, %v510_v41 }
 0x287   : > { %847 = vmatmul.f32.gmra.mxu3 %v811_v54  ;;  %v514_v56 = vadd.f32 %v3657_v55, %v513_v49 }
 0x288   : > { %v721_v53 = vmax.f32 %v511_v51, 0.0 }
 0x289   : > { %v722_v58 = vmax.f32 %v514_v56, 0.0 }
 0x28d   : > { %v767_v57 = vpop.permute.xlu1 %766 }
 0x28e   : > { %v812_v59 = vsel %vm808_vm3, %v715_v26, %v767_v57  ;;  %v516_v54 = vpop.f32.mrf.mxu1 }
 0x28f   : > { %850 = vmatmul.f32.gmra.mxu3 %v812_v59  ;;  %v517_v60 = vadd.f32 %v3657_v55, %v516_v54 }
 0x291   : > { %v723_v63 = vmax.f32 %v517_v60, 0.0 }
 0x295   : > { %v775_v44 = vpop.permute.xlu2 %774 }
 0x296   : > { %v816_v47 = vsel %vm808_vm3, %v719_v43, %v775_v44  ;;  %v519_v62 = vpop.f32.mrf.mxu1 }
 0x297   : > { %853 = vmatmul.f32.gmra.mxu3 %v813_v27 }
 0x29d   : > { %v771_v29 = vpop.permute.xlu0 %770 }
 0x29e   : > { %v814_v32 = vsel %vm808_vm3, %v717_v1, %v771_v29  ;;  %v520_v1 = vadd.f32 %v3657_v55, %v519_v62  ;;  %v522_v31 = vpop.f32.mrf.mxu1 }
 0x29f   : > { %856 = vmatmul.f32.gmra.mxu3 %v814_v32 }
 0x2a0   : > { %v724_v32 = vmax.f32 %v520_v1, 0.0 }
 0x2a5   : > { %v773_v36 = vpop.permute.xlu1 %772 }
 0x2a6   : > { %v815_v40 = vsel %vm808_vm3, %v718_v35, %v773_v36  ;;  %v523_v35 = vadd.f32 %v3657_v55, %v522_v31  ;;  %v525_v37 = vpop.f32.mrf.mxu1 }
 0x2a7   : > { %859 = vmatmul.f32.gmra.mxu3 %v815_v40  ;;  %v526_v44 = vadd.f32 %v3657_v55, %v525_v37 }
 0x2a8   : > { %v725_v40 = vmax.f32 %v523_v35, 0.0 }
 0x2a9   : > { %v726_v45 = vmax.f32 %v526_v44, 0.0 }
 0x2ad   : > { %v781_v59 = vpop.permute.xlu2 %780 }
 0x2ae   : > { %v819_v61 = vsel %vm808_vm3, %v722_v58, %v781_v59 }
 0x2af   : > { %862 = vmatmul.f32.gmra.mxu3 %v816_v47  ;;  %v528_v47 = vpop.f32.mrf.mxu1 }
 0x2b5   : > { %v777_v50 = vpop.permute.xlu0 %776 }
 0x2b6   : > { %v817_v52 = vsel %vm808_vm3, %v720_v48, %v777_v50  ;;  %v529_v50 = vadd.f32 %v3657_v55, %v528_v47 }
 0x2b7   : > { %865 = vmatmul.f32.gmra.mxu3 %v817_v52 }
 0x2b8   : > { %v727_v51 = vmax.f32 %v529_v50, 0.0 }
 0x2bd   : > { %v779_v26 = vpop.permute.xlu1 %778 }
 0x2be   : > { %v818_v57 = vsel %vm808_vm3, %v721_v53, %v779_v26 }
 0x2bf   : > { %868 = vmatmul.f32.gmra.mxu3 %v818_v57 }
 0x2c5   : > { %v787_v41 = vpop.permute.xlu2 %786 }
 0x2c6   : > { %v822_v43 = vsel %vm808_vm3, %v725_v40, %v787_v41 }
 0x2c7   : > { %871 = vmatmul.f32.gmra.mxu3 %v819_v61 }
 0x2cd   : > { %v783_v27 = vpop.permute.xlu0 %782 }
 0x2ce   : > { %v820_v29 = vsel %vm808_vm3, %v723_v63, %v783_v27 }
 0x2cf   : > { %874 = vmatmul.f32.gmra.mxu3 %v820_v29  ;;  %v4005_v29 = vld [vmem:[%s5338_s3 + $0x80] ss:$0 sm:$0xff] }
 0x2d5   : > { %v785_v33 = vpop.permute.xlu1 %784 }
 0x2d6   : > { %v821_v36 = vsel %vm808_vm3, %v724_v32, %v785_v33 }
 0x2d7   : > { %877 = vmatmul.f32.gmra.mxu3 %v821_v36 }
 0x2df   : > { %880 = vmatmul.f32.gmra.mxu3 %v822_v43 }
 0x2e5   : > { %v789_v48 = vpop.permute.xlu0 %788 }
 0x2e6   : > { %v823_v49 = vsel %vm808_vm3, %v726_v45, %v789_v48 }
 0x2e7   : > { %883 = vmatmul.f32.gmra.mxu3 %v823_v49 }
 0x2ed   : > { %v791_v52 = vpop.permute.xlu1 %790 }
 0x2ee   : > { %v824_v53 = vsel %vm808_vm3, %v727_v51, %v791_v52 }
 0x2ef   : > { %886 = vmatmul.f32.gmra.mxu3 %v824_v53 }
 0x2fa   : > { %v842_v54 = vpop.f32.mrf.mxu3 }
 0x302   : > { %v845_v26 = vpop.f32.mrf.mxu3 }
 0x303   : > { %v3276_v56 = vpack.i.bf16 %v845_v26, %v842_v54 }
 0x305   : > { %3277 = vrot.lane.b32.xlu2 %v3276_v56, %s3552_s28 }
 0x30a   : > { %v848_v57 = vpop.f32.mrf.mxu3 }
 0x312   : > { %v851_v58 = vpop.f32.mrf.mxu3 }
 0x313   : > { %v3281_v59 = vpack.i.bf16 %v851_v58, %v848_v57 }
 0x315   : > { %3282 = vrot.lane.b32.xlu0 %v3281_v59, %s3552_s28 }
 0x31a   : > { %v854_v60 = vpop.f32.mrf.mxu3 }
 0x322   : > { %v857_v61 = vpop.f32.mrf.mxu3 }
 0x32a   : > { %v860_v62 = vpop.f32.mrf.mxu3 }
 0x32b   : > { %v3301_v40 = vpack.i.bf16 %v857_v61, %v860_v62 }
 0x332   : > { %v863_v55 = vpop.f32.mrf.mxu3 }
 0x33a   : > { %v866_v63 = vpop.f32.mrf.mxu3 }
 0x33b   : > { %v3296_v27 = vpack.i.bf16 %v863_v55, %v866_v63 }
 0x33d   : > { %3297 = vrot.lane.b32.xlu2 %v3296_v27, %s3552_s28 }
 0x342   : > { %v869_v1 = vpop.f32.mrf.mxu3 }
 0x345   : > { %1022 = vrot.lane.b32.xlu2 %v4005_v29, %s3552_s28 }
 0x34a   : > { %v872_v31 = vpop.f32.mrf.mxu3 }
 0x34b   : > { %v3291_v32 = vpack.i.bf16 %v869_v1, %v872_v31 }
 0x34d   : > { %3292 = vrot.lane.b32.xlu1 %v3291_v32, %s3552_s28 }
 0x352   : > { %v875_v33 = vpop.f32.mrf.mxu3 }
 0x355   : > { %982 = vrot.lane.b32.xlu1 %v854_v60, %s3552_s28 }
 0x35a   : > { %v878_v35 = vpop.f32.mrf.mxu3 }
 0x35b   : > { %v3286_v36 = vpack.i.bf16 %v875_v33, %v878_v35 }
 0x35d   : > { %3287 = vrot.lane.b32.xlu0 %v3286_v36, %s3552_s28 }
 0x35f   : > { %v3278_v45 = vpop.permute.xlu2 %3277 }
 0x362   : > { %v881_v37 = vpop.f32.mrf.mxu3 }
 0x365   : > { %3302 = vrot.lane.b32.xlu0 %v3301_v40, %s3552_s28 }
 0x36a   : > { %v884_v41 = vpop.f32.mrf.mxu3 }
 0x36b   : > { %v3306_v43 = vpack.i.bf16 %v881_v37, %v884_v41 }
 0x36d   : > { %3307 = vrot.lane.b32.xlu2 %v3306_v43, %s3552_s28 }
 0x372   : > { %v887_v44 = vpop.f32.mrf.mxu3 }
 0x373   : > { %1004 = vrot.lane.b32.xlu1 %v887_v44, %s3552_s28  ;;  %3137 = vmatpush.msk.msrb.mxu0 %vm462_vm1, %v887_v44 }
 0x375   : > { %895 = vmatpush.msrb.mxu0 %v884_v41 }
 0x377   : > { %896 = vmatpush.msrb.mxu0 %v881_v37 }
 0x379   : > { %897 = vmatpush.msrb.mxu0 %v878_v35 }
 0x37b   : > { %898 = vmatpush.msrb.mxu0 %v875_v33 }
 0x37d   : > { %899 = vmatpush.msrb.mxu0 %v872_v31 }
 0x37f   : > { %900 = vmatpush.msrb.mxu0 %v869_v1 }
 0x381   : > { %901 = vmatpush.msrb.mxu0 %v866_v63 }
 0x383   : > { %902 = vmatpush.msrb.mxu0 %v863_v55 }
 0x385   : > { %903 = vmatpush.msrb.mxu0 %v860_v62 }
 0x387   : > { %904 = vmatpush.msrb.mxu0 %v857_v61 }
 0x389   : > { %905 = vmatpush.msrb.mxu0 %v854_v60 }
 0x38b   : > { %906 = vmatpush.msrb.mxu0 %v851_v58  ;;  %v3279_v58 = vunpack.i.l.bf16 %v3278_v45 }
 0x38d   : > { %907 = vmatpush.msrb.mxu0 %v848_v57  ;;  %v3280_v57 = vunpack.i.h.bf16 %v3278_v45 }
 0x38f   : > { %908 = vmatpush.msrb.mxu0 %v845_v26 }
 0x391   : > { %909 = vmatpush.msrb.mxu0 %v842_v54 }
 0x392   : > { %3138 = vmatmul.msk.f32.vlgmr.msrb.gmra.mxu0 %vm413_vm2, %v3727_v10 }
 0x397   : > { %v3298_v10 = vpop.permute.xlu2 %3297 }
 0x398   : > { %v3299_v51 = vunpack.i.l.bf16 %v3298_v10 }
 0x39a   : > { %3139 = vmatmul.msk.f32.gmra.mxu0 %vm413_vm2, %v3741_v12 }
 0x3a2   : > { %3140 = vmatmul.msk.f32.gmra.mxu0 %vm413_vm2, %v3755_v14  ;;  %v4034_v14 = vpop.permute.xlu2 %1022 }
 0x3aa   : > { %3141 = vmatmul.msk.f32.gmra.mxu0 %vm413_vm2, %v3769_v16 }
 0x3b2   : > { %3142 = vmatmul.msk.f32.gmra.mxu0 %vm413_vm2, %v3781_v18  ;;  %v3283_v18 = vpop.permute.xlu0 %3282 }
 0x3b3   : > { %v3285_v26 = vunpack.i.h.bf16 %v3283_v18  ;;  %v3284_v56 = vunpack.i.l.bf16 %v3283_v18 }
 0x3ba   : > { %3143 = vmatmul.msk.f32.gmra.mxu0 %vm413_vm2, %v3797_v20 }
 0x3bf   : > { %v3293_v12 = vpop.permute.xlu1 %3292 }
 0x3c0   : > { %v3295_v50 = vunpack.i.h.bf16 %v3293_v12 }
 0x3c2   : > { %3144 = vmatmul.msk.f32.gmra.mxu0 %vm413_vm2, %v3811_v22 }
 0x3c7   : > { %v983_v16 = vpop.permute.xlu1 %982  ;;  %v3308_v20 = vpop.permute.xlu2 %3307 }
 0x3c8   : > { %v3309_v47 = vunpack.i.l.bf16 %v3308_v20  ;;  %v3310_v48 = vunpack.i.h.bf16 %v3308_v20 }
 0x3ca   : > { %3145 = vmatmul.msk.f32.gmra.mxu0 %vm413_vm2, %v3825_v24 }
 0x3cf   : > { %v3288_v24 = vpop.permute.xlu0 %3287 }
 0x3d0   : > { %v3290_v49 = vunpack.i.h.bf16 %v3288_v24 }
 0x3d2   : > { %3146 = vmatmul.msk.f32.gmra.mxu0 %vm413_vm2, %v3832_v25  ;;  %v3289_v25 = vunpack.i.l.bf16 %v3288_v24  ;;  %v4180_v24 = vld [vmem:[%s5339_s4 + $0x10] ss:$0 sm:$0xff] }
 0x3d7   : > { %v3303_v52 = vpop.permute.xlu0 %3302 }
 0x3d8   : > { %v3304_v53 = vunpack.i.l.bf16 %v3303_v52  ;;  %v3305_v54 = vunpack.i.h.bf16 %v3303_v52 }
 0x3da   : > { %3147 = vmatmul.msk.f32.gmra.mxu0 %vm413_vm2, %v3843_v30  ;;  %v295_v30 = vld [vmem:[%s5339_s4 + $0x8] sm:$0xff] }
 0x3db   : > { %1464 = vmatpush.msra.mxu0 %v295_v30  ;;  %3224 = vmatpush.msra.mxu2 %v295_v30 }
 0x3dc   : > { %3225 = vmatpush.msra.mxu3 %v295_v30  ;;  %v4187_v30 = vld [vmem:[%s5339_s4 + $0x11] ss:$0 sm:$0xff] }
 0x3e2   : > { %3148 = vmatmul.msk.f32.gmra.mxu0 %vm413_vm2, %v3852_v34  ;;  %v3294_v34 = vunpack.i.l.bf16 %v3293_v12 }
 0x3e5   : > { %v1005_v22 = vpop.permute.xlu1 %1004 }
 0x3e6   : > { %3154 = vmatpush.msk.msra.mxu1 %vm462_vm1, %v1005_v22 }
 0x3e8   : > { %1028 = vmatpush.msra.mxu1 %v3309_v47 }
 0x3ea   : > { %1029 = vmatpush.msra.mxu1 %v3310_v48  ;;  %3149 = vmatmul.msk.f32.gmra.mxu0 %vm413_vm2, %v3861_v38  ;;  %v3300_v38 = vunpack.i.h.bf16 %v3298_v10 }
 0x3ec   : > { %1030 = vmatpush.msra.mxu1 %v3289_v25 }
 0x3ee   : > { %1031 = vmatpush.msra.mxu1 %v3290_v49 }
 0x3f0   : > { %1032 = vmatpush.msra.mxu1 %v3294_v34 }
 0x3f2   : > { %1033 = vmatpush.msra.mxu1 %v3295_v50  ;;  %3150 = vmatmul.msk.f32.gmra.mxu0 %vm413_vm2, %v3870_v42  ;;  %v294_v42 = vld [vmem:[%s5339_s4] sm:$0xff] }
 0x3f3   : > { %1465 = vmatpush.msra.mxu0 %v294_v42  ;;  %3226 = vmatpush.msra.mxu2 %v294_v42 }
 0x3f4   : > { %1034 = vmatpush.msra.mxu1 %v3299_v51  ;;  %3227 = vmatpush.msra.mxu3 %v294_v42 }
 0x3f6   : > { %1035 = vmatpush.msra.mxu1 %v3300_v38 }
 0x3f8   : > { %1036 = vmatpush.msra.mxu1 %v3304_v53 }
 0x3fa   : > { %1037 = vmatpush.msra.mxu1 %v3305_v54  ;;  %3151 = vmatmul.msk.f32.gmra.mxu0 %vm413_vm2, %v3879_v46 }
 0x3fc   : > { %1038 = vmatpush.msra.mxu1 %v983_v16 }
 0x3fe   : > { %1039 = vmatpush.msra.mxu1 %v3285_v26 }
 0x400   : > { %1040 = vmatpush.msra.mxu1 %v3284_v56 }
 0x402   : > { %1041 = vmatpush.msra.mxu1 %v3280_v57  ;;  %3152 = vmatmul.msk.f32.gmra.mxu0 %vm413_vm2, %v3912_v28 }
 0x404   : > { %1042 = vmatpush.msra.mxu1 %v3279_v58 }
 0x405   : > { %3155 = vmatmul.msk.f32.vlgmr.msra.gmra.mxu1 %vm413_vm2, %v3664_v0 }
 0x40a   : > { %3153 = vmatmul.msk.f32.gmra.mxu0 %vm413_vm2, %v3933_v39 }
 0x40d   : > { %3156 = vmatmul.msk.f32.gmra.mxu1 %vm413_vm2, %v3671_v2 }
 0x40f   : > { %v911_v46 = vpop.f32.mrf.mxu0 }
 0x410   : > { %v4062_v28 = vadd.f32 %v4005_v29, %v911_v46 }
 0x412   : > { %3171 = vmatmul.msk.f32.vlgmr.msra.gmra.mxu0 %vm298_vm0, %v4062_v28 }
 0x415   : > { %3157 = vmatmul.msk.f32.gmra.mxu1 %vm413_vm2, %v3678_v3 }
 0x417   : > { %v914_v0 = vpop.f32.mrf.mxu0 }
 0x418   : > { %v4069_v2 = vadd.f32 %v4005_v29, %v914_v0 }
 0x41a   : > { %5385 = vst [vmem:[#allocation2_spill] sm:$0xff] %v4069_v2  ;;  %3172 = vmatmul.msk.f32.gmra.mxu0 %vm298_vm0, %v4069_v2 }
 0x41d   : > { %3158 = vmatmul.msk.f32.gmra.mxu1 %vm413_vm2, %v3685_v4 }
 0x41f   : > { %v917_v39 = vpop.f32.mrf.mxu0 }
 0x420   : > { %v4076_v59 = vadd.f32 %v4005_v29, %v917_v39 }
 0x422   : > { %5386 = vst [vmem:[#allocation3_spill] sm:$0xff] %v4076_v59  ;;  %3173 = vmatmul.msk.f32.gmra.mxu0 %vm298_vm0, %v4076_v59 }
 0x425   : > { %3159 = vmatmul.msk.f32.gmra.mxu1 %vm413_vm2, %v3692_v5 }
 0x427   : > { %v920_v3 = vpop.f32.mrf.mxu0 }
 0x428   : > { %v4083_v60 = vadd.f32 %v4005_v29, %v920_v3 }
 0x42a   : > { %5387 = vst [vmem:[#allocation4_spill] sm:$0xff] %v4083_v60  ;;  %3174 = vmatmul.msk.f32.gmra.mxu0 %vm298_vm0, %v4083_v60 }
 0x42d   : > { %3160 = vmatmul.msk.f32.gmra.mxu1 %vm413_vm2, %v3699_v6 }
 0x42f   : > { %v923_v4 = vpop.f32.mrf.mxu0 }
 0x430   : > { %v4090_v61 = vadd.f32 %v4005_v29, %v923_v4 }
 0x432   : > { %5388 = vst [vmem:[#allocation5_spill] sm:$0xff] %v4090_v61  ;;  %3175 = vmatmul.msk.f32.gmra.mxu0 %vm298_vm0, %v4090_v61 }
 0x435   : > { %3161 = vmatmul.msk.f32.gmra.mxu1 %vm413_vm2, %v3706_v7 }
 0x437   : > { %v926_v5 = vpop.f32.mrf.mxu0 }
 0x438   : > { %v4097_v62 = vadd.f32 %v4005_v29, %v926_v5 }
 0x43a   : > { %5389 = vst [vmem:[#allocation6_spill] sm:$0xff] %v4097_v62  ;;  %3176 = vmatmul.msk.f32.gmra.mxu0 %vm298_vm0, %v4097_v62 }
 0x43d   : > { %3162 = vmatmul.msk.f32.gmra.mxu1 %vm413_vm2, %v3713_v8 }
 0x43f   : > { %v929_v6 = vpop.f32.mrf.mxu0 }
 0x440   : > { %v4104_v55 = vadd.f32 %v4005_v29, %v929_v6 }
 0x442   : > { %5390 = vst [vmem:[#allocation7_spill] sm:$0xff] %v4104_v55  ;;  %3177 = vmatmul.msk.f32.gmra.mxu0 %vm298_vm0, %v4104_v55 }
 0x445   : > { %3163 = vmatmul.msk.f32.gmra.mxu1 %vm413_vm2, %v3720_v9 }
 0x447   : > { %v932_v7 = vpop.f32.mrf.mxu0 }
 0x448   : > { %v4111_v63 = vadd.f32 %v4005_v29, %v932_v7 }
 0x44a   : > { %5391 = vst [vmem:[#allocation8_spill] sm:$0xff] %v4111_v63  ;;  %3178 = vmatmul.msk.f32.gmra.mxu0 %vm298_vm0, %v4111_v63 }
 0x44d   : > { %3164 = vmatmul.msk.f32.gmra.mxu1 %vm413_vm2, %v3734_v11 }
 0x44f   : > { %v935_v8 = vpop.f32.mrf.mxu0 }
 0x450   : > { %v4118_v27 = vadd.f32 %v4005_v29, %v935_v8 }
 0x452   : > { %5392 = vst [vmem:[#allocation9_spill] sm:$0xff] %v4118_v27  ;;  %3179 = vmatmul.msk.f32.gmra.mxu0 %vm298_vm0, %v4118_v27 }
 0x455   : > { %3165 = vmatmul.msk.f32.gmra.mxu1 %vm413_vm2, %v3748_v13 }
 0x457   : > { %v938_v9 = vpop.f32.mrf.mxu0 }
 0x458   : > { %v4125_v1 = vadd.f32 %v4005_v29, %v938_v9 }
 0x45a   : > { %5393 = vst [vmem:[#allocation10_spill] sm:$0xff] %v4125_v1  ;;  %3180 = vmatmul.msk.f32.vlgmr.msra.gmra.mxu2 %vm298_vm0, %v4125_v1 }
 0x45d   : > { %3166 = vmatmul.msk.f32.gmra.mxu1 %vm413_vm2, %v3762_v15 }
 0x45f   : > { %v941_v11 = vpop.f32.mrf.mxu0 }
 0x460   : > { %v4132_v31 = vadd.f32 %v4005_v29, %v941_v11 }
 0x462   : > { %5394 = vst [vmem:[#allocation11_spill] sm:$0xff] %v4132_v31  ;;  %3181 = vmatmul.msk.f32.gmra.mxu2 %vm298_vm0, %v4132_v31 }
 0x465   : > { %3167 = vmatmul.msk.f32.gmra.mxu1 %vm413_vm2, %v3776_v17 }
 0x467   : > { %v944_v13 = vpop.f32.mrf.mxu0 }
 0x468   : > { %v4139_v32 = vadd.f32 %v4005_v29, %v944_v13 }
 0x46a   : > { %5395 = vst [vmem:[#allocation12_spill] sm:$0xff] %v4139_v32  ;;  %3182 = vmatmul.msk.f32.gmra.mxu2 %vm298_vm0, %v4139_v32 }
 0x46d   : > { %3168 = vmatmul.msk.f32.gmra.mxu1 %vm413_vm2, %v3790_v19 }
 0x46f   : > { %v947_v15 = vpop.f32.mrf.mxu0 }
 0x470   : > { %v4146_v33 = vadd.f32 %v4005_v29, %v947_v15 }
 0x472   : > { %5396 = vst [vmem:[#allocation13_spill] sm:$0xff] %v4146_v33  ;;  %3183 = vmatmul.msk.f32.gmra.mxu2 %vm298_vm0, %v4146_v33 }
 0x475   : > { %3169 = vmatmul.msk.f32.gmra.mxu1 %vm413_vm2, %v3804_v21 }
 0x477   : > { %v950_v17 = vpop.f32.mrf.mxu0 }
 0x478   : > { %v4153_v35 = vadd.f32 %v4005_v29, %v950_v17 }
 0x47a   : > { %5397 = vst [vmem:[#allocation14_spill] sm:$0xff] %v4153_v35  ;;  %3184 = vmatmul.msk.f32.gmra.mxu2 %vm298_vm0, %v4153_v35 }
 0x47d   : > { %3170 = vmatmul.msk.f32.gmra.mxu1 %vm413_vm2, %v3818_v23 }
 0x47f   : > { %v953_v19 = vpop.f32.mrf.mxu0 }
 0x480   : > { %v4160_v36 = vadd.f32 %v4005_v29, %v953_v19 }
 0x482   : > { %5398 = vst [vmem:[#allocation15_spill] sm:$0xff] %v4160_v36  ;;  %v1044_v37 = vpop.f32.mrf.mxu1  ;;  %3185 = vmatmul.msk.f32.gmra.mxu2 %vm298_vm0, %v4160_v36 }
 0x483   : > { %v1045_v21 = vadd.f32 %v1044_v37, %v4034_v14 }
 0x485   : > { %v1188_v40 = vrot.slane %v1045_v21, 3  ;;  %1108 = vrot.lane.b32.xlu0 %v1045_v21, %s3554_s29 }
 0x487   : > { %1219 = vrot.lane.b32.xlu1 %v1188_v40, %s3555_s30  ;;  %v956_v16 = vpop.f32.mrf.mxu0 }
 0x48a   : > { %v1047_v41 = vpop.f32.mrf.mxu1 }
 0x48b   : > { %v1048_v23 = vadd.f32 %v1047_v41, %v4034_v14 }
 0x48d   : > { %v1189_v43 = vrot.slane %v1048_v23, 3 }
 0x48f   : > { %1110 = vrot.lane.b32.xlu1 %v1048_v23, %s3554_s29  ;;  %v1190_v44 = vsel %vm462_vm1, %v1188_v40, %v1189_v43  ;;  %v1467_v47 = vpop.f32.mrf.mxu0 }
 0x490   : > { %1221 = vrot.lane.b32.xlu2 %v1190_v44, %s3555_s30  ;;  %v1468_v48 = vadd.f32 %v4180_v24, %v1467_v47 }
 0x492   : > { %v1050_v45 = vpop.f32.mrf.mxu1  ;;  %3318 = vtanh.f32 %v1468_v48 }
 0x493   : > { %v1051_v10 = vadd.f32 %v1050_v45, %v4034_v14  ;;  %v4218_v45 = vadd.f32 %v4005_v29, %v956_v16 }
 0x495   : > { %v1191_v12 = vrot.slane %v1051_v10, 3  ;;  %5399 = vst [vmem:[#allocation16_spill] sm:$0xff] %v4218_v45 }
 0x497   : > { %v1192_v18 = vsel %vm462_vm1, %v1189_v43, %v1191_v12  ;;  %v1470_v25 = vpop.f32.mrf.mxu0 }
 0x498   : > { %1223 = vrot.lane.b32.xlu0 %v1192_v18, %s3555_s30  ;;  %1112 = vrot.lane.b32.xlu2 %v1051_v10, %s3554_s29  ;;  %v1471_v49 = vadd.f32 %v4180_v24, %v1470_v25  ;;  %v3319_v34 = vpop.eup %3318 }
 0x499   : > { %v1656_v50 = vmul.f32 %v3319_v34, %v4187_v30 }
 0x49a   : > { %v1053_v20 = vpop.f32.mrf.mxu1  ;;  %3320 = vtanh.f32 %v1471_v49 }
 0x49b   : > { %v1054_v22 = vadd.f32 %v1053_v20, %v4034_v14  ;;  %v1703_v52 = vsel %vm298_vm0, %v1656_v50, 0.0 }
 0x49d   : > { %v1193_v0 = vrot.slane %v1054_v22, 3 }
 0x49f   : > { %v1473_v51 = vpop.f32.mrf.mxu0  ;;  %v1194_v4 = vsel %vm462_vm1, %v1191_v12, %v1193_v0 }
 0x4a0   : > { %1114 = vrot.lane.b32.xlu0 %v1054_v22, %s3554_s29  ;;  %v1474_v38 = vadd.f32 %v4180_v24, %v1473_v51  ;;  %v3321_v53 = vpop.eup %3320 }
 0x4a1   : > { %v1657_v26 = vmul.f32 %v3321_v53, %v4187_v30 }
 0x4a2   : > { %v1056_v54 = vpop.f32.mrf.mxu1  ;;  %3322 = vtanh.f32 %v1474_v38 }
 0x4a3   : > { %v1706_v56 = vsel %vm298_vm0, %v1657_v26, 0.0  ;;  %v1057_v3 = vadd.f32 %v1056_v54, %v4034_v14 }
 0x4a5   : > { %v1195_v5 = vrot.slane %v1057_v3, 3 }
 0x4a7   : > { %v1196_v8 = vsel %vm462_vm1, %v1193_v0, %v1195_v5  ;;  %v1476_v21 = vpop.f32.mrf.mxu0 }
 0x4a8   : > { %v3323_v57 = vpop.eup %3322  ;;  %v1477_v10 = vadd.f32 %v4180_v24, %v1476_v21 }
 0x4a9   : > { %v1658_v58 = vmul.f32 %v3323_v57, %v4187_v30 }
 0x4aa   : > { %v1059_v42 = vpop.f32.mrf.mxu1  ;;  %3324 = vtanh.f32 %v1477_v10 }
 0x4ab   : > { %v1709_v46 = vsel %vm298_vm0, %v1658_v58, 0.0  ;;  %v1060_v6 = vadd.f32 %v1059_v42, %v4034_v14 }
 0x4ad   : > { %v1197_v9 = vrot.slane %v1060_v6, 3 }
 0x4af   : > { %v1198_v15 = vsel %vm462_vm1, %v1195_v5, %v1197_v9  ;;  %v1479_v44 = vpop.f32.mrf.mxu0 }
 0x4b0   : > { %v1480_v20 = vadd.f32 %v4180_v24, %v1479_v44  ;;  %v3325_v47 = vpop.eup %3324 }
 0x4b1   : > { %v1659_v49 = vmul.f32 %v3325_v47, %v4187_v30 }
 0x4b2   : > { %v1062_v39 = vpop.f32.mrf.mxu1  ;;  %3326 = vtanh.f32 %v1480_v20 }
 0x4b3   : > { %v1063_v11 = vadd.f32 %v1062_v39, %v4034_v14  ;;  %v1712_v51 = vsel %vm298_vm0, %v1659_v49, 0.0 }
 0x4b5   : > { %v1199_v13 = vrot.slane %v1063_v11, 3 }
 0x4b7   : > { %v1200_v17 = vsel %vm462_vm1, %v1197_v9, %v1199_v13  ;;  %v1482_v18 = vpop.f32.mrf.mxu0 }
 0x4b8   : > { %v3327_v25 = vpop.eup %3326 }
 0x4b9   : > { %1704 = vadd.xlane.f32.xlu1 %v1703_v52  ;;  %v1660_v50 = vmul.f32 %v3327_v25, %v4187_v30 }
 0x4ba   : > { %v1065_v7 = vpop.f32.mrf.mxu1 }
 0x4bb   : > { %v1066_v40 = vadd.f32 %v1065_v7, %v4034_v14  ;;  %v1715_v38 = vsel %vm298_vm0, %v1660_v50, 0.0 }
 0x4bd   : > { %v1201_v23 = vrot.slane %v1066_v40, 3 }
 0x4bf   : > { %v1485_v16 = vpop.f32.mrf.mxu0  ;;  %v1202_v58 = vsel %vm462_vm1, %v1199_v13, %v1201_v23 }
 0x4c0   : > { %v1486_v34 = vadd.f32 %v4180_v24, %v1485_v16 }
 0x4c1   : > { %1707 = vadd.xlane.f32.xlu2 %v1706_v56 }
 0x4c2   : > { %v1068_v19 = vpop.f32.mrf.mxu1  ;;  %3328 = vtanh.f32 %v1486_v34 }
 0x4c3   : > { %v4210_v37 = vadd.f32 %v1068_v19, %v4034_v14 }
 0x4c5   : > { %v1203_v41 = vrot.slane %v4210_v37, 3 }
 0x4c7   : > { %v1204_v43 = vsel %vm462_vm1, %v1201_v23, %v1203_v41  ;;  %v1488_v21 = vpop.f32.mrf.mxu0 }
 0x4c8   : > { %v3329_v53 = vpop.eup %3328 }
 0x4c9   : > { %v1662_v54 = vmul.f32 %v3329_v53, %v4187_v30 }
 0x4ca   : > { %1710 = vadd.xlane.f32.xlu0 %v1709_v46  ;;  %v1071_v26 = vpop.f32.mrf.mxu1 }
 0x4cb   : > { %v1721_v56 = vsel %vm298_vm0, %v1662_v54, 0.0  ;;  %v1072_v42 = vadd.f32 %v1071_v26, %v4034_v14 }
 0x4cd   : > { %v1205_v46 = vrot.slane %v1072_v42, 3 }
 0x4d2   : > { %1225 = vrot.lane.b32.xlu1 %v1194_v4, %s3555_s30  ;;  %v1074_v57 = vpop.f32.mrf.mxu1 }
 0x4d3   : > { %v1075_v4 = vadd.f32 %v1074_v57, %v4034_v14 }
 0x4d9   : > { %1227 = vrot.lane.b32.xlu2 %v1196_v8, %s3555_s30 }
 0x4da   : > { %1116 = vrot.lane.b32.xlu1 %v1057_v3, %s3554_s29  ;;  %v1077_v0 = vpop.f32.mrf.mxu1  ;;  %v1206_v3 = vsel %vm462_vm1, %v1203_v41, %v1205_v46 }
 0x4db   : > { %v4250_v39 = vadd.f32 %v1077_v0, %v4034_v14 }
 0x4dd   : > { %v1209_v5 = vrot.slane %v4250_v39, 3  ;;  %v1494_v47 = vpop.f32.mrf.mxu2 }
 0x4de   : > { %1229 = vrot.lane.b32.xlu0 %v1198_v15, %s3555_s30  ;;  %v1495_v49 = vadd.f32 %v4180_v24, %v1494_v47 }
 0x4e1   : > { %1118 = vrot.lane.b32.xlu2 %v1060_v6, %s3554_s29  ;;  %v1207_v6 = vrot.slane %v1075_v4, 3 }
 0x4e2   : > { %1231 = vrot.lane.b32.xlu1 %v1200_v17, %s3555_s30  ;;  %v1080_v9 = vpop.f32.mrf.mxu1 }
 0x4e3   : > { %v1210_v7 = vsel %vm462_vm1, %v1207_v6, %v1209_v5  ;;  %v4263_v13 = vadd.f32 %v1080_v9, %v4034_v14 }
 0x4e6   : > { %1120 = vrot.lane.b32.xlu0 %v1063_v11, %s3554_s29  ;;  %v1483_v11 = vadd.f32 %v4180_v24, %v1482_v18 }
 0x4e8   : > { %3330 = vtanh.f32 %v1483_v11  ;;  %v1491_v11 = vpop.f32.mrf.mxu0 }
 0x4ea   : > { %v4228_v48 = vpop.permute.xlu2 %1221  ;;  %v1083_v54 = vpop.f32.mrf.mxu1 }
 0x4eb   : > { %v4311_v0 = vadd.f32 %v1083_v54, %v4034_v14 }
 0x4ee   : > { %1235 = vrot.lane.b32.xlu0 %v1204_v43, %s3555_s30  ;;  %v1489_v43 = vadd.f32 %v4180_v24, %v1488_v21 }
 0x4f0   : > { %3332 = vtanh.f32 %v1489_v43 }
 0x4f1   : > { %3334 = vtanh.f32 %v1495_v49 }
 0x4f2   : > { %v4265_v15 = vpop.permute.xlu2 %1112  ;;  %v1086_v57 = vpop.f32.mrf.mxu1 }
 0x4f7   : > { %v4230_v29 = vpop.permute.xlu0 %1108 }
 0x4f8   : > { %v1156_v21 = vadd.f32 %v4230_v29, %v4062_v28 }
 0x4f9   : > { %v4221_v12 = vpop.permute.xlu1 %1219 }
 0x4fa   : > { %v1336_v22 = vsel %vm462_vm1, %v4218_v45, %v4221_v12 }
 0x4fb   : > { %3186 = vmatmul.msk.f32.gmra.mxu2 %vm298_vm0, %v1336_v22 }
 0x501   : > { %v4258_v8 = vpop.permute.xlu1 %1110 }
 0x503   : > { %3187 = vmatmul.msk.f32.gmra.mxu2 %vm298_vm0, %v4228_v48 }
 0x50a   : > { %v4238_v52 = vpop.permute.xlu0 %1223  ;;  %1713 = vadd.xlane.f32.xlu2 %v1712_v51 }
 0x50b   : > { %3188 = vmatmul.msk.f32.gmra.mxu2 %vm298_vm0, %v4238_v52 }
 0x50c   : > { %1716 = vadd.xlane.f32.xlu1 %v1715_v38 }
 0x512   : > { %v1115_v41 = vpop.permute.xlu0 %1114 }
 0x518   : > { %1722 = vadd.xlane.f32.xlu0 %v1721_v56  ;;  %v1208_v56 = vsel %vm462_vm1, %v1205_v46, %v1207_v6  ;;  %v1089_v6 = vpop.f32.mrf.mxu1 }
 0x522   : > { %1233 = vrot.lane.b32.xlu2 %v1202_v58, %s3555_s30  ;;  %v4307_v58 = vadd.f32 %v1086_v57, %v4034_v14 }
 0x525   : > { %1122 = vrot.lane.b32.xlu1 %v1066_v40, %s3554_s29  ;;  %v3331_v40 = vpop.eup %3330 }
 0x526   : > { %v1661_v44 = vmul.f32 %v3331_v40, %v4187_v30  ;;  %v3333_v22 = vpop.eup %3332  ;;  %v4330_v40 = vadd.f32 %v1089_v6, %v4034_v14  ;;  %v1158_v14 = vadd.f32 %v4265_v15, %v4076_v59 }
 0x527   : > { %v1663_v25 = vmul.f32 %v3333_v22, %v4187_v30  ;;  %v3335_v38 = vpop.eup %3334 }
 0x528   : > { %v1718_v10 = vsel %vm298_vm0, %v1661_v44, 0.0  ;;  %v1665_v53 = vmul.f32 %v3335_v38, %v4187_v30  ;;  %v4337_v44 = vmul.f32 0.5, %v1156_v21 }
 0x529   : > { %v1724_v50 = vsel %vm298_vm0, %v1663_v25, 0.0  ;;  %v4352_v25 = vmul.f32 0.5, %v1158_v14 }
 0x52a   : > { %v1730_v26 = vsel %vm298_vm0, %v1665_v53, 0.0  ;;  %v1272_v29 = vrot.slane %v4337_v44, 6 }
 0x52b   : > { %v1275_v15 = vrot.slane %v4352_v25, 6 }
 0x52c   : > { %1126 = vrot.lane.b32.xlu0 %v1072_v42, %s3554_s29  ;;  %v4269_v17 = vpop.xlane.xlu1 %1704  ;;  %v1211_v42 = vrot.slane %v4263_v13, 3 }
 0x52d   : > { %1237 = vrot.lane.b32.xlu1 %v1206_v3, %s3555_s30 }
 0x52e   : > { %v1212_v46 = vsel %vm462_vm1, %v1209_v5, %v1211_v42  ;;  %v1492_v5 = vadd.f32 %v4180_v24, %v1491_v11 }
 0x530   : > { %3336 = vtanh.f32 %v1492_v5 }
 0x534   : > { %1241 = vrot.lane.b32.xlu0 %v1210_v7, %s3555_s30  ;;  %v4271_v19 = vpop.xlane.xlu2 %1707  ;;  %v1213_v7 = vrot.slane %v4311_v0, 3 }
 0x53c   : > { %1132 = vrot.lane.b32.xlu0 %v4263_v13, %s3554_s29  ;;  %v4280_v18 = vpop.permute.xlu2 %1227 }
 0x53d   : > { %5401 = vst [vmem:[#allocation18_spill] sm:$0xff] %v4280_v18  ;;  %v4282_v20 = vpop.xlane.xlu0 %1710 }
 0x544   : > { %v4273_v23 = vpop.permute.xlu1 %1225  ;;  %v1119_v3 = vpop.permute.xlu2 %1118 }
 0x545   : > { %5400 = vst [vmem:[#allocation17_spill] sm:$0xff] %v4273_v23  ;;  %3189 = vmatmul.msk.f32.gmra.mxu2 %vm298_vm0, %v4273_v23  ;;  %v1161_v53 = vadd.f32 %v1119_v3, %v4097_v62  ;;  %v1497_v3 = vpop.f32.mrf.mxu2 }
 0x546   : > { %v1498_v5 = vadd.f32 %v4180_v24, %v1497_v3 }
 0x548   : > { %3338 = vtanh.f32 %v1498_v5 }
 0x54b   : > { %1719 = vadd.xlane.f32.xlu2 %v1718_v10  ;;  %v1159_v10 = vadd.f32 %v1115_v41, %v4083_v60  ;;  %v3337_v41 = vpop.eup %3336 }
 0x54c   : > { %v4286_v16 = vpop.permute.xlu1 %1116 }
 0x54d   : > { %3190 = vmatmul.msk.f32.gmra.mxu2 %vm298_vm0, %v4280_v18  ;;  %v4347_v47 = vmul.f32 0.5, %v1159_v10 }
 0x54f   : > { %v1277_v49 = vrot.slane %v4347_v47, 6 }
 0x550   : > { %v4290_v34 = vpop.permute.xlu0 %1229 }
 0x551   : > { %5402 = vst [vmem:[#allocation19_spill] sm:$0xff] %v4290_v34  ;;  %v1278_v57 = vsel %vm1271_vm4, %v1275_v15, %v1277_v49 }
 0x554   : > { %v4295_v51 = vpop.permute.xlu1 %1231 }
 0x555   : > { %3191 = vmatmul.msk.f32.gmra.mxu2 %vm298_vm0, %v4290_v34  ;;  %5403 = vst [vmem:[#allocation20_spill] sm:$0xff] %v4295_v51 }
 0x557   : > { %1725 = vadd.xlane.f32.xlu1 %v1724_v50 }
 0x558   : > { %v1121_v43 = vpop.permute.xlu0 %1120 }
 0x559   : > { %v1162_v50 = vadd.f32 %v1121_v43, %v4104_v55 }
 0x55d   : > { %3192 = vmatmul.msk.f32.gmra.mxu2 %vm298_vm0, %v4295_v51 }
 0x560   : > { %v4356_v38 = vpop.permute.xlu0 %1235 }
 0x561   : > { %5405 = vst [vmem:[#allocation22_spill] sm:$0xff] %v4356_v38 }
 0x563   : > { %1124 = vrot.lane.b32.xlu2 %v4210_v37, %s3554_s29  ;;  %v1215_v37 = vrot.slane %v4307_v58, 3 }
 0x566   : > { %1731 = vadd.xlane.f32.xlu0 %v1730_v26  ;;  %v1664_v26 = vmul.f32 %v3337_v41, %v4187_v30 }
 0x56b   : > { %1239 = vrot.lane.b32.xlu2 %v1208_v56, %s3555_s30  ;;  %v1178_v56 = vmul.f32 0.5, %v1162_v50 }
 0x56d   : > { %v1283_v6 = vrot.slane %v1178_v56, 6  ;;  %v1500_v56 = vpop.f32.mrf.mxu2 }
 0x570   : > { %1128 = vrot.lane.b32.xlu1 %v1075_v4, %s3554_s29  ;;  %v1216_v4 = vsel %vm462_vm1, %v1213_v7, %v1215_v37 }
 0x575   : > { %v1503_v3 = vpop.f32.mrf.mxu2 }
 0x578   : > { %1243 = vrot.lane.b32.xlu1 %v1212_v46, %s3555_s30  ;;  %v4371_v46 = vmul.f32 0.5, %v1161_v53 }
 0x57a   : > { %1247 = vrot.lane.b32.xlu0 %v1216_v4, %s3555_s30  ;;  %v1727_v4 = vsel %vm298_vm0, %v1664_v26, 0.0  ;;  %v1281_v11 = vrot.slane %v4371_v46, 6  ;;  %v3339_v26 = vpop.eup %3338 }
 0x57c   : > { %v1284_v10 = vsel %vm1271_vm4, %v1281_v11, %v1283_v6 }
 0x57d   : > { %v4325_v9 = vpop.xlane.xlu2 %1713 }
 0x57f   : > { %v4362_v54 = vpop.xlane.xlu1 %1716 }
 0x580   : > { %1134 = vrot.lane.b32.xlu1 %v4311_v0, %s3554_s29 }
 0x582   : > { %1138 = vrot.lane.b32.xlu0 %v4330_v40, %s3554_s29 }
 0x585   : > { %v4340_v22 = vpop.permute.xlu2 %1233 }
 0x586   : > { %5404 = vst [vmem:[#allocation21_spill] sm:$0xff] %v4340_v22  ;;  %3193 = vmatmul.msk.f32.gmra.mxu2 %vm298_vm0, %v4340_v22 }
 0x58a   : > { %1303 = vrot.lane.b32.xlu0 %v1272_v29, %s3555_s30 }
 0x58b   : > { %v4407_v13 = vpop.xlane.xlu0 %1722 }
 0x58e   : > { %3194 = vmatmul.msk.f32.gmra.mxu2 %vm298_vm0, %v4356_v38 }
 0x592   : > { %1309 = vrot.lane.b32.xlu0 %v1278_v57, %s3555_s30  ;;  %v1666_v57 = vmul.f32 %v3339_v26, %v4187_v30 }
 0x594   : > { %1728 = vadd.xlane.f32.xlu2 %v1727_v4  ;;  %v1733_v4 = vsel %vm298_vm0, %v1666_v57, 0.0 }
 0x597   : > { %v1123_v21 = vpop.permute.xlu1 %1122 }
 0x598   : > { %v1163_v43 = vadd.f32 %v1123_v21, %v4111_v63  ;;  %v1504_v21 = vadd.f32 %v4180_v24, %v1503_v3 }
 0x59a   : > { %v1179_v14 = vmul.f32 0.5, %v1163_v43  ;;  %1315 = vrot.lane.b32.xlu0 %v1284_v10, %s3555_s30  ;;  %3340 = vtanh.f32 %v1504_v21  ;;  %v1217_v43 = vrot.slane %v4330_v40, 3 }
 0x59c   : > { %v1285_v41 = vrot.slane %v1179_v14, 6 }
 0x59e   : > { %v4382_v50 = vsel %vm1271_vm4, %v1283_v6, %v1285_v41  ;;  %v1214_v6 = vsel %vm462_vm1, %v1211_v42, %v1213_v7  ;;  %v1218_v42 = vsel %vm462_vm1, %v1215_v37, %v1217_v43  ;;  %v1127_v21 = vpop.permute.xlu0 %1126 }
 0x59f   : > { %v4384_v53 = vpop.permute.xlu1 %1237 }
 0x5a0   : > { %5406 = vst [vmem:[#allocation23_spill] sm:$0xff] %v4384_v53  ;;  %3195 = vmatmul.msk.f32.gmra.mxu2 %vm298_vm0, %v4384_v53  ;;  %v3341_v5 = vpop.eup %3340 }
 0x5a1   : > { %v1668_v0 = vmul.f32 %v3341_v5, %v4187_v30 }
 0x5a3   : > { %v1739_v7 = vsel %vm298_vm0, %v1668_v0, 0.0 }
 0x5aa   : > { %1734 = vadd.xlane.f32.xlu1 %v1733_v4 }
 0x5ac   : > { %1130 = vrot.lane.b32.xlu2 %v4250_v39, %s3554_s29  ;;  %v1157_v39 = vadd.f32 %v4258_v8, %v4069_v2  ;;  %v1160_v8 = vadd.f32 %v4286_v16, %v4090_v61 }
 0x5ae   : > { %v1173_v14 = vmul.f32 0.5, %v1157_v39  ;;  %v1176_v3 = vmul.f32 0.5, %v1160_v8 }
 0x5b0   : > { %v1273_v40 = vrot.slane %v1173_v14, 6  ;;  %v1279_v39 = vrot.slane %v1176_v3, 6 }
 0x5b2   : > { %v1280_v44 = vsel %vm1271_vm4, %v1277_v49, %v1279_v39 }
 0x5b4   : > { %1245 = vrot.lane.b32.xlu2 %v1214_v6, %s3555_s30  ;;  %v1165_v6 = vadd.f32 %v1127_v21, %v4125_v1 }
 0x5b6   : > { %v1181_v0 = vmul.f32 0.5, %v1165_v6 }
 0x5b8   : > { %v1289_v14 = vrot.slane %v1181_v0, 6 }
 0x5bc   : > { %1136 = vrot.lane.b32.xlu2 %v4307_v58, %s3554_s29  ;;  %v1274_v58 = vsel %vm1271_vm4, %v1272_v29, %v1273_v40  ;;  %v1501_v29 = vadd.f32 %v4180_v24, %v1500_v56 }
 0x5be   : > { %v4404_v10 = vpop.xlane.xlu2 %1719  ;;  %3342 = vtanh.f32 %v1501_v29  ;;  %v1276_v29 = vsel %vm1271_vm4, %v1273_v40, %v1275_v15 }
 0x5c3   : > { %1249 = vrot.lane.b32.xlu1 %v1218_v42, %s3555_s30  ;;  %v4434_v42 = vpop.permute.xlu0 %1241 }
 0x5c4   : > { %1740 = vadd.xlane.f32.xlu0 %v1739_v7  ;;  %5408 = vst [vmem:[#allocation25_spill] sm:$0xff] %v4434_v42  ;;  %v3343_v47 = vpop.eup %3342 }
 0x5c5   : > { %v1667_v49 = vmul.f32 %v3343_v47, %v4187_v30 }
 0x5c6   : > { %v1125_v26 = vpop.permute.xlu2 %1124 }
 0x5c7   : > { %v1164_v57 = vadd.f32 %v1125_v26, %v4118_v27  ;;  %v1736_v56 = vsel %vm298_vm0, %v1667_v49, 0.0  ;;  %v1506_v26 = vpop.f32.mrf.mxu2 }
 0x5c9   : > { %v1180_v4 = vmul.f32 0.5, %v1164_v57 }
 0x5ca   : > { %v4440_v7 = vpop.xlane.xlu1 %1725 }
 0x5cb   : > { %v1287_v37 = vrot.slane %v1180_v4, 6  ;;  %1305 = vrot.lane.b32.xlu1 %v1274_v58, %s3555_s30  ;;  %v1507_v4 = vadd.f32 %v4180_v24, %v1506_v26  ;;  %v1133_v0 = vpop.permute.xlu0 %1132 }
 0x5cd   : > { %v4423_v5 = vsel %vm1271_vm4, %v1285_v41, %v1287_v37  ;;  %v1290_v41 = vsel %vm1271_vm4, %v1287_v37, %v1289_v14  ;;  %3344 = vtanh.f32 %v1507_v4 }
 0x5ce   : > { %v4425_v16 = vpop.permute.xlu2 %1239 }
 0x5cf   : > { %5407 = vst [vmem:[#allocation24_spill] sm:$0xff] %v4425_v16  ;;  %3196 = vmatmul.msk.f32.gmra.mxu2 %vm298_vm0, %v4425_v16  ;;  %v1509_v3 = vpop.f32.mrf.mxu2 }
 0x5d3   : > { %1311 = vrot.lane.b32.xlu1 %v1280_v44, %s3555_s30  ;;  %v3345_v21 = vpop.eup %3344 }
 0x5d4   : > { %v1669_v37 = vmul.f32 %v3345_v21, %v4187_v30 }
 0x5d6   : > { %v1742_v6 = vsel %vm298_vm0, %v1669_v37, 0.0 }
 0x5d7   : > { %3197 = vmatmul.msk.f32.gmra.mxu2 %vm298_vm0, %v4434_v42  ;;  %v4449_v58 = vpop.f32.mrf.mxu2 }
 0x5d8   : > { %1321 = vrot.lane.b32.xlu0 %v1290_v41, %s3555_s30 }
 0x5d9   : > { %v4458_v41 = vpop.xlane.xlu0 %1731 }
 0x5df   : > { %v1515_v44 = vpop.f32.mrf.mxu2 }
 0x5e2   : > { %v1129_v8 = vpop.permute.xlu1 %1128 }
 0x5e3   : > { %v1166_v4 = vadd.f32 %v1129_v8, %v4132_v31 }
 0x5e5   : > { %1737 = vadd.xlane.f32.xlu2 %v1736_v56  ;;  %v1168_v56 = vadd.f32 %v1133_v0, %v4146_v33 }
 0x5e7   : > { %v4462_v49 = vpop.f32.mrf.mxu2  ;;  %v1184_v15 = vmul.f32 0.5, %v1168_v56 }
 0x5ea   : > { %v4444_v57 = vpop.permute.xlu1 %1243 }
 0x5eb   : > { %5409 = vst [vmem:[#allocation26_spill] sm:$0xff] %v4444_v57  ;;  %3198 = vmatmul.msk.f32.gmra.mxu2 %vm298_vm0, %v4444_v57 }
 0x5ec   : > { %v4469_v26 = vpop.permute.xlu0 %1247 }
 0x5ed   : > { %5410 = vst [vmem:[#allocation27_spill] sm:$0xff] %v4469_v26 }
 0x5ef   : > { %v1521_v37 = vpop.f32.mrf.mxu2 }
 0x5f2   : > { %v1135_v46 = vpop.permute.xlu1 %1134 }
 0x5f3   : > { %v1169_v56 = vadd.f32 %v1135_v46, %v4153_v35 }
 0x5fd   : > { %1251 = vrot.lane.b32.xlu2 %v1217_v43, %s3555_s30  ;;  %1743 = vadd.xlane.f32.xlu1 %v1742_v6  ;;  %v1282_v43 = vsel %vm1271_vm4, %v1279_v39, %v1281_v11  ;;  %v1295_v6 = vrot.slane %v1184_v15, 6  ;;  %v1524_v15 = vpop.f32.mrf.mxu2 }
 0x605   : > { %1307 = vrot.lane.b32.xlu2 %v1276_v29, %s3555_s30  ;;  %v4476_v29 = vmul.f32 0.5, %v1166_v4 }
 0x607   : > { %v4460_v47 = vpop.xlane.xlu2 %1728  ;;  %v1291_v8 = vrot.slane %v4476_v29, 6 }
 0x60d   : > { %1313 = vrot.lane.b32.xlu2 %v1282_v43, %s3555_s30  ;;  %v1139_v43 = vpop.permute.xlu0 %1138 }
 0x60f   : > { %v1131_v25 = vpop.permute.xlu2 %1130 }
 0x610   : > { %v1167_v40 = vadd.f32 %v1131_v25, %v4139_v32  ;;  %v1171_v25 = vadd.f32 %v1139_v43, %v4218_v45  ;;  %v1510_v43 = vadd.f32 %v4180_v24, %v1509_v3 }
 0x612   : > { %v4473_v21 = vmul.f32 0.5, %v1167_v40  ;;  %v1292_v40 = vsel %vm1271_vm4, %v1289_v14, %v1291_v8  ;;  %3346 = vtanh.f32 %v1510_v43  ;;  %v1513_v43 = vadd.f32 %v4180_v24, %v4449_v58 }
 0x614   : > { %v5341_v0 = vrot.slane %v4473_v21, 6 }
 0x616   : > { %1317 = vrot.lane.b32.xlu1 %v4382_v50, %s3555_s30  ;;  %v1296_v11 = vsel %vm1271_vm4, %v5341_v0, %v1295_v6  ;;  %v4491_v50 = vmul.f32 0.5, %v1169_v56  ;;  %v1187_v0 = vmul.f32 0.5, %v1171_v25 }
 0x617   : > { %v4483_v39 = vpop.permute.xlu2 %1245  ;;  %1327 = vrot.lane.b32.xlu0 %v1296_v11, %s3555_s30 }
 0x618   : > { %5411 = vst [vmem:[#allocation28_spill] sm:$0xff] %v4483_v39  ;;  %3199 = vmatmul.msk.f32.gmra.mxu2 %vm298_vm0, %v4483_v39  ;;  %v5344_v29 = vrot.slane %v4491_v50, 6  ;;  %v1301_v35 = vrot.slane %v1187_v0, 6 }
 0x61a   : > { %v1298_v14 = vsel %vm1271_vm4, %v1295_v6, %v5344_v29  ;;  %v1516_v6 = vadd.f32 %v4180_v24, %v1515_v44 }
 0x61c   : > { %3348 = vtanh.f32 %v1516_v6 }
 0x61d   : > { %3350 = vtanh.f32 %v1513_v43 }
 0x61e   : > { %1323 = vrot.lane.b32.xlu1 %v1292_v40, %s3555_s30  ;;  %v4508_v40 = vpop.f32.mrf.mxu2 }
 0x61f   : > { %v1137_v4 = vpop.permute.xlu2 %1136 }
 0x620   : > { %v1170_v11 = vadd.f32 %v1137_v4, %v4160_v36  ;;  %3200 = vmatmul.msk.f32.gmra.mxu2 %vm298_vm0, %v4469_v26  ;;  %v4511_v4 = vpop.xlane.xlu1 %1734 }
 0x622   : > { %v4499_v46 = vmul.f32 0.5, %v1170_v11  ;;  %v3347_v11 = vpop.eup %3346 }
 0x623   : > { %v1670_v0 = vmul.f32 %v3347_v11, %v4187_v30  ;;  %v1522_v11 = vadd.f32 %v4180_v24, %v1521_v37  ;;  %v3349_v29 = vpop.eup %3348 }
 0x624   : > { %v1299_v56 = vrot.slane %v4499_v46, 6  ;;  %v1672_v32 = vmul.f32 %v3349_v29, %v4187_v30 }
 0x625   : > { %v1745_v36 = vsel %vm298_vm0, %v1670_v0, 0.0  ;;  %v3351_v0 = vpop.eup %3350 }
 0x626   : > { %1329 = vrot.lane.b32.xlu1 %v1298_v14, %s3555_s30  ;;  %v1302_v25 = vsel %vm1271_vm4, %v1299_v56, %v1301_v35  ;;  %v1530_v3 = vpop.f32.mrf.mxu2  ;;  %v1671_v44 = vmul.f32 %v3351_v0, %v4187_v30 }
 0x627   : > { %1333 = vrot.lane.b32.xlu0 %v1302_v25, %s3555_s30  ;;  %v1525_v25 = vadd.f32 %v4180_v24, %v1524_v15  ;;  %v1531_v58 = vadd.f32 %v4180_v24, %v1530_v3  ;;  %v1751_v15 = vsel %vm298_vm0, %v1672_v32, 0.0 }
 0x628   : > { %v1748_v37 = vsel %vm298_vm0, %v1671_v44, 0.0 }
 0x629   : > { %3352 = vtanh.f32 %v1525_v25 }
 0x62a   : > { %3354 = vtanh.f32 %v1522_v11  ;;  %v5413_v11 = vrot.slane %v4473_v21, 6 }
 0x62e   : > { %v1533_v35 = vpop.f32.mrf.mxu2 }
 0x62f   : > { %v1534_v45 = vadd.f32 %v4180_v24, %v1533_v35  ;;  %v3353_v6 = vpop.eup %3352 }
 0x630   : > { %v3355_v43 = vpop.eup %3354  ;;  %v1675_v25 = vmul.f32 %v3353_v6, %v4187_v30  ;;  %v5414_v6 = vrot.slane %v4491_v50, 6 }
 0x631   : > { %3356 = vtanh.f32 %v1534_v45  ;;  %v1674_v35 = vmul.f32 %v3355_v43, %v4187_v30 }
 0x632   : > { %3358 = vtanh.f32 %v1531_v58  ;;  %v1760_v0 = vsel %vm298_vm0, %v1675_v25, 0.0 }
 0x633   : > { %v1757_v58 = vsel %vm298_vm0, %v1674_v35, 0.0 }
 0x635   : > { %v4514_v46 = vpop.permute.xlu1 %1249 }
 0x636   : > { %5412 = vst [vmem:[#allocation29_spill] sm:$0xff] %v4514_v46  ;;  %1746 = vadd.xlane.f32.xlu2 %v1745_v36  ;;  %3201 = vmatmul.msk.f32.gmra.mxu2 %vm298_vm0, %v4514_v46  ;;  %v4522_v14 = vpop.f32.mrf.mxu2 }
 0x637   : > { %v3357_v44 = vpop.eup %3356 }
 0x638   : > { %v1678_v21 = vmul.f32 %v3357_v44, %v4187_v30 }
 0x63d   : > { %v4566_v44 = vpop.permute.xlu1 %1305 }
 0x63e   : > { %v1539_v36 = vpop.f32.mrf.mxu2 }
 0x63f   : > { %v1540_v32 = vadd.f32 %v4180_v24, %v1539_v36  ;;  %v1300_v36 = vsel %vm1271_vm4, %v5414_v6, %v1299_v56  ;;  %v1519_v6 = vadd.f32 %v4180_v24, %v4462_v49 }
 0x645   : > { %v4589_v49 = vpop.permute.xlu1 %1311 }
 0x646   : > { %5418 = vst [vmem:[#allocation33_spill] sm:$0xff] %v4589_v49 }
 0x64e   : > { %1319 = vrot.lane.b32.xlu2 %v4423_v5, %s3555_s30  ;;  %v1294_v5 = vsel %vm1271_vm4, %v1291_v8, %v5413_v11 }
 0x650   : > { %1752 = vadd.xlane.f32.xlu1 %v1751_v15  ;;  %v3359_v15 = vpop.eup %3358 }
 0x651   : > { %1749 = vadd.xlane.f32.xlu0 %v1748_v37  ;;  %v1677_v8 = vmul.f32 %v3359_v15, %v4187_v30  ;;  %v1769_v37 = vsel %vm298_vm0, %v1678_v21, 0.0 }
 0x652   : > { %v1542_v29 = vpop.f32.mrf.mxu2 }
 0x653   : > { %v1543_v3 = vadd.f32 %v4180_v24, %v1542_v29  ;;  %v4553_v29 = vpop.permute.xlu0 %1303  ;;  %v1766_v35 = vsel %vm298_vm0, %v1677_v8, 0.0 }
 0x655   : > { %3360 = vtanh.f32 %v1543_v3 }
 0x656   : > { %1325 = vrot.lane.b32.xlu2 %v1294_v5, %s3555_s30  ;;  %3362 = vtanh.f32 %v1540_v32 }
 0x658   : > { %v4543_v45 = vpop.xlane.xlu2 %1737  ;;  %1761 = vadd.xlane.f32.xlu1 %v1760_v0 }
 0x659   : > { %1758 = vadd.xlane.f32.xlu0 %v1757_v58 }
 0x65a   : > { %v1545_v3 = vpop.f32.mrf.mxu2 }
 0x65b   : > { %v3361_v43 = vpop.eup %3360  ;;  %v4570_v15 = vpop.permute.xlu0 %1309 }
 0x65c   : > { %v3363_v11 = vpop.eup %3362  ;;  %v1681_v56 = vmul.f32 %v3361_v43, %v4187_v30  ;;  %5416 = vst [vmem:[#allocation31_spill] sm:$0xff] %v4570_v15 }
 0x65d   : > { %v1680_v5 = vmul.f32 %v3363_v11, %v4187_v30  ;;  %v1528_v11 = vadd.f32 %v4180_v24, %v4508_v40 }
 0x65e   : > { %1331 = vrot.lane.b32.xlu2 %v1300_v36, %s3555_s30  ;;  %v1778_v32 = vsel %vm298_vm0, %v1681_v56, 0.0 }
 0x65f   : > { %v1775_v0 = vsel %vm298_vm0, %v1680_v5, 0.0 }
 0x660   : > { %v4555_v25 = vpop.permute.xlu2 %1251  ;;  %1770 = vadd.xlane.f32.xlu1 %v1769_v37 }
 0x661   : > { %5415 = vst [vmem:[#allocation30_spill] sm:$0xff] %v4555_v25  ;;  %1767 = vadd.xlane.f32.xlu0 %v1766_v35  ;;  %v1337_v50 = vsel %vm1271_vm4, %v4555_v25, %v4553_v29 }
 0x662   : > { %3202 = vmatmul.msk.f32.gmra.mxu2 %vm298_vm0, %v1337_v50 }
 0x663   : > { %v4580_v43 = vpop.permute.xlu0 %1315 }
 0x664   : > { %5417 = vst [vmem:[#allocation32_spill] sm:$0xff] %v4580_v43 }
 0x668   : > { %1779 = vadd.xlane.f32.xlu1 %v1778_v32  ;;  %v4573_v8 = vpop.permute.xlu2 %1307  ;;  %v1537_v32 = vadd.f32 %v4180_v24, %v4522_v14 }
 0x669   : > { %1776 = vadd.xlane.f32.xlu0 %v1775_v0 }
 0x66a   : > { %3203 = vmatmul.msk.f32.gmra.mxu2 %vm298_vm0, %v4566_v44 }
 0x66b   : > { %v4587_v56 = vpop.xlane.xlu0 %1740 }
 0x66e   : > { %v1548_v58 = vpop.f32.mrf.mxu2 }
 0x66f   : > { %v1549_v21 = vadd.f32 %v4180_v24, %v1548_v58 }
 0x670   : > { %v4606_v14 = vpop.xlane.xlu1 %1743 }
 0x671   : > { %3364 = vtanh.f32 %v1549_v21  ;;  %v4599_v21 = vpop.permute.xlu2 %1313 }
 0x672   : > { %3204 = vmatmul.msk.f32.gmra.mxu2 %vm298_vm0, %v4573_v8  ;;  %3366 = vtanh.f32 %v1519_v6  ;;  %5420 = vst [vmem:[#allocation35_spill] sm:$0xff] %v4599_v21 }
 0x673   : > { %3368 = vtanh.f32 %v1528_v11  ;;  %v4597_v40 = vpop.permute.xlu0 %1321 }
 0x674   : > { %3370 = vtanh.f32 %v1537_v32  ;;  %5419 = vst [vmem:[#allocation34_spill] sm:$0xff] %v4597_v40 }
 0x677   : > { %v3365_v36 = vpop.eup %3364 }
 0x678   : > { %v1683_v37 = vmul.f32 %v3365_v36, %v4187_v30  ;;  %v3367_v50 = vpop.eup %3366  ;;  %v1546_v36 = vadd.f32 %v4180_v24, %v1545_v3 }
 0x679   : > { %v1673_v5 = vmul.f32 %v3367_v50, %v4187_v30  ;;  %v3369_v58 = vpop.eup %3368 }
 0x67a   : > { %3205 = vmatmul.msk.f32.gmra.mxu2 %vm298_vm0, %v4570_v15  ;;  %v1784_v35 = vsel %vm298_vm0, %v1683_v37, 0.0  ;;  %v1676_v6 = vmul.f32 %v3369_v58, %v4187_v30  ;;  %3372 = vtanh.f32 %v1546_v36 }
 0x67b   : > { %1785 = vadd.xlane.f32.xlu0 %v1784_v35  ;;  %v1754_v0 = vsel %vm298_vm0, %v1673_v5, 0.0  ;;  %v3371_v35 = vpop.eup %3370 }
 0x67c   : > { %v1763_v37 = vsel %vm298_vm0, %v1676_v6, 0.0  ;;  %v1679_v50 = vmul.f32 %v3371_v35, %v4187_v30 }
 0x67e   : > { %v1772_v5 = vsel %vm298_vm0, %v1679_v50, 0.0 }
 0x680   : > { %v3373_v32 = vpop.eup %3372 }
 0x681   : > { %v1682_v58 = vmul.f32 %v3373_v32, %v4187_v30 }
 0x682   : > { %3206 = vmatmul.msk.f32.gmra.mxu2 %vm298_vm0, %v4589_v49 }
 0x687   : > { %1755 = vadd.xlane.f32.xlu2 %v1754_v0 }
 0x688   : > { %v4614_v0 = vpop.permute.xlu1 %1317 }
 0x689   : > { %v4608_v11 = vpop.permute.xlu0 %1327  ;;  %5422 = vst [vmem:[#allocation37_spill] sm:$0xff] %v4614_v0 }
 0x68a   : > { %3207 = vmatmul.msk.f32.gmra.mxu2 %vm298_vm0, %v4599_v21  ;;  %5421 = vst [vmem:[#allocation36_spill] sm:$0xff] %v4608_v11 }
 0x68f   : > { %1764 = vadd.xlane.f32.xlu2 %v1763_v37  ;;  %v1781_v37 = vsel %vm298_vm0, %v1682_v58, 0.0 }
 0x692   : > { %3208 = vmatmul.msk.f32.gmra.mxu2 %vm298_vm0, %v4580_v43 }
 0x697   : > { %1773 = vadd.xlane.f32.xlu2 %v1772_v5 }
 0x699   : > { %v4616_v3 = vpop.permute.xlu0 %1333 }
 0x69a   : > { %5423 = vst [vmem:[#allocation38_spill] sm:$0xff] %v4616_v3  ;;  %3209 = vmatmul.msk.f32.gmra.mxu2 %vm298_vm0, %v4614_v0  ;;  %3217 = vmatmul.msk.f32.vlgmr.msra.gmra.mxu3 %vm298_vm0, %v4616_v3 }
 0x69b   : > { %v1551_v6 = vpop.f32.mrf.mxu2 }
 0x69c   : > { %v1552_v36 = vadd.f32 %v4180_v24, %v1551_v6 }
 0x69e   : > { %3374 = vtanh.f32 %v1552_v36 }
 0x69f   : > { %1782 = vadd.xlane.f32.xlu2 %v1781_v37 }
 0x6a3   : > { %v1554_v35 = vpop.f32.mrf.mxu2 }
 0x6a4   : > { %v3375_v50 = vpop.eup %3374  ;;  %v1555_v5 = vadd.f32 %v4180_v24, %v1554_v35 }
 0x6a5   : > { %v1684_v33 = vmul.f32 %v3375_v50, %v4187_v30 }
 0x6a6   : > { %3376 = vtanh.f32 %v1555_v5 }
 0x6a7   : > { %v1787_v26 = vsel %vm298_vm0, %v1684_v33, 0.0  ;;  %v4639_v33 = vpop.permute.xlu1 %1323 }
 0x6a8   : > { %1788 = vadd.xlane.f32.xlu1 %v1787_v26  ;;  %5425 = vst [vmem:[#allocation40_spill] sm:$0xff] %v4639_v33 }
 0x6a9   : > { %v4628_v3 = vpop.xlane.xlu2 %1746 }
 0x6ac   : > { %v3377_v32 = vpop.eup %3376 }
 0x6ad   : > { %v1685_v39 = vmul.f32 %v3377_v32, %v4187_v30 }
 0x6af   : > { %v1790_v6 = vsel %vm298_vm0, %v1685_v39, 0.0  ;;  %v4651_v5 = vpop.permute.xlu1 %1329 }
 0x6b0   : > { %1791 = vadd.xlane.f32.xlu2 %v1790_v6  ;;  %5427 = vst [vmem:[#allocation42_spill] sm:$0xff] %v4651_v5 }
 0x6b1   : > { %v4632_v58 = vpop.permute.xlu2 %1319 }
 0x6b2   : > { %5424 = vst [vmem:[#allocation39_spill] sm:$0xff] %v4632_v58  ;;  %3210 = vmatmul.msk.f32.gmra.mxu2 %vm298_vm0, %v4632_v58 }
 0x6b9   : > { %v1557_v36 = vpop.f32.mrf.mxu2  ;;  %v4645_v50 = vpop.permute.xlu2 %1325 }
 0x6ba   : > { %v1558_v37 = vadd.f32 %v4180_v24, %v1557_v36  ;;  %3211 = vmatmul.msk.f32.gmra.mxu2 %vm298_vm0, %v4597_v40  ;;  %5426 = vst [vmem:[#allocation41_spill] sm:$0xff] %v4645_v50 }
 0x6bc   : > { %3378 = vtanh.f32 %v1558_v37 }
 0x6c1   : > { %v4655_v32 = vpop.permute.xlu2 %1331 }
 0x6c2   : > { %v3379_v26 = vpop.eup %3378  ;;  %3212 = vmatmul.msk.f32.gmra.mxu2 %vm298_vm0, %v4639_v33  ;;  %5428 = vst [vmem:[#allocation43_spill] sm:$0xff] %v4655_v32 }
 0x6c3   : > { %v1686_v39 = vmul.f32 %v3379_v26, %v4187_v30 }
 0x6c4   : > { %v4696_v31 = vpop.xlane.xlu0 %1749 }
 0x6c5   : > { %v1793_v35 = vsel %vm298_vm0, %v1686_v39, 0.0 }
 0x6c6   : > { %1794 = vadd.xlane.f32.xlu0 %v1793_v35 }
 0x6ca   : > { %3213 = vmatmul.msk.f32.gmra.mxu2 %vm298_vm0, %v4645_v50 }
 0x6cc   : > { %v4707_v50 = vpop.xlane.xlu0 %1758 }
 0x6d2   : > { %3214 = vmatmul.msk.f32.gmra.mxu2 %vm298_vm0, %v4608_v11 }
 0x6da   : > { %3215 = vmatmul.msk.f32.gmra.mxu2 %vm298_vm0, %v4651_v5 }
 0x6e2   : > { %3216 = vmatmul.msk.f32.gmra.mxu2 %vm298_vm0, %v4655_v32 }
 0x6e5   : > { %v1560_v6 = vpop.f32.mrf.mxu2 }
 0x6e6   : > { %v1561_v36 = vadd.f32 %v4180_v24, %v1560_v6 }
 0x6e8   : > { %3380 = vtanh.f32 %v1561_v36 }
 0x6ed   : > { %v1563_v37 = vpop.f32.mrf.mxu2 }
 0x6ee   : > { %v3381_v26 = vpop.eup %3380  ;;  %v1564_v39 = vadd.f32 %v4180_v24, %v1563_v37 }
 0x6ef   : > { %v1687_v35 = vmul.f32 %v3381_v26, %v4187_v30 }
 0x6f0   : > { %3382 = vtanh.f32 %v1564_v39 }
 0x6f1   : > { %v1796_v11 = vsel %vm298_vm0, %v1687_v35, 0.0 }
 0x6f2   : > { %1797 = vadd.xlane.f32.xlu1 %v1796_v11 }
 0x6f5   : > { %v1566_v5 = vpop.f32.mrf.mxu2 }
 0x6f6   : > { %v3383_v25 = vpop.eup %3382  ;;  %v1567_v57 = vadd.f32 %v4180_v24, %v1566_v5 }
 0x6f7   : > { %v1688_v32 = vmul.f32 %v3383_v25, %v4187_v30 }
 0x6f8   : > { %3384 = vtanh.f32 %v1567_v57 }
 0x6f9   : > { %v1799_v6 = vsel %vm298_vm0, %v1688_v32, 0.0 }
 0x6fa   : > { %1800 = vadd.xlane.f32.xlu2 %v1799_v6 }
 0x6fd   : > { %v1569_v36 = vpop.f32.mrf.mxu2 }
 0x6fe   : > { %v3385_v46 = vpop.eup %3384  ;;  %v1570_v37 = vadd.f32 %v4180_v24, %v1569_v36 }
 0x6ff   : > { %v1689_v26 = vmul.f32 %v3385_v46, %v4187_v30 }
 0x700   : > { %3386 = vtanh.f32 %v1570_v37 }
 0x701   : > { %v1802_v39 = vsel %vm298_vm0, %v1689_v26, 0.0 }
 0x702   : > { %1803 = vadd.xlane.f32.xlu0 %v1802_v39 }
 0x705   : > { %v1572_v11 = vpop.f32.mrf.mxu2 }
 0x706   : > { %v3387_v35 = vpop.eup %3386  ;;  %v1573_v5 = vadd.f32 %v4180_v24, %v1572_v11  ;;  %v4678_v11 = vld [vmem:[%s5339_s4 + $0x10] ss:$0 sm:$0xff] }
 0x707   : > { %v1690_v25 = vmul.f32 %v3387_v35, %v4187_v30 }
 0x708   : > { %3388 = vtanh.f32 %v1573_v5 }
 0x709   : > { %v1805_v57 = vsel %vm298_vm0, %v1690_v25, 0.0 }
 0x70a   : > { %1806 = vadd.xlane.f32.xlu1 %v1805_v57 }
 0x70d   : > { %v1575_v32 = vpop.f32.mrf.mxu2 }
 0x70e   : > { %v3389_v6 = vpop.eup %3388  ;;  %v1576_v36 = vadd.f32 %v4180_v24, %v1575_v32 }
 0x70f   : > { %v1691_v46 = vmul.f32 %v3389_v6, %v4187_v30  ;;  %v4687_v6 = vld [vmem:[%s5339_s4 + $0x11] ss:$0 sm:$0xff] }
 0x710   : > { %3390 = vtanh.f32 %v1576_v36 }
 0x711   : > { %v1808_v37 = vsel %vm298_vm0, %v1691_v46, 0.0 }
 0x712   : > { %1809 = vadd.xlane.f32.xlu2 %v1808_v37 }
 0x715   : > { %v1578_v26 = vpop.f32.mrf.mxu2 }
 0x716   : > { %v3391_v39 = vpop.eup %3390  ;;  %v1579_v35 = vadd.f32 %v4678_v11, %v1578_v26 }
 0x717   : > { %v1692_v5 = vmul.f32 %v3391_v39, %v4187_v30 }
 0x718   : > { %3392 = vtanh.f32 %v1579_v35 }
 0x719   : > { %v1811_v24 = vsel %vm298_vm0, %v1692_v5, 0.0  ;;  %v4694_v5 = vpop.xlane.xlu1 %1752 }
 0x71a   : > { %1812 = vadd.xlane.f32.xlu0 %v1811_v24 }
 0x71d   : > { %v1581_v25 = vpop.f32.mrf.mxu2  ;;  %v1605_v33 = vpop.f32.mrf.mxu3 }
 0x71e   : > { %v3393_v57 = vpop.eup %3392  ;;  %v1582_v32 = vadd.f32 %v4678_v11, %v1581_v25 }
 0x71f   : > { %v1693_v36 = vmul.f32 %v4687_v6, %v3393_v57 }
 0x720   : > { %3394 = vtanh.f32 %v1582_v32  ;;  %v4699_v32 = vpop.xlane.xlu2 %1755 }
 0x721   : > { %v1814_v46 = vsel %vm298_vm0, %v1693_v36, 0.0 }
 0x722   : > { %1815 = vadd.xlane.f32.xlu1 %v1814_v46 }
 0x726   : > { %v3395_v30 = vpop.eup %3394 }
 0x727   : > { %v1694_v37 = vmul.f32 %v4687_v6, %v3395_v30 }
 0x729   : > { %v1817_v26 = vsel %vm298_vm0, %v1694_v37, 0.0 }
 0x72a   : > { %1818 = vadd.xlane.f32.xlu2 %v1817_v26 }
 0x735   : > { %v1584_v39 = vpop.f32.mrf.mxu2 }
 0x736   : > { %v1585_v35 = vadd.f32 %v4678_v11, %v1584_v39  ;;  %v4704_v39 = vpop.xlane.xlu1 %1761 }
 0x738   : > { %3396 = vtanh.f32 %v1585_v35 }
 0x73d   : > { %v1587_v24 = vpop.f32.mrf.mxu2 }
 0x73e   : > { %v3397_v25 = vpop.eup %3396  ;;  %v1588_v57 = vadd.f32 %v4678_v11, %v1587_v24  ;;  %v4709_v24 = vpop.xlane.xlu2 %1764 }
 0x73f   : > { %v1695_v36 = vmul.f32 %v4687_v6, %v3397_v25 }
 0x740   : > { %3398 = vtanh.f32 %v1588_v57 }
 0x741   : > { %v1820_v46 = vsel %vm298_vm0, %v1695_v36, 0.0 }
 0x742   : > { %1821 = vadd.xlane.f32.xlu0 %v1820_v46 }
 0x745   : > { %v1590_v30 = vpop.f32.mrf.mxu2 }
 0x746   : > { %v3399_v37 = vpop.eup %3398  ;;  %v1591_v26 = vadd.f32 %v4678_v11, %v1590_v30  ;;  %v4714_v30 = vpop.xlane.xlu1 %1770 }
 0x747   : > { %v1696_v35 = vmul.f32 %v4687_v6, %v3399_v37  ;;  %v4717_v37 = vpop.xlane.xlu0 %1767 }
 0x748   : > { %3400 = vtanh.f32 %v1591_v26  ;;  %v4719_v26 = vpop.xlane.xlu2 %1773 }
 0x749   : > { %v1823_v42 = vsel %vm298_vm0, %v1696_v35, 0.0 }
 0x74a   : > { %1824 = vadd.xlane.f32.xlu1 %v1823_v42 }
 0x74d   : > { %v1593_v25 = vpop.f32.mrf.mxu2 }
 0x74e   : > { %v3401_v57 = vpop.eup %3400  ;;  %v1594_v36 = vadd.f32 %v4678_v11, %v1593_v25  ;;  %v1606_v25 = vadd.f32 %v4678_v11, %v1605_v33 }
 0x74f   : > { %v1697_v46 = vmul.f32 %v4687_v6, %v3401_v57 }
 0x750   : > { %3402 = vtanh.f32 %v1594_v36  ;;  %v4725_v36 = vpop.xlane.xlu1 %1779 }
 0x751   : > { %v1826_v1 = vsel %vm298_vm0, %v1697_v46, 0.0  ;;  %v4727_v46 = vpop.xlane.xlu0 %1776 }
 0x752   : > { %1827 = vadd.xlane.f32.xlu2 %v1826_v1  ;;  %v4729_v1 = vpop.xlane.xlu2 %1782 }
 0x755   : > { %v1596_v16 = vpop.f32.mrf.mxu2 }
 0x756   : > { %v3403_v35 = vpop.eup %3402  ;;  %v1597_v42 = vadd.f32 %v4678_v11, %v1596_v16 }
 0x757   : > { %v1698_v27 = vmul.f32 %v4687_v6, %v3403_v35 }
 0x758   : > { %3404 = vtanh.f32 %v1597_v42  ;;  %v4734_v42 = vpop.xlane.xlu1 %1788 }
 0x759   : > { %v1829_v57 = vsel %vm298_vm0, %v1698_v27, 0.0  ;;  %3406 = vtanh.f32 %v1606_v25  ;;  %v3556_v27 = vmov 0   ;;  %v4736_v25 = vpop.xlane.xlu0 %1785 }
 0x75a   : > { %1830 = vadd.xlane.f32.xlu0 %v1829_v57  ;;  %3311 = vset.pattern.permute.xlu2 %v3556_v27  ;;  %v4738_v57 = vpop.xlane.xlu2 %1791 }
 0x75b   : > { %3312 = vset.pattern.permute.xlu1 %v3556_v27  ;;  %3313 = vset.pattern.permute.xlu0 %v3556_v27 }
 0x75d   : > { %v1599_v40 = vpop.f32.mrf.mxu2 }
 0x75e   : > { %v3405_v53 = vpop.eup %3404  ;;  %v1600_v58 = vadd.f32 %v4678_v11, %v1599_v40 }
 0x75f   : > { %v1699_v16 = vmul.f32 %v4687_v6, %v3405_v53  ;;  %v3407_v35 = vpop.eup %3406 }
 0x760   : > { %3408 = vtanh.f32 %v1600_v58  ;;  %v1702_v40 = vmul.f32 %v4687_v6, %v3407_v35 }
 0x761   : > { %v1832_v33 = vsel %vm298_vm0, %v1699_v16, 0.0  ;;  %v1864_v16 = vrot.slane %v4694_v5, 5  ;;  %v4749_v22 = vpop.xlane.xlu0 %1794 }
 0x762   : > { %1833 = vadd.xlane.f32.xlu1 %v1832_v33  ;;  %v1863_v33 = vrot.slane %v4696_v31, 5  ;;  %v1842_v27 = vsel %vm1841_vm5, %v1702_v40, 0.0 }
 0x764   : > { %v1865_v35 = vsel %vm1862_vm6, %v1863_v33, %v1864_v16 }
 0x765   : > { %v1602_v63 = vpop.f32.mrf.mxu2  ;;  %v4746_v0 = vpop.xlane.xlu1 %1797 }
 0x766   : > { %v3409_v38 = vpop.eup %3408  ;;  %v1603_v53 = vadd.f32 %v4678_v11, %v1602_v63  ;;  %v1944_v11 = vrot.slane %v4746_v0, 2 }
 0x767   : > { %v1700_v58 = vmul.f32 %v4687_v6, %v3409_v38 }
 0x768   : > { %3410 = vtanh.f32 %v1603_v53  ;;  %v1912_v53 = vmax.f32 %v4269_v17, %v1865_v35 }
 0x769   : > { %v1835_v55 = vsel %vm298_vm0, %v1700_v58, 0.0  ;;  %v1866_v58 = vrot.slane %v4699_v32, 5 }
 0x76a   : > { %1843 = vadd.xlane.f32.xlu1 %v1842_v27  ;;  %1836 = vadd.xlane.f32.xlu2 %v1835_v55 }
 0x76b   : > { %v1867_v61 = vsel %vm1862_vm6, %v1864_v16, %v1866_v58 }
 0x76d   : > { %v1801_v63 = vpop.xlane.xlu2 %1800 }
 0x76e   : > { %v3411_v38 = vpop.eup %3410  ;;  %v1945_v62 = vrot.slane %v1801_v63, 2 }
 0x76f   : > { %v1701_v40 = vmul.f32 %v4687_v6, %v3411_v38  ;;  %v1913_v6 = vmax.f32 %v4271_v19, %v1867_v61 }
 0x770   : > { %v1946_v55 = vsel %vm1943_vm7, %v1944_v11, %v1945_v62 }
 0x771   : > { %v1991_v27 = vmax.f32 %v1912_v53, %v1946_v55  ;;  %v1838_v43 = vsel %vm298_vm0, %v1701_v40, 0.0  ;;  %v1868_v40 = vrot.slane %v4707_v50, 5 }
 0x772   : > { %1839 = vadd.xlane.f32.xlu0 %v1838_v43 }
 0x773   : > { %v2007_v33 = vsub.f32 %v4269_v17, %v1991_v27  ;;  %v2170_v51 = vrot.slane %v1991_v27, 6  ;;  %v2071_v60 = vrot.slane %v1991_v27, 3  ;;  %v1869_v49 = vsel %vm1862_vm6, %v1866_v58, %v1868_v40 }
 0x775   : > { %v2217_v34 = vsub.f32 %v4746_v0, %v2170_v51  ;;  %v1804_v21 = vpop.xlane.xlu0 %1803  ;;  %v2023_v38 = vmul.f32 1.442695, %v2007_v33  ;;  %v2119_v43 = vsub.f32 %v4696_v31, %v2071_v60 }
 0x776   : > { %v1947_v35 = vrot.slane %v1804_v21, 2 }
 0x777   : > { %v2233_v18 = vmul.f32 1.442695, %v2217_v34  ;;  %3412 = vpow2.f32 %v2023_v38  ;;  %v2136_v34 = vmul.f32 1.442695, %v2119_v43  ;;  %v1914_v38 = vmax.f32 %v4282_v20, %v1869_v49 }
 0x778   : > { %v1948_v11 = vsel %vm1943_vm7, %v1945_v62, %v1947_v35 }
 0x779   : > { %v1992_v53 = vmax.f32 %v1913_v6, %v1948_v11  ;;  %3414 = vpow2.f32 %v2233_v18 }
 0x77b   : > { %v2008_v17 = vsub.f32 %v4271_v19, %v1992_v53  ;;  %v2072_v16 = vrot.slane %v1992_v53, 3  ;;  %v2171_v55 = vrot.slane %v1992_v53, 6  ;;  %v1870_v19 = vrot.slane %v4704_v39, 5 }
 0x77d   : > { %v2025_v27 = vmul.f32 1.442695, %v2008_v17  ;;  %v2073_v61 = vsel %vm462_vm1, %v2071_v60, %v2072_v16  ;;  %v4767_v33 = vpop.xlane.xlu1 %1806  ;;  %v2172_v62 = vsel %vm1271_vm4, %v2170_v51, %v2171_v55  ;;  %v4775_v53 = vpop.eup %3412  ;;  %v1871_v49 = vsel %vm1862_vm6, %v1868_v40, %v1870_v19 }
 0x77e   : > { %v1949_v6 = vrot.slane %v4767_v33, 2  ;;  %v2120_v11 = vsub.f32 %v4694_v5, %v2073_v61  ;;  %v2218_v17 = vsub.f32 %v1801_v63, %v2172_v62 }
 0x77f   : > { %3416 = vpow2.f32 %v2025_v27  ;;  %v4777_v59 = vpop.eup %3414 }
 0x780   : > { %v1950_v58 = vsel %vm1943_vm7, %v1947_v35, %v1949_v6  ;;  %v2138_v18 = vmul.f32 1.442695, %v2120_v11  ;;  %3418 = vpow2.f32 %v2136_v34  ;;  %v2235_v34 = vmul.f32 1.442695, %v2218_v17 }
 0x781   : > { %v1993_v60 = vmax.f32 %v1914_v38, %v1950_v58  ;;  %v1915_v58 = vmax.f32 %v4325_v9, %v1871_v49  ;;  %v2363_v2 = vrot.slane %v4777_v59, 2 }
 0x782   : > { %2444 = vperm.xlu2 %3311, %v4775_v53   ;;  %3420 = vpow2.f32 %v2138_v18  ;;  %v1872_v18 = vrot.slane %v4709_v24, 5 }
 0x783   : > { %v2009_v51 = vsub.f32 %v4282_v20, %v1993_v60  ;;  %v2074_v5 = vrot.slane %v1993_v60, 3  ;;  %v2173_v43 = vrot.slane %v1993_v60, 6  ;;  %2721 = vperm.xlu1 %3312, %v4777_v59  }
 0x785   : > { %v4783_v35 = vpop.eup %3416  ;;  %v2027_v27 = vmul.f32 1.442695, %v2009_v51  ;;  %v2075_v61 = vsel %vm462_vm1, %v2072_v16, %v2074_v5  ;;  %v2174_v63 = vsel %vm1271_vm4, %v2171_v55, %v2173_v43  ;;  %v4787_v62 = vpop.xlane.xlu2 %1809 }
 0x786   : > { %v1951_v11 = vrot.slane %v4787_v62, 2  ;;  %2449 = vperm.xlu0 %3313, %v4783_v35   ;;  %v2219_v20 = vsub.f32 %v1804_v21, %v2174_v63  ;;  %v2121_v38 = vsub.f32 %v4699_v32, %v2075_v61  ;;  %v3419_v40 = vpop.eup %3418  ;;  %v1873_v32 = vsel %vm1862_vm6, %v1870_v19, %v1872_v18 }
 0x787   : > { %3422 = vpow2.f32 %v2027_v27  ;;  %v1916_v19 = vmax.f32 %v4362_v54, %v1873_v32 }
 0x788   : > { %v1952_v16 = vsel %vm1943_vm7, %v1949_v6, %v1951_v11  ;;  %v2237_v60 = vmul.f32 1.442695, %v2219_v20  ;;  %v2140_v55 = vmul.f32 1.442695, %v2121_v38  ;;  %v3421_v51 = vpop.eup %3420  ;;  %3424 = vpow2.f32 %v2235_v34 }
 0x789   : > { %v1994_v15 = vmax.f32 %v1915_v58, %v1952_v16  ;;  %v2283_v49 = vrot.slane %v3421_v51, 5  ;;  %v2282_v38 = vrot.slane %v3419_v40, 5 }
 0x78a   : > { %2539 = vperm.xlu2 %3311, %v3419_v40   ;;  %3426 = vpow2.f32 %v2237_v60 }
 0x78b   : > { %v2010_v17 = vsub.f32 %v4325_v9, %v1994_v15  ;;  %v2076_v21 = vrot.slane %v1994_v15, 3  ;;  %v2175_v63 = vrot.slane %v1994_v15, 6  ;;  %3428 = vpow2.f32 %v2140_v55 }
 0x78c   : > { %v2284_v40 = vsel %vm1862_vm6, %v2282_v38, %v2283_v49 }
 0x78d   : > { %v4797_v27 = vpop.eup %3422  ;;  %v2077_v61 = vsel %vm462_vm1, %v2074_v5, %v2076_v21  ;;  %v2176_v6 = vsel %vm1271_vm4, %v2173_v43, %v2175_v63  ;;  %v4801_v20 = vpop.xlane.xlu0 %1812  ;;  %v2029_v16 = vmul.f32 1.442695, %v2010_v17 }
 0x78e   : > { %v2122_v34 = vsub.f32 %v4707_v50, %v2077_v61  ;;  %v1953_v58 = vrot.slane %v4801_v20, 2  ;;  %2543 = vperm.xlu0 %3313, %v3421_v51   ;;  %2454 = vperm.xlu1 %3312, %v4797_v27   ;;  %v2220_v9 = vsub.f32 %v4767_v33, %v2176_v6  ;;  %v3425_v15 = vpop.eup %3424  ;;  %v1874_v50 = vrot.slane %v4717_v37, 5 }
 0x78f   : > { %v2364_v33 = vrot.slane %v3425_v15, 2 }
 0x790   : > { %v4808_v60 = vpop.eup %3426  ;;  %v2142_v5 = vmul.f32 1.442695, %v2122_v34  ;;  %v1954_v43 = vsel %vm1943_vm7, %v1951_v11, %v1953_v58  ;;  %v2239_v51 = vmul.f32 1.442695, %v2220_v9  ;;  %v2331_v34 = vadd.f32 %v4775_v53, %v2284_v40 }
 0x791   : > { %v3429_v55 = vpop.eup %3428  ;;  %v1995_v61 = vmax.f32 %v1916_v19, %v1954_v43  ;;  %v2366_v6 = vrot.slane %v4808_v60, 2  ;;  %v1875_v11 = vsel %vm1862_vm6, %v1872_v18, %v1874_v50  ;;  %v2365_v59 = vsel %vm1943_vm7, %v2363_v2, %v2364_v33 }
 0x792   : > { %3430 = vpow2.f32 %v2142_v5  ;;  %2725 = vperm.xlu2 %3311, %v3425_v15   ;;  %v2285_v23 = vrot.slane %v3429_v55, 5  ;;  %v1917_v18 = vmax.f32 %v4404_v10, %v1875_v11  ;;  %v2410_v43 = vadd.f32 %v2365_v59, %v2331_v34 }
 0x793   : > { %3432 = vpow2.f32 %v2029_v16  ;;  %v2078_v17 = vrot.slane %v1995_v61, 3  ;;  %v2177_v32 = vrot.slane %v1995_v61, 6  ;;  %v2367_v53 = vsel %vm1943_vm7, %v2364_v33, %v2366_v6 }
 0x794   : > { %v2286_v38 = vsel %vm1862_vm6, %v2283_v49, %v2285_v23  ;;  %3434 = vpow2.f32 %v2239_v51 }
 0x795   : > { %v2079_v19 = vsel %vm462_vm1, %v2076_v21, %v2078_v17  ;;  %v4819_v9 = vpop.xlane.xlu1 %1815  ;;  %v2332_v15 = vadd.f32 %v4783_v35, %v2286_v38  ;;  %v2178_v5 = vsel %vm1271_vm4, %v2175_v63, %v2177_v32  ;;  %v2011_v21 = vsub.f32 %v4362_v54, %v1995_v61 }
 0x796   : > { %v1955_v16 = vrot.slane %v4819_v9, 2  ;;  %2729 = vperm.xlu0 %3313, %v4808_v60   ;;  %2547 = vperm.xlu1 %3312, %v3429_v55   ;;  %v1876_v63 = vrot.slane %v4714_v30, 5  ;;  %v2123_v55 = vsub.f32 %v4704_v39, %v2079_v19  ;;  %v2221_v2 = vsub.f32 %v4787_v62, %v2178_v5 }
 0x797   : > { %v2411_v49 = vadd.f32 %v2367_v53, %v2332_v15  ;;  %v2031_v61 = vmul.f32 1.442695, %v2011_v21 }
 0x798   : > { %v4831_v35 = vpop.eup %3430  ;;  %v1956_v40 = vsel %vm1943_vm7, %v1953_v58, %v1955_v16  ;;  %v1877_v39 = vsel %vm1862_vm6, %v1874_v50, %v1876_v63  ;;  %v2144_v11 = vmul.f32 1.442695, %v2123_v55  ;;  %v2241_v19 = vmul.f32 1.442695, %v2221_v2 }
 0x799   : > { %v4836_v51 = vpop.eup %3432  ;;  %v2287_v38 = vrot.slane %v4831_v35, 5  ;;  %v4840_v33 = vmax.f32 %v1917_v18, %v1956_v40  ;;  %3436 = vrcp.f32 %v2411_v49 }
 0x79a   : > { %2459 = vperm.xlu2 %3311, %v4836_v51   ;;  %v4843_v54 = vpop.eup %3434  ;;  %3438 = vrcp.f32 %v2410_v43 }
 0x79b   : > { %v2080_v34 = vrot.slane %v4840_v33, 3  ;;  %v2179_v58 = vrot.slane %v4840_v33, 6  ;;  %v2288_v62 = vsel %vm1862_vm6, %v2285_v23, %v2287_v38  ;;  %v2368_v50 = vrot.slane %v4843_v54, 2 }
 0x79c   : > { %v1918_v23 = vmax.f32 %v4407_v13, %v1877_v39  ;;  %3440 = vpow2.f32 %v2031_v61 }
 0x79d   : > { %v2081_v15 = vsel %vm462_vm1, %v2078_v17, %v2080_v34  ;;  %v2180_v5 = vsel %vm1271_vm4, %v2177_v32, %v2179_v58  ;;  %v4855_v53 = vpop.xlane.xlu2 %1818  ;;  %v2333_v17 = vadd.f32 %v4797_v27, %v2288_v62  ;;  %3442 = vpow2.f32 %v2144_v11 }
 0x79e   : > { %v2124_v59 = vsub.f32 %v4709_v24, %v2081_v15  ;;  %v2222_v18 = vsub.f32 %v4801_v20, %v2180_v5  ;;  %v1957_v21 = vrot.slane %v4855_v53, 2  ;;  %2733 = vperm.xlu1 %3312, %v4843_v54   ;;  %3444 = vpow2.f32 %v2241_v19 }
 0x79f   : > { %v3437_v49 = vpop.eup %3436  ;;  %v2369_v55 = vsel %vm1943_vm7, %v2366_v6, %v2368_v50  ;;  %v1880_v54 = vrot.slane %v4727_v46, 5 }
 0x7a0   : > { %v2146_v43 = vmul.f32 1.442695, %v2124_v59  ;;  %v2243_v32 = vmul.f32 1.442695, %v2222_v18  ;;  %v1958_v24 = vsel %vm1943_vm7, %v1955_v16, %v1957_v21  ;;  %2901 = vperm.xlu0 %3313, %v3437_v49   ;;  %v3439_v20 = vpop.eup %3438  ;;  %v2412_v2 = vadd.f32 %v2369_v55, %v2333_v17 }
 0x7a1   : > { %v4867_v40 = vmax.f32 %v1918_v23, %v1958_v24 }
 0x7a2   : > { %3446 = vpow2.f32 %v2146_v43  ;;  %2896 = vperm.xlu2 %3311, %v3439_v20   ;;  %v3441_v61 = vpop.eup %3440 }
 0x7a3   : > { %3448 = vpow2.f32 %v2243_v32  ;;  %v2082_v27 = vrot.slane %v4867_v40, 3  ;;  %v2181_v39 = vrot.slane %v4867_v40, 6  ;;  %v3443_v62 = vpop.eup %3442  ;;  %v2013_v55 = vsub.f32 %v4407_v13, %v4867_v40 }
 0x7a4   : > { %v3445_v19 = vpop.eup %3444  ;;  %3450 = vrcp.f32 %v2412_v2  ;;  %v2289_v59 = vrot.slane %v3443_v62, 5  ;;  %v1878_v2 = vrot.slane %v4719_v26, 5 }
 0x7a5   : > { %v2083_v16 = vsel %vm462_vm1, %v2080_v34, %v2082_v27  ;;  %v2182_v5 = vsel %vm1271_vm4, %v2179_v58, %v2181_v39  ;;  %v2370_v49 = vrot.slane %v3445_v19, 2 }
 0x7a6   : > { %v2125_v11 = vsub.f32 %v4717_v37, %v2083_v16  ;;  %2464 = vperm.xlu1 %3312, %v3441_v61   ;;  %v2012_v37 = vsub.f32 %v4404_v10, %v4840_v33  ;;  %v2223_v17 = vsub.f32 %v4819_v9, %v2182_v5  ;;  %v2290_v9 = vsel %vm1862_vm6, %v2287_v38, %v2289_v59 }
 0x7a7   : > { %v2035_v33 = vmul.f32 1.442695, %v2013_v55  ;;  %v1879_v13 = vsel %vm1862_vm6, %v1876_v63, %v1878_v2  ;;  %v2371_v38 = vsel %vm1943_vm7, %v2368_v50, %v2370_v49 }
 0x7a8   : > { %v3447_v60 = vpop.eup %3446  ;;  %2555 = vperm.xlu0 %3313, %v3443_v62   ;;  %v2148_v18 = vmul.f32 1.442695, %v2125_v11  ;;  %v2033_v20 = vmul.f32 1.442695, %v2012_v37  ;;  %v2245_v10 = vmul.f32 1.442695, %v2223_v17 }
 0x7a9   : > { %v4880_v6 = vpop.eup %3448  ;;  %v2291_v15 = vrot.slane %v3447_v60, 5 }
 0x7aa   : > { %v2372_v34 = vrot.slane %v4880_v6, 2  ;;  %2551 = vperm.xlu2 %3311, %v4831_v35   ;;  %v3451_v32 = vpop.eup %3450  ;;  %3452 = vpow2.f32 %v2148_v18 }
 0x7ab   : > { %v2292_v23 = vsel %vm1862_vm6, %v2289_v59, %v2291_v15 }
 0x7ac   : > { %v2335_v43 = vadd.f32 %v3441_v61, %v2292_v23  ;;  %v2373_v58 = vsel %vm1943_vm7, %v2370_v49, %v2372_v34  ;;  %v2334_v61 = vadd.f32 %v4836_v51, %v2290_v9  ;;  %v1881_v23 = vsel %vm1862_vm6, %v1878_v2, %v1880_v54 }
 0x7ad   : > { %v1920_v55 = vmax.f32 %v4460_v47, %v1881_v23 }
 0x7ae   : > { %2906 = vperm.xlu1 %3312, %v3451_v32   ;;  %v2414_v24 = vadd.f32 %v2373_v58, %v2335_v43  ;;  %v2413_v5 = vadd.f32 %v2371_v38, %v2334_v61 }
 0x7b0   : > { %2741 = vperm.xlu0 %3313, %v4880_v6   ;;  %3454 = vrcp.f32 %v2414_v24  ;;  %v4902_v16 = vpop.eup %3452 }
 0x7b1   : > { %3456 = vpow2.f32 %v2033_v20  ;;  %v2293_v51 = vrot.slane %v4902_v16, 5 }
 0x7b2   : > { %2737 = vperm.xlu2 %3311, %v3445_v19   ;;  %3458 = vpow2.f32 %v2245_v10  ;;  %v1919_v19 = vmax.f32 %v4440_v7, %v1879_v13  ;;  %v1882_v10 = vrot.slane %v4725_v36, 5 }
 0x7b3   : > { %3460 = vpow2.f32 %v2035_v33  ;;  %v2294_v50 = vsel %vm1862_vm6, %v2291_v15, %v2293_v51 }
 0x7b4   : > { %3462 = vrcp.f32 %v2413_v5 }
 0x7b5   : > { %v4907_v62 = vpop.xlane.xlu0 %1821 }
 0x7b6   : > { %v3455_v35 = vpop.eup %3454  ;;  %v1959_v11 = vrot.slane %v4907_v62, 2  ;;  %2559 = vperm.xlu1 %3312, %v3447_v60  }
 0x7b7   : > { %v3457_v59 = vpop.eup %3456 }
 0x7b8   : > { %v1960_v63 = vsel %vm1943_vm7, %v1957_v21, %v1959_v11  ;;  %2916 = vperm.xlu0 %3313, %v3455_v35   ;;  %v4918_v37 = vpop.eup %3458  ;;  %v2336_v20 = vadd.f32 %v3457_v59, %v2294_v50 }
 0x7b9   : > { %v1998_v18 = vmax.f32 %v1919_v19, %v1960_v63  ;;  %v4925_v17 = vpop.eup %3460  ;;  %v2374_v21 = vrot.slane %v4918_v37, 2 }
 0x7ba   : > { %2469 = vperm.xlu2 %3311, %v3457_v59   ;;  %v3463_v9 = vpop.eup %3462 }
 0x7bb   : > { %v2084_v60 = vrot.slane %v1998_v18, 3  ;;  %v2183_v49 = vrot.slane %v1998_v18, 6  ;;  %v2014_v2 = vsub.f32 %v4440_v7, %v1998_v18 }
 0x7bd   : > { %v2085_v43 = vsel %vm462_vm1, %v2082_v27, %v2084_v60  ;;  %v2184_v32 = vsel %vm1271_vm4, %v2181_v39, %v2183_v49  ;;  %v4934_v58 = vpop.xlane.xlu1 %1824  ;;  %v2037_v13 = vmul.f32 1.442695, %v2014_v2 }
 0x7be   : > { %v2126_v15 = vsub.f32 %v4714_v30, %v2085_v43  ;;  %v1961_v24 = vrot.slane %v4934_v58, 2  ;;  %2474 = vperm.xlu1 %3312, %v4925_v17   ;;  %v2224_v40 = vsub.f32 %v4855_v53, %v2184_v32  ;;  %v2375_v30 = vsel %vm1943_vm7, %v2372_v34, %v2374_v21 }
 0x7bf   : > { %v2415_v61 = vadd.f32 %v2375_v30, %v2336_v20  ;;  %v1883_v53 = vsel %vm1862_vm6, %v1880_v54, %v1882_v10  ;;  %v1884_v54 = vrot.slane %v4729_v1, 5 }
 0x7c0   : > { %v2150_v27 = vmul.f32 1.442695, %v2126_v15  ;;  %v1962_v39 = vsel %vm1943_vm7, %v1959_v11, %v1961_v24  ;;  %v2247_v19 = vmul.f32 1.442695, %v2224_v40 }
 0x7c1   : > { %v1999_v33 = vmax.f32 %v1920_v55, %v1962_v39  ;;  %v1885_v32 = vsel %vm1862_vm6, %v1882_v10, %v1884_v54 }
 0x7c2   : > { %3464 = vpow2.f32 %v2150_v27  ;;  %2911 = vperm.xlu2 %3311, %v3463_v9   ;;  %v1922_v30 = vmax.f32 %v4511_v4, %v1885_v32 }
 0x7c3   : > { %v2015_v7 = vsub.f32 %v4460_v47, %v1999_v33  ;;  %v2086_v35 = vrot.slane %v1999_v33, 3  ;;  %v2185_v38 = vrot.slane %v1999_v33, 6  ;;  %3466 = vrcp.f32 %v2415_v61 }
 0x7c4   : > { %v1921_v47 = vmax.f32 %v4458_v41, %v1883_v53  ;;  %3468 = vpow2.f32 %v2037_v13 }
 0x7c5   : > { %v2039_v11 = vmul.f32 1.442695, %v2015_v7  ;;  %v2087_v5 = vsel %vm462_vm1, %v2084_v60, %v2086_v35  ;;  %v2186_v63 = vsel %vm1271_vm4, %v2183_v49, %v2185_v38  ;;  %v4953_v59 = vpop.xlane.xlu2 %1827  ;;  %3470 = vpow2.f32 %v2247_v19 }
 0x7c6   : > { %v2127_v6 = vsub.f32 %v4719_v26, %v2087_v5  ;;  %v2225_v34 = vsub.f32 %v4907_v62, %v2186_v63  ;;  %v1963_v18 = vrot.slane %v4953_v59, 2  ;;  %2745 = vperm.xlu1 %3312, %v4918_v37  }
 0x7c7   : > { %3472 = vpow2.f32 %v2039_v11 }
 0x7c8   : > { %v3465_v50 = vpop.eup %3464  ;;  %v2152_v60 = vmul.f32 1.442695, %v2127_v6  ;;  %v2249_v49 = vmul.f32 1.442695, %v2225_v34  ;;  %v1964_v23 = vsel %vm1943_vm7, %v1961_v24, %v1963_v18  ;;  %v1886_v34 = vrot.slane %v4736_v25, 5 }
 0x7c9   : > { %v4962_v26 = vmax.f32 %v1921_v47, %v1964_v23  ;;  %2567 = vperm.xlu0 %3313, %v3465_v50   ;;  %v3467_v43 = vpop.eup %3466  ;;  %v2295_v15 = vrot.slane %v3465_v50, 5 }
 0x7ca   : > { %3474 = vpow2.f32 %v2152_v60  ;;  %2563 = vperm.xlu2 %3311, %v4902_v16   ;;  %v3469_v55 = vpop.eup %3468  ;;  %v1887_v23 = vsel %vm1862_vm6, %v1884_v54, %v1886_v34 }
 0x7cb   : > { %3476 = vpow2.f32 %v2249_v49  ;;  %v2088_v62 = vrot.slane %v4962_v26, 3  ;;  %v2187_v20 = vrot.slane %v4962_v26, 6  ;;  %v3471_v27 = vpop.eup %3470  ;;  %v2016_v10 = vsub.f32 %v4458_v41, %v4962_v26 }
 0x7cc   : > { %v2296_v7 = vsel %vm1862_vm6, %v2293_v51, %v2295_v15  ;;  %v2376_v5 = vrot.slane %v3471_v27, 2 }
 0x7cd   : > { %v2089_v2 = vsel %vm462_vm1, %v2086_v35, %v2088_v62  ;;  %v4969_v24 = vpop.xlane.xlu0 %1830  ;;  %v2188_v39 = vsel %vm1271_vm4, %v2185_v38, %v2187_v20  ;;  %v3473_v33 = vpop.eup %3472  ;;  %v2337_v51 = vadd.f32 %v4925_v17, %v2296_v7  ;;  %v1888_v7 = vrot.slane %v4734_v42, 5 }
 0x7ce   : > { %v2128_v40 = vsub.f32 %v4727_v46, %v2089_v2  ;;  %v1965_v9 = vrot.slane %v4969_v24, 2  ;;  %2921 = vperm.xlu1 %3312, %v3467_v43   ;;  %v2226_v61 = vsub.f32 %v4934_v58, %v2188_v39  ;;  %v2041_v58 = vmul.f32 1.442695, %v2016_v10 }
 0x7cf   : > { %v2377_v49 = vsel %vm1943_vm7, %v2374_v21, %v2376_v5 }
 0x7d0   : > { %v3475_v13 = vpop.eup %3474  ;;  %v2154_v35 = vmul.f32 1.442695, %v2128_v40  ;;  %v1966_v46 = vsel %vm1943_vm7, %v1963_v18, %v1965_v9  ;;  %v2251_v19 = vmul.f32 1.442695, %v2226_v61  ;;  %v2416_v26 = vadd.f32 %v2377_v49, %v2337_v51 }
 0x7d1   : > { %v3477_v38 = vpop.eup %3476  ;;  %v2297_v53 = vrot.slane %v3475_v13, 5  ;;  %v4982_v11 = vmax.f32 %v1922_v30, %v1966_v46  ;;  %2484 = vperm.xlu0 %3313, %v3473_v33  }
 0x7d2   : > { %v2378_v63 = vrot.slane %v3477_v38, 2  ;;  %3478 = vpow2.f32 %v2154_v35  ;;  %2479 = vperm.xlu2 %3311, %v3469_v55  }
 0x7d3   : > { %v2298_v41 = vsel %vm1862_vm6, %v2295_v15, %v2297_v53  ;;  %v2090_v16 = vrot.slane %v4982_v11, 3  ;;  %3480 = vpow2.f32 %v2251_v19  ;;  %v2189_v37 = vrot.slane %v4982_v11, 6 }
 0x7d4   : > { %v2338_v6 = vadd.f32 %v3469_v55, %v2298_v41  ;;  %v2379_v47 = vsel %vm1943_vm7, %v2376_v5, %v2378_v63  ;;  %3482 = vpow2.f32 %v2041_v58  ;;  %v1923_v55 = vmax.f32 %v4543_v45, %v1887_v23 }
 0x7d5   : > { %v4988_v18 = vpop.xlane.xlu1 %1833  ;;  %v2091_v17 = vsel %vm462_vm1, %v2088_v62, %v2090_v16  ;;  %v2190_v30 = vsel %vm1271_vm4, %v2187_v20, %v2189_v37  ;;  %v2017_v46 = vsub.f32 %v4511_v4, %v4982_v11  ;;  %v1889_v4 = vsel %vm1862_vm6, %v1886_v34, %v1888_v7 }
 0x7d6   : > { %v1967_v50 = vrot.slane %v4988_v18, 2  ;;  %2571 = vperm.xlu1 %3312, %v3475_v13   ;;  %v2417_v60 = vadd.f32 %v2379_v47, %v2338_v6  ;;  %v2129_v2 = vsub.f32 %v4725_v36, %v2091_v17  ;;  %v2227_v35 = vsub.f32 %v4953_v59, %v2190_v30 }
 0x7d7   : > { %v1892_v11 = vrot.slane %v4749_v22, 5  ;;  %v1894_v58 = vrot.slane %v4746_v0, 5  ;;  %v2043_v51 = vmul.f32 1.442695, %v2017_v46  ;;  %v1924_v17 = vmax.f32 %v4587_v56, %v1889_v4 }
 0x7d8   : > { %v4997_v43 = vpop.eup %3478  ;;  %v1968_v15 = vsel %vm1943_vm7, %v1965_v9, %v1967_v50  ;;  %3484 = vrcp.f32 %v2417_v60  ;;  %v2156_v36 = vmul.f32 1.442695, %v2129_v2  ;;  %v2253_v5 = vmul.f32 1.442695, %v2227_v35 }
 0x7d9   : > { %v2299_v32 = vrot.slane %v4997_v43, 5  ;;  %2753 = vperm.xlu0 %3313, %v3477_v38   ;;  %v5004_v21 = vpop.eup %3480  ;;  %3486 = vrcp.f32 %v2416_v26  ;;  %v5009_v62 = vmax.f32 %v1923_v55, %v1968_v15  ;;  %v1895_v55 = vsel %vm1862_vm6, %v1892_v11, %v1894_v58 }
 0x7da   : > { %2749 = vperm.xlu2 %3311, %v3471_v27   ;;  %v5011_v40 = vpop.eup %3482  ;;  %v2380_v9 = vrot.slane %v5004_v21, 2  ;;  %3488 = vpow2.f32 %v2156_v36 }
 0x7db   : > { %v2300_v54 = vsel %vm1862_vm6, %v2297_v53, %v2299_v32  ;;  %v2092_v61 = vrot.slane %v5009_v62, 3  ;;  %v2018_v38 = vsub.f32 %v4543_v45, %v5009_v62 }
 0x7dc   : > { %v2339_v27 = vadd.f32 %v3473_v33, %v2300_v54  ;;  %v2381_v20 = vsel %vm1943_vm7, %v2378_v63, %v2380_v9  ;;  %v2191_v33 = vrot.slane %v5009_v62, 6  ;;  %v1890_v63 = vrot.slane %v4738_v57, 5 }
 0x7dd   : > { %v5013_v39 = vpop.xlane.xlu2 %1836  ;;  %v2093_v59 = vsel %vm462_vm1, %v2090_v16, %v2092_v61  ;;  %v2045_v6 = vmul.f32 1.442695, %v2018_v38  ;;  %v5041_v47 = vpop.xlane.xlu1 %1843 }
 0x7de   : > { %2489 = vperm.xlu1 %3312, %v5011_v40   ;;  %v3485_v10 = vpop.eup %3484  ;;  %v2418_v53 = vadd.f32 %v2381_v20, %v2339_v27  ;;  %v1969_v19 = vrot.slane %v5013_v39, 2  ;;  %v2130_v16 = vsub.f32 %v4729_v1, %v2093_v59  ;;  %v2192_v34 = vsel %vm1271_vm4, %v2189_v37, %v2191_v33 }
 0x7df   : > { %v3487_v13 = vpop.eup %3486  ;;  %v1893_v26 = vsel %vm1862_vm6, %v1890_v63, %v1892_v11  ;;  %v1973_v15 = vrot.slane %v5041_v47, 2  ;;  %v2228_v1 = vsub.f32 %v4969_v24, %v2192_v34  ;;  %v1891_v20 = vsel %vm1862_vm6, %v1888_v7, %v1890_v63 }
 0x7e0   : > { %3490 = vrcp.f32 %v2418_v53  ;;  %v5047_v49 = vpop.eup %3488  ;;  %v1970_v23 = vsel %vm1943_vm7, %v1967_v50, %v1969_v19  ;;  %v2158_v2 = vmul.f32 1.442695, %v2130_v16  ;;  %v1926_v54 = vmax.f32 %v4628_v3, %v1893_v26 }
 0x7e1   : > { %2931 = vperm.xlu0 %3313, %v3485_v10   ;;  %3492 = vpow2.f32 %v2253_v5  ;;  %v5057_v37 = vmax.f32 %v1924_v17, %v1970_v23  ;;  %v2301_v36 = vrot.slane %v5047_v49, 5  ;;  %v2255_v10 = vmul.f32 1.442695, %v2228_v1 }
 0x7e2   : > { %2926 = vperm.xlu2 %3311, %v3487_v13   ;;  %3494 = vpow2.f32 %v2045_v6  ;;  %v1927_v13 = vmax.f32 %v4696_v31, %v1895_v55 }
 0x7e3   : > { %3496 = vpow2.f32 %v2043_v51  ;;  %v2019_v46 = vsub.f32 %v4587_v56, %v5057_v37  ;;  %v2302_v53 = vsel %vm1862_vm6, %v2299_v32, %v2301_v36  ;;  %v2193_v59 = vrot.slane %v5057_v37, 6 }
 0x7e4   : > { %3498 = vpow2.f32 %v2158_v2  ;;  %v5076_v4 = vmax.f32 %v1927_v13, %v1973_v15  ;;  %v2094_v63 = vrot.slane %v5057_v37, 3  ;;  %v2340_v58 = vadd.f32 %v5011_v40, %v2302_v53 }
 0x7e5   : > { %v5035_v45 = vpop.xlane.xlu0 %1839  ;;  %v5037_v41 = vpop.permute.xlu2 %2444  ;;  %3500 = vpow2.f32 %v2255_v10  ;;  %v2047_v32 = vmul.f32 1.442695, %v2019_v46  ;;  %v2194_v51 = vsel %vm1271_vm4, %v2191_v33, %v2193_v59 }
 0x7e6   : > { %2757 = vperm.xlu1 %3312, %v5004_v21   ;;  %v1971_v60 = vrot.slane %v5035_v45, 2  ;;  %v3491_v30 = vpop.eup %3490  ;;  %v2100_v6 = vrot.slane %v5076_v4, 3  ;;  %v2095_v33 = vsel %vm462_vm1, %v2092_v61, %v2094_v63 }
 0x7e7   : > { %v5065_v35 = vpop.eup %3492  ;;  %3502 = vpow2.f32 %v2047_v32  ;;  %v2131_v62 = vsub.f32 %v4736_v25, %v2095_v33  ;;  %v2022_v25 = vsub.f32 %v4696_v31, %v5076_v4 }
 0x7e8   : > { %v1974_v50 = vsel %vm1943_vm7, %v1971_v60, %v1973_v15  ;;  %v5069_v38 = vpop.eup %3494  ;;  %v2382_v5 = vrot.slane %v5065_v35, 2  ;;  %v1972_v56 = vsel %vm1943_vm7, %v1969_v19, %v1971_v60  ;;  %v2229_v60 = vsub.f32 %v4988_v18, %v2194_v51 }
 0x7e9   : > { %2579 = vperm.xlu0 %3313, %v5047_v49   ;;  %v5063_v24 = vmax.f32 %v1926_v54, %v1974_v50  ;;  %v5078_v11 = vpop.eup %3496  ;;  %v2135_v17 = vsub.f32 %v4746_v0, %v2100_v6  ;;  %v2160_v54 = vmul.f32 1.442695, %v2131_v62  ;;  %v2053_v32 = vmul.f32 1.442695, %v2022_v25  ;;  %v5429_v25 = vld [vmem:[#allocation2_spill] sm:$0xff] }
 0x7ea   : > { %2575 = vperm.xlu2 %3311, %v4997_v43   ;;  %v1925_v43 = vmax.f32 %v4606_v14, %v1891_v20  ;;  %v5093_v16 = vpop.eup %3498  ;;  %v2383_v40 = vsel %vm1943_vm7, %v2380_v9, %v2382_v5  ;;  %v2257_v18 = vmul.f32 1.442695, %v2229_v60 }
 0x7eb   : > { %v2021_v7 = vsub.f32 %v4628_v3, %v5063_v24  ;;  %v2419_v49 = vadd.f32 %v2383_v40, %v2340_v58  ;;  %v5107_v23 = vpop.eup %3500  ;;  %v2303_v21 = vrot.slane %v5093_v16, 5  ;;  %v2098_v9 = vrot.slane %v5063_v24, 3 }
 0x7ec   : > { %v5095_v19 = vmax.f32 %v1925_v43, %v1972_v56  ;;  %v2168_v61 = vmul.f32 1.442695, %v2135_v17 }
 0x7ed   : > { %v2540_v27 = vpop.permute.xlu2 %2539  ;;  %v2051_v34 = vmul.f32 1.442695, %v2021_v7  ;;  %v5118_v0 = vpop.eup %3502  ;;  %v2304_v50 = vsel %vm1862_vm6, %v2301_v36, %v2303_v21  ;;  %v2384_v36 = vrot.slane %v5107_v23, 2 }
 0x7ee   : > { %2936 = vperm.xlu1 %3312, %v3491_v30   ;;  %v2096_v1 = vrot.slane %v5095_v19, 3  ;;  %v2621_v10 = vmul.f32 %v2540_v27, %v4221_v12  ;;  %v2195_v31 = vrot.slane %v5095_v19, 6  ;;  %v2101_v12 = vsel %vm462_vm1, %v2098_v9, %v2100_v6 }
 0x7ef   : > { %3504 = vpow2.f32 %v2051_v34  ;;  %v2197_v27 = vrot.slane %v5063_v24, 6  ;;  %v2522_v34 = vmul.f32 %v5037_v41, %v4062_v28 }
 0x7f0   : > { %3506 = vrcp.f32 %v2419_v49  ;;  %v2097_v55 = vsel %vm462_vm1, %v2094_v63, %v2096_v1  ;;  %v2099_v30 = vsel %vm462_vm1, %v2096_v1, %v2098_v9  ;;  %v2341_v63 = vadd.f32 %v5078_v11, %v2304_v50 }
 0x7f1   : > { %2499 = vperm.xlu0 %3313, %v5069_v38   ;;  %3508 = vpow2.f32 %v2257_v18  ;;  %v2132_v53 = vsub.f32 %v4734_v42, %v2097_v55  ;;  %v2020_v42 = vsub.f32 %v4606_v14, %v5095_v19  ;;  %v2655_v58 = vrot.slane %v2621_v10, 5 }
 0x7f2   : > { %2494 = vperm.xlu2 %3311, %v5078_v11   ;;  %3510 = vpow2.f32 %v2168_v61  ;;  %v2198_v11 = vsel %vm1271_vm4, %v2195_v31, %v2197_v27 }
 0x7f3   : > { %3512 = vpow2.f32 %v2160_v54  ;;  %v2162_v24 = vmul.f32 1.442695, %v2132_v53  ;;  %v2049_v41 = vmul.f32 1.442695, %v2020_v42 }
 0x7f4   : > { %3514 = vpow2.f32 %v2053_v32 }
 0x7f5   : > { %v2726_v3 = vpop.permute.xlu2 %2725  ;;  %v2722_v26 = vpop.permute.xlu1 %2721  ;;  %3516 = vpow2.f32 %v2162_v24 }
 0x7f6   : > { %2583 = vperm.xlu1 %3312, %v5093_v16   ;;  %v5132_v13 = vmul.f32 %v2726_v3, %v4566_v44  ;;  %v2799_v46 = vmul.f32 %v2722_v26, %v4553_v29  ;;  %v5135_v20 = vpop.eup %3504  ;;  %v2133_v44 = vsub.f32 %v4738_v57, %v2099_v30  ;;  %v2134_v57 = vsub.f32 %v4749_v22, %v2101_v12  ;;  %v5430_v12 = vld [vmem:[#allocation17_spill] sm:$0xff] }
 0x7f7   : > { %v3507_v43 = vpop.eup %3506  ;;  %v2385_v22 = vsel %vm1943_vm7, %v2382_v5, %v2384_v36  ;;  %v2199_v26 = vrot.slane %v5076_v4, 6 }
 0x7f8   : > { %v5110_v15 = vpop.permute.xlu0 %2449  ;;  %v2832_v51 = vrot.slane %v5132_v13, 2  ;;  %v2831_v6 = vrot.slane %v2799_v46, 2  ;;  %v5157_v40 = vpop.eup %3508  ;;  %v2164_v14 = vmul.f32 1.442695, %v2133_v44  ;;  %v2420_v28 = vadd.f32 %v2385_v22, %v2341_v63 }
 0x7f9   : > { %2765 = vperm.xlu0 %3313, %v5107_v23   ;;  %v5166_v37 = vpop.eup %3510  ;;  %v5434_v23 = vld [vmem:[#allocation18_spill] sm:$0xff] }
 0x7fa   : > { %2761 = vperm.xlu2 %3311, %v5065_v35   ;;  %v2833_v49 = vsel %vm1943_vm7, %v2831_v6, %v2832_v51  ;;  %v5171_v17 = vpop.eup %3512  ;;  %v2231_v35 = vsub.f32 %v5035_v45, %v2198_v11  ;;  %3518 = vpow2.f32 %v2164_v14  ;;  %v2200_v45 = vsel %vm1271_vm4, %v2197_v27, %v2199_v26 }
 0x7fb   : > { %3520 = vrcp.f32 %v2420_v28  ;;  %v2232_v30 = vsub.f32 %v5041_v47, %v2200_v45  ;;  %v2305_v53 = vrot.slane %v5171_v17, 5 }
 0x7fc   : > { %3522 = vpow2.f32 %v2049_v41  ;;  %v2261_v54 = vmul.f32 1.442695, %v2231_v35 }
 0x7fd   : > { %v5121_v2 = vpop.permute.xlu2 %2459  ;;  %v2263_v32 = vmul.f32 1.442695, %v2232_v30  ;;  %v2306_v42 = vsel %vm1862_vm6, %v2303_v21, %v2305_v53 }
 0x7fe   : > { %2504 = vperm.xlu1 %3312, %v5118_v0   ;;  %v2342_v16 = vadd.f32 %v5069_v38, %v2306_v42 }
 0x800   : > { %v2544_v56 = vpop.permute.xlu0 %2543  ;;  %v5140_v7 = vpop.permute.xlu1 %2454 }
 0x801   : > { %v2622_v29 = vmul.f32 %v2544_v56, %v4228_v48  ;;  %2514 = vperm.xlu0 %3313, %v5135_v20   ;;  %v2196_v48 = vsel %vm1271_vm4, %v2193_v59, %v2195_v31 }
 0x802   : > { %2941 = vperm.xlu2 %3311, %v3507_v43   ;;  %v2230_v60 = vsub.f32 %v5013_v39, %v2196_v48  ;;  %v2166_v39 = vmul.f32 1.442695, %v2134_v57  ;;  %v2386_v57 = vrot.slane %v5157_v40, 2  ;;  %v5431_v48 = vld [vmem:[#allocation31_spill] sm:$0xff] }
 0x803   : > { %v2656_v3 = vrot.slane %v2622_v29, 5 }
 0x804   : > { %v2259_v61 = vmul.f32 1.442695, %v2230_v60  ;;  %3524 = vpow2.f32 %v2166_v39  ;;  %v2387_v41 = vsel %vm1943_vm7, %v2384_v36, %v2386_v57 }
 0x805   : > { %v2657_v19 = vsel %vm1862_vm6, %v2655_v58, %v2656_v3  ;;  %v2897_v33 = vpop.permute.xlu2 %2896  ;;  %v2421_v26 = vadd.f32 %v2387_v41, %v2342_v16 }
 0x806   : > { %v2704_v59 = vadd.f32 %v2657_v19, %v2522_v34  ;;  %2769 = vperm.xlu1 %3312, %v5157_v40   ;;  %3526 = vpow2.f32 %v2259_v61  ;;  %v2313_v61 = vrot.slane %v5166_v37, 5 }
 0x807   : > { %3528 = vpow2.f32 %v2261_v54 }
 0x808   : > { %v2878_v5 = vadd.f32 %v2833_v49, %v2704_v59  ;;  %v2730_v1 = vpop.permute.xlu0 %2729  ;;  %v2548_v62 = vpop.permute.xlu1 %2547  ;;  %3530 = vpow2.f32 %v2263_v32 }
 0x809   : > { %v5183_v9 = vmul.f32 %v2730_v1, %v4573_v8  ;;  %v2623_v4 = vmul.f32 %v2548_v62, %v4238_v52  ;;  %2603 = vperm.xlu0 %3313, %v5166_v37   ;;  %v2523_v8 = vmul.f32 %v5110_v15, %v5429_v25  ;;  %v5194_v52 = vpop.eup %3514  ;;  %3532 = vrcp.f32 %v2421_v26 }
 0x80a   : > { %v2974_v18 = vmul.f32 %v2897_v33, %v2878_v5  ;;  %2587 = vperm.xlu2 %3311, %v5171_v17   ;;  %v3517_v46 = vpop.eup %3516  ;;  %v5432_v17 = vld [vmem:[#allocation3_spill] sm:$0xff] }
 0x80b   : > { %v2834_v55 = vrot.slane %v5183_v9, 2  ;;  %v2658_v50 = vrot.slane %v2623_v4, 5  ;;  %v3519_v56 = vpop.eup %3518  ;;  %v2307_v6 = vrot.slane %v3517_v46, 5  ;;  %v2524_v38 = vmul.f32 %v5140_v7, %v5432_v17  ;;  %v5433_v4 = vld [vmem:[#allocation33_spill] sm:$0xff] }
 0x80c   : > { %2990 = vst.msk [vmem:[%s5180_s17] sm:$0xff] %vm298_vm0, %v2974_v18  ;;  %v3521_v43 = vpop.eup %3520 }
 0x80d   : > { %v2552_v10 = vpop.permute.xlu2 %2551  ;;  %v2659_v13 = vsel %vm1862_vm6, %v2656_v3, %v2658_v50  ;;  %v2835_v15 = vsel %vm1943_vm7, %v2832_v51, %v2834_v55  ;;  %v3523_v29 = vpop.eup %3522  ;;  %v2309_v3 = vrot.slane %v3519_v56, 5  ;;  %v2308_v22 = vsel %vm1862_vm6, %v2305_v53, %v2307_v6 }
 0x80e   : > { %2519 = vperm.xlu1 %3312, %v5194_v52   ;;  %v2705_v31 = vadd.f32 %v2659_v13, %v2523_v8  ;;  %v2624_v44 = vmul.f32 %v2552_v10, %v5430_v12  ;;  %v3525_v58 = vpop.eup %3524  ;;  %v2343_v39 = vadd.f32 %v5118_v0, %v2308_v22  ;;  %v5435_v13 = vld [vmem:[#allocation4_spill] sm:$0xff] }
 0x80f   : > { %v3527_v14 = vpop.eup %3526  ;;  %v2311_v21 = vrot.slane %v3525_v58, 5  ;;  %v2310_v33 = vsel %vm1862_vm6, %v2307_v6, %v2309_v3 }
 0x810   : > { %v2734_v47 = vpop.permute.xlu1 %2733  ;;  %v2879_v27 = vadd.f32 %v2835_v15, %v2705_v31  ;;  %v2660_v24 = vrot.slane %v2624_v44, 5  ;;  %v3529_v19 = vpop.eup %3528  ;;  %v2388_v60 = vrot.slane %v3527_v14, 2  ;;  %v2344_v5 = vadd.f32 %v3523_v29, %v2310_v33 }
 0x811   : > { %2946 = vperm.xlu0 %3313, %v3521_v43   ;;  %v2802_v34 = vmul.f32 %v2734_v47, %v5431_v48  ;;  %v2390_v49 = vrot.slane %v3529_v19, 2  ;;  %v2312_v35 = vsel %vm1862_vm6, %v2309_v3, %v2311_v21  ;;  %v3531_v62 = vpop.eup %3530  ;;  %v2314_v53 = vsel %vm1862_vm6, %v2311_v21, %v2313_v61 }
 0x812   : > { %v2902_v63 = vpop.permute.xlu0 %2901  ;;  %2509 = vperm.xlu2 %3311, %v3523_v29   ;;  %v2661_v40 = vsel %vm1862_vm6, %v2658_v50, %v2660_v24  ;;  %v2345_v50 = vadd.f32 %v5135_v20, %v2312_v35  ;;  %v2389_v0 = vsel %vm1943_vm7, %v2386_v57, %v2388_v60  ;;  %v2392_v30 = vrot.slane %v3531_v62, 2  ;;  %v3533_v12 = vpop.eup %3532  ;;  %v5437_v57 = vld [vmem:[#allocation19_spill] sm:$0xff] }
 0x813   : > { %v2975_v51 = vmul.f32 %v2902_v63, %v2879_v27  ;;  %v2836_v59 = vrot.slane %v2802_v34, 2  ;;  %v2706_v36 = vadd.f32 %v2661_v40, %v2524_v38  ;;  %v2391_v54 = vsel %vm1943_vm7, %v2388_v60, %v2390_v49 }
 0x814   : > { %v2423_v10 = vadd.f32 %v2391_v54, %v2344_v5  ;;  %v2422_v37 = vadd.f32 %v2389_v0, %v2343_v39  ;;  %v2393_v43 = vsel %vm1943_vm7, %v2390_v49, %v2392_v30  ;;  %v5439_v49 = vld [vmem:[#allocation20_spill] sm:$0xff]  ;;  %v5441_v39 = vld [vmem:[#allocation6_spill] sm:$0xff] }
 0x815   : > { %2991 = vst.msk [vmem:[%s5180_s17 + $0x8] sm:$0xff] %vm298_vm0, %v2975_v51  ;;  %v2738_v11 = vpop.permute.xlu2 %2737  ;;  %v2837_v7 = vsel %vm1943_vm7, %v2834_v55, %v2836_v59  ;;  %v2424_v44 = vadd.f32 %v2393_v43, %v2345_v50  ;;  %v5440_v5 = vld [vmem:[#allocation32_spill] sm:$0xff] }
 0x816   : > { %2595 = vperm.xlu1 %3312, %v3519_v56   ;;  %v2803_v45 = vmul.f32 %v2738_v11, %v5433_v4  ;;  %v2880_v55 = vadd.f32 %v2837_v7, %v2706_v36  ;;  %3534 = vrcp.f32 %v2423_v10  ;;  %v5444_v10 = vld [vmem:[#allocation7_spill] sm:$0xff] }
 0x817   : > { %3536 = vrcp.f32 %v2422_v37 }
 0x818   : > { %v5214_v28 = vpop.permute.xlu1 %2464  ;;  %v2838_v9 = vrot.slane %v2803_v45, 2  ;;  %3538 = vrcp.f32 %v2424_v44 }
 0x819   : > { %2591 = vperm.xlu0 %3313, %v3517_v46   ;;  %v2525_v46 = vmul.f32 %v5121_v2, %v5435_v13  ;;  %v2346_v2 = vadd.f32 %v5194_v52, %v2314_v53 }
 0x81a   : > { %v2556_v1 = vpop.permute.xlu0 %2555  ;;  %2599 = vperm.xlu2 %3311, %v3525_v58   ;;  %v2839_v47 = vsel %vm1943_vm7, %v2836_v59, %v2838_v9  ;;  %v5436_v58 = vld [vmem:[#allocation35_spill] sm:$0xff] }
 0x81b   : > { %v2625_v18 = vmul.f32 %v2556_v1, %v5434_v23  ;;  %v2425_v63 = vadd.f32 %v2392_v30, %v2346_v2 }
 0x81c   : > { %v3535_v3 = vpop.eup %3534 }
 0x81d   : > { %v2662_v25 = vrot.slane %v2625_v18, 5  ;;  %v5232_v8 = vpop.permute.xlu2 %2469  ;;  %v3537_v52 = vpop.eup %3536  ;;  %3540 = vrcp.f32 %v2425_v63  ;;  %v5442_v18 = vld [vmem:[#allocation21_spill] sm:$0xff] }
 0x81e   : > { %2781 = vperm.xlu1 %3312, %v3531_v62   ;;  %v3539_v16 = vpop.eup %3538  ;;  %v2527_v4 = vmul.f32 %v5232_v8, %v5441_v39  ;;  %v5453_v39 = vld [vmem:[#allocation10_spill] sm:$0xff] }
 0x81f   : > { %v2663_v20 = vsel %vm1862_vm6, %v2660_v24, %v2662_v25 }
 0x820   : > { %v2907_v31 = vpop.permute.xlu1 %2906  ;;  %v2707_v56 = vadd.f32 %v2663_v20, %v2525_v46 }
 0x821   : > { %v2976_v15 = vmul.f32 %v2907_v31, %v2880_v55  ;;  %2777 = vperm.xlu0 %3313, %v3529_v19  }
 0x822   : > { %2773 = vperm.xlu2 %3311, %v3527_v14   ;;  %v2742_v27 = vpop.permute.xlu0 %2741  ;;  %v2881_v29 = vadd.f32 %v2839_v47, %v2707_v56  ;;  %v5438_v14 = vld [vmem:[#allocation5_spill] sm:$0xff] }
 0x823   : > { %2992 = vst.msk [vmem:[%s5180_s17 + $0x10] sm:$0xff] %vm298_vm0, %v2976_v15  ;;  %v2804_v6 = vmul.f32 %v2742_v27, %v5436_v58  ;;  %v2526_v11 = vmul.f32 %v5214_v28, %v5438_v14  ;;  %v3541_v41 = vpop.eup %3540  ;;  %v5446_v27 = vld [vmem:[#allocation8_spill] sm:$0xff] }
 0x825   : > { %v2912_v32 = vpop.permute.xlu2 %2911  ;;  %v2840_v48 = vrot.slane %v2804_v6, 2 }
 0x826   : > { %v2977_v42 = vmul.f32 %v2912_v32, %v2881_v29  ;;  %2951 = vperm.xlu1 %3312, %v3533_v12   ;;  %v5445_v12 = vld [vmem:[#allocation22_spill] sm:$0xff]  ;;  %v5447_v32 = vld [vmem:[#allocation39_spill] sm:$0xff] }
 0x827   : > { %v2841_v22 = vsel %vm1943_vm7, %v2838_v9, %v2840_v48 }
 0x828   : > { %2993 = vst.msk [vmem:[%s5180_s17 + $0x18] sm:$0xff] %vm298_vm0, %v2977_v42  ;;  %v2560_v51 = vpop.permute.xlu1 %2559 }
 0x829   : > { %v2626_v24 = vmul.f32 %v2560_v51, %v5437_v57  ;;  %2961 = vperm.xlu0 %3313, %v3535_v3   ;;  %v5448_v57 = vld [vmem:[#allocation23_spill] sm:$0xff] }
 0x82a   : > { %2956 = vperm.xlu2 %3311, %v3537_v52   ;;  %v2917_v60 = vpop.permute.xlu0 %2916 }
 0x82b   : > { %v2664_v34 = vrot.slane %v2626_v24, 5 }
 0x82d   : > { %v2665_v19 = vsel %vm1862_vm6, %v2662_v25, %v2664_v34  ;;  %v2564_v21 = vpop.permute.xlu2 %2563  ;;  %v5443_v25 = vld [vmem:[#allocation37_spill] sm:$0xff] }
 0x82e   : > { %v2708_v33 = vadd.f32 %v2665_v19, %v2526_v11  ;;  %2966 = vperm.xlu1 %3312, %v3539_v16   ;;  %v2627_v17 = vmul.f32 %v2564_v21, %v5439_v49  ;;  %v5449_v21 = vld [vmem:[#allocation34_spill] sm:$0xff]  ;;  %v5451_v49 = vld [vmem:[#allocation24_spill] sm:$0xff] }
 0x830   : > { %v2882_v59 = vadd.f32 %v2841_v22, %v2708_v33  ;;  %v2475_v40 = vpop.permute.xlu1 %2474  ;;  %v2666_v26 = vrot.slane %v2627_v17, 5 }
 0x831   : > { %v2528_v13 = vmul.f32 %v2475_v40, %v5444_v10 }
 0x832   : > { %v2978_v38 = vmul.f32 %v2917_v60, %v2882_v59  ;;  %2971 = vperm.xlu2 %3311, %v3541_v41   ;;  %v2667_v62 = vsel %vm1862_vm6, %v2664_v34, %v2666_v26  ;;  %v5450_v59 = vld [vmem:[#allocation9_spill] sm:$0xff] }
 0x833   : > { %v2709_v61 = vadd.f32 %v2667_v62, %v2527_v4 }
 0x834   : > { %2994 = vst.msk [vmem:[%s5180_s17 + $0x20] sm:$0xff] %vm298_vm0, %v2978_v38 }
 0x835   : > { %v2480_v28 = vpop.permute.xlu2 %2479 }
 0x836   : > { %v2529_v29 = vmul.f32 %v2480_v28, %v5446_v27 }
 0x838   : > { %v2746_v35 = vpop.permute.xlu1 %2745 }
 0x839   : > { %v2805_v1 = vmul.f32 %v2746_v35, %v5440_v5  ;;  %v5452_v5 = vld [vmem:[#allocation40_spill] sm:$0xff] }
 0x83b   : > { %v2842_v45 = vrot.slane %v2805_v1, 2  ;;  %v2568_v23 = vpop.permute.xlu0 %2567 }
 0x83c   : > { %v2628_v36 = vmul.f32 %v2568_v23, %v5442_v18 }
 0x83d   : > { %v2750_v7 = vpop.permute.xlu2 %2749  ;;  %v2843_v50 = vsel %vm1943_vm7, %v2840_v48, %v2842_v45 }
 0x83e   : > { %v2668_v54 = vrot.slane %v2628_v36, 5  ;;  %v2806_v0 = vmul.f32 %v2750_v7, %v5443_v25  ;;  %v2883_v30 = vadd.f32 %v2843_v50, %v2709_v61 }
 0x840   : > { %v2844_v46 = vrot.slane %v2806_v0, 2  ;;  %v2922_v37 = vpop.permute.xlu1 %2921  ;;  %v2669_v8 = vsel %vm1862_vm6, %v2666_v26, %v2668_v54 }
 0x841   : > { %v2979_v9 = vmul.f32 %v2922_v37, %v2883_v30  ;;  %v2710_v55 = vadd.f32 %v2669_v8, %v2528_v13  ;;  %v5454_v37 = vld [vmem:[#allocation25_spill] sm:$0xff] }
 0x842   : > { %v2845_v20 = vsel %vm1943_vm7, %v2842_v45, %v2844_v46 }
 0x843   : > { %2995 = vst.msk [vmem:[%s5180_s17 + $0x28] sm:$0xff] %vm298_vm0, %v2979_v9  ;;  %v2485_v53 = vpop.permute.xlu0 %2484  ;;  %v2884_v31 = vadd.f32 %v2845_v20, %v2710_v55 }
 0x844   : > { %v2530_v40 = vmul.f32 %v2485_v53, %v5450_v59  ;;  %v5455_v53 = vld [vmem:[#allocation41_spill] sm:$0xff] }
 0x845   : > { %v2927_v56 = vpop.permute.xlu2 %2926 }
 0x846   : > { %v2980_v15 = vmul.f32 %v2927_v56, %v2884_v31 }
 0x848   : > { %2996 = vst.msk [vmem:[%s5180_s17 + $0x30] sm:$0xff] %vm298_vm0, %v2980_v15  ;;  %v2572_v43 = vpop.permute.xlu1 %2571 }
 0x849   : > { %v2629_v2 = vmul.f32 %v2572_v43, %v5445_v12 }
 0x84b   : > { %v2670_v44 = vrot.slane %v2629_v2, 5  ;;  %v2754_v47 = vpop.permute.xlu0 %2753  ;;  %v5456_v2 = vld [vmem:[#allocation11_spill] sm:$0xff] }
 0x84c   : > { %v2807_v42 = vmul.f32 %v2754_v47, %v5447_v32 }
 0x84d   : > { %v2576_v63 = vpop.permute.xlu2 %2575  ;;  %v2671_v58 = vsel %vm1862_vm6, %v2668_v54, %v2670_v44 }
 0x84e   : > { %v2846_v6 = vrot.slane %v2807_v42, 2  ;;  %v2711_v3 = vadd.f32 %v2671_v58, %v2529_v29  ;;  %v2630_v24 = vmul.f32 %v2576_v63, %v5448_v57  ;;  %v5458_v57 = vld [vmem:[#allocation26_spill] sm:$0xff] }
 0x850   : > { %v2490_v51 = vpop.permute.xlu1 %2489  ;;  %v2847_v52 = vsel %vm1943_vm7, %v2844_v46, %v2846_v6  ;;  %v2672_v11 = vrot.slane %v2630_v24, 5 }
 0x851   : > { %v2885_v48 = vadd.f32 %v2847_v52, %v2711_v3  ;;  %v2531_v4 = vmul.f32 %v2490_v51, %v5453_v39  ;;  %v5457_v3 = vld [vmem:[#allocation29_spill] sm:$0xff] }
 0x852   : > { %v2673_v22 = vsel %vm1862_vm6, %v2670_v44, %v2672_v11 }
 0x853   : > { %v2932_v34 = vpop.permute.xlu0 %2931  ;;  %v2712_v38 = vadd.f32 %v2673_v22, %v2530_v40  ;;  %v5462_v22 = vld [vmem:[#allocation28_spill] sm:$0xff] }
 0x854   : > { %v2981_v14 = vmul.f32 %v2932_v34, %v2885_v48  ;;  %v5459_v48 = vld [vmem:[#allocation30_spill] sm:$0xff] }
 0x855   : > { %v2495_v16 = vpop.permute.xlu2 %2494 }
 0x856   : > { %2997 = vst.msk [vmem:[%s5180_s17 + $0x38] sm:$0xff] %vm298_vm0, %v2981_v14  ;;  %v2532_v44 = vmul.f32 %v2495_v16, %v5456_v2  ;;  %v5460_v14 = vld [vmem:[#allocation42_spill] sm:$0xff] }
 0x858   : > { %v2758_v19 = vpop.permute.xlu1 %2757 }
 0x859   : > { %v2808_v33 = vmul.f32 %v2758_v19, %v5449_v21  ;;  %v5461_v19 = vld [vmem:[#allocation36_spill] sm:$0xff] }
 0x85b   : > { %v2848_v41 = vrot.slane %v2808_v33, 2  ;;  %v2580_v60 = vpop.permute.xlu0 %2579 }
 0x85c   : > { %v2631_v17 = vmul.f32 %v2580_v60, %v5451_v49 }
 0x85d   : > { %v2762_v26 = vpop.permute.xlu2 %2761  ;;  %v2849_v28 = vsel %vm1943_vm7, %v2846_v6, %v2848_v41 }
 0x85e   : > { %v2674_v35 = vrot.slane %v2631_v17, 5  ;;  %v2809_v1 = vmul.f32 %v2762_v26, %v5452_v5  ;;  %v2886_v62 = vadd.f32 %v2849_v28, %v2712_v38  ;;  %v5463_v17 = vld [vmem:[#allocation27_spill] sm:$0xff]  ;;  %v5464_v28 = vld [vmem:[#allocation13_spill] sm:$0xff]  ;;  %v5465_v5 = vld [vmem:[#allocation16_spill] sm:$0xff] }
 0x860   : > { %v2850_v45 = vrot.slane %v2809_v1, 2  ;;  %v2937_v23 = vpop.permute.xlu1 %2936  ;;  %v2675_v18 = vsel %vm1862_vm6, %v2672_v11, %v2674_v35 }
 0x861   : > { %v2982_v36 = vmul.f32 %v2937_v23, %v2886_v62  ;;  %v2713_v61 = vadd.f32 %v2675_v18, %v2531_v4  ;;  %v5466_v18 = vld [vmem:[#allocation38_spill] sm:$0xff] }
 0x862   : > { %v2851_v7 = vsel %vm1943_vm7, %v2848_v41, %v2850_v45 }
 0x863   : > { %2998 = vst.msk [vmem:[%s5180_s17 + $0x40] sm:$0xff] %vm298_vm0, %v2982_v36  ;;  %v2500_v50 = vpop.permute.xlu0 %2499  ;;  %v2887_v54 = vadd.f32 %v2851_v7, %v2713_v61 }
 0x865   : > { %v2942_v25 = vpop.permute.xlu2 %2941 }
 0x866   : > { %v2983_v0 = vmul.f32 %v2942_v25, %v2887_v54  ;;  %v5467_v25 = vld [vmem:[#allocation12_spill] sm:$0xff] }
 0x868   : > { %2999 = vst.msk [vmem:[%s5180_s17 + $0x48] sm:$0xff] %vm298_vm0, %v2983_v0  ;;  %v2584_v30 = vpop.permute.xlu1 %2583  ;;  %v2533_v0 = vmul.f32 %v2500_v50, %v5467_v25 }
 0x869   : > { %v2632_v8 = vmul.f32 %v2584_v30, %v5454_v37  ;;  %v5468_v37 = vld [vmem:[#allocation43_spill] sm:$0xff] }
 0x86b   : > { %v2766_v10 = vpop.permute.xlu0 %2765  ;;  %v2676_v20 = vrot.slane %v2632_v8, 5 }
 0x86c   : > { %v2810_v31 = vmul.f32 %v2766_v10, %v5455_v53 }
 0x86d   : > { %v2588_v13 = vpop.permute.xlu2 %2587  ;;  %v2677_v12 = vsel %vm1862_vm6, %v2674_v35, %v2676_v20 }
 0x86e   : > { %v2852_v15 = vrot.slane %v2810_v31, 2  ;;  %v2714_v27 = vadd.f32 %v2677_v12, %v2532_v44  ;;  %v2633_v24 = vmul.f32 %v2588_v13, %v5458_v57 }
 0x870   : > { %v2505_v46 = vpop.permute.xlu1 %2504  ;;  %v2853_v29 = vsel %vm1943_vm7, %v2850_v45, %v2852_v15  ;;  %v2678_v40 = vrot.slane %v2633_v24, 5 }
 0x871   : > { %v2888_v42 = vadd.f32 %v2853_v29, %v2714_v27  ;;  %v2534_v35 = vmul.f32 %v2505_v46, %v5464_v28 }
 0x872   : > { %v2679_v54 = vsel %vm1862_vm6, %v2676_v20, %v2678_v40 }
 0x873   : > { %v5291_v9 = vpop.permute.xlu0 %2514  ;;  %v2715_v44 = vadd.f32 %v2679_v54, %v2533_v0 }
 0x875   : > { %v2510_v55 = vpop.permute.xlu2 %2509 }
 0x878   : > { %v2770_v56 = vpop.permute.xlu1 %2769 }
 0x879   : > { %v2811_v21 = vmul.f32 %v2770_v56, %v5461_v19  ;;  %v5469_v56 = vld [vmem:[#allocation14_spill] sm:$0xff] }
 0x87b   : > { %v2604_v43 = vpop.permute.xlu0 %2603  ;;  %v2854_v62 = vrot.slane %v2811_v21, 2 }
 0x87c   : > { %v2637_v34 = vmul.f32 %v2604_v43, %v5459_v48  ;;  %v2535_v43 = vmul.f32 %v2510_v55, %v5469_v56 }
 0x87d   : > { %v2600_v47 = vpop.permute.xlu2 %2599  ;;  %v2855_v53 = vsel %vm1943_vm7, %v2852_v15, %v2854_v62 }
 0x87e   : > { %v2636_v51 = vmul.f32 %v2600_v47, %v5457_v3  ;;  %v2686_v60 = vrot.slane %v2637_v34, 5  ;;  %v2889_v27 = vadd.f32 %v2855_v53, %v2715_v44 }
 0x880   : > { %v2520_v32 = vpop.permute.xlu1 %2519  ;;  %v2684_v33 = vrot.slane %v2636_v51, 5 }
 0x881   : > { %v2537_v1 = vmul.f32 %v2520_v32, %v5465_v5 }
 0x882   : > { %v2687_v39 = vsel %vm1862_vm6, %v2684_v33, %v2686_v60 }
 0x883   : > { %v2947_v63 = vpop.permute.xlu0 %2946  ;;  %v2719_v30 = vadd.f32 %v2687_v39, %v2537_v1 }
 0x884   : > { %v2984_v58 = vmul.f32 %v2947_v63, %v2888_v42 }
 0x885   : > { %v2774_v6 = vpop.permute.xlu2 %2773 }
 0x886   : > { %3000 = vst.msk [vmem:[%s5180_s17 + $0x50] sm:$0xff] %vm298_vm0, %v2984_v58  ;;  %v2812_v11 = vmul.f32 %v2774_v6, %v5460_v14  ;;  %v5470_v58 = vld [vmem:[#allocation15_spill] sm:$0xff] }
 0x887   : > { %v2536_v6 = vmul.f32 %v5291_v9, %v5470_v58 }
 0x888   : > { %v2596_v52 = vpop.permute.xlu1 %2595  ;;  %v2856_v49 = vrot.slane %v2812_v11, 2 }
 0x889   : > { %v2635_v38 = vmul.f32 %v2596_v52, %v5463_v17 }
 0x88a   : > { %v2857_v7 = vsel %vm1943_vm7, %v2854_v62, %v2856_v49 }
 0x88b   : > { %v2592_v16 = vpop.permute.xlu0 %2591  ;;  %v2682_v61 = vrot.slane %v2635_v38, 5 }
 0x88c   : > { %v2634_v59 = vmul.f32 %v2592_v16, %v5462_v22 }
 0x88d   : > { %v2957_v41 = vpop.permute.xlu2 %2956  ;;  %v2685_v63 = vsel %vm1862_vm6, %v2682_v61, %v2684_v33 }
 0x88e   : > { %v2680_v26 = vrot.slane %v2634_v59, 5  ;;  %v2718_v57 = vadd.f32 %v2685_v63, %v2536_v6 }
 0x890   : > { %v2681_v4 = vsel %vm1862_vm6, %v2678_v40, %v2680_v26  ;;  %v2782_v45 = vpop.permute.xlu1 %2781  ;;  %v2683_v31 = vsel %vm1862_vm6, %v2680_v26, %v2682_v61 }
 0x891   : > { %v2716_v23 = vadd.f32 %v2681_v4, %v2534_v35  ;;  %v2814_v36 = vmul.f32 %v2782_v45, %v5466_v18  ;;  %v2717_v29 = vadd.f32 %v2683_v31, %v2535_v43 }
 0x893   : > { %v2890_v10 = vadd.f32 %v2857_v7, %v2716_v23  ;;  %v2860_v13 = vrot.slane %v2814_v36, 2  ;;  %v2778_v46 = vpop.permute.xlu0 %2777 }
 0x894   : > { %v2813_v8 = vmul.f32 %v2778_v46, %v5468_v37 }
 0x895   : > { %v2986_v12 = vmul.f32 %v2957_v41, %v2890_v10  ;;  %v2972_v2 = vpop.permute.xlu2 %2971  ;;  %v2893_v20 = vadd.f32 %v2860_v13, %v2719_v30 }
 0x896   : > { %v2858_v47 = vrot.slane %v2813_v8, 2 }
 0x897   : > { %3002 = vst.msk [vmem:[%s5180_s17 + $0x60] sm:$0xff] %vm298_vm0, %v2986_v12  ;;  %v2989_v50 = vmul.f32 %v2972_v2, %v2893_v20 }
 0x898   : > { %v2952_v32 = vpop.permute.xlu1 %2951  ;;  %v2859_v15 = vsel %vm1943_vm7, %v2856_v49, %v2858_v47  ;;  %v2861_v52 = vsel %vm1943_vm7, %v2858_v47, %v2860_v13 }
 0x899   : > { %3006 = vst.msk [vmem:[%s5180_s17 + $0x78] sm:$0x1f] %vm3005_vm8, %v2989_v50  ;;  %v2985_v42 = vmul.f32 %v2952_v32, %v2889_v27  ;;  %v2891_v55 = vadd.f32 %v2859_v15, %v2717_v29  ;;  %v2892_v24 = vadd.f32 %v2861_v52, %v2718_v57 }
 0x89b   : > { %3001 = vst.msk [vmem:[%s5180_s17 + $0x58] sm:$0xff] %vm298_vm0, %v2985_v42  ;;  %v2962_v3 = vpop.permute.xlu0 %2961 }
 0x89c   : > { %v2987_v51 = vmul.f32 %v2962_v3, %v2891_v55 }
 0x89e   : > { %3003 = vst.msk [vmem:[%s5180_s17 + $0x68] sm:$0xff] %vm298_vm0, %v2987_v51 }
 0x8a0   : > { %v2967_v48 = vpop.permute.xlu1 %2966 }
 0x8a1   : > { %v2988_v34 = vmul.f32 %v2967_v48, %v2892_v24 }
 0x8a3   : > { %3004 = vst.msk [vmem:[%s5180_s17 + $0x70] sm:$0xff] %vm298_vm0, %v2988_v34 }
 0x8a4 PF: > { %s15_s18 = sadd.s32 1, %s3550_s18  }
 0x8a5   : > { %p12_p4 = scmp.ge.s32.totalorder %s15_s18, 4  }
 0x8a7   :  { %14 = sbr.rel (!%p12_p4) target bundleno = 1 (0x1), region = 71 }

</bundles_post_ra>
